<compile_context>
chip_gen: v5e
topology: v5e:2x2
jax: 0.10.0
libtpu: 0.0.40
codegen_flags: <defaults>
</compile_context>

<pallas_src>
import functools

import jax
import jax.numpy as jnp
import numpy as np
from jax import lax
from jax.experimental import pallas as pl
from jax.experimental.pallas import tpu as pltpu

# ---------------- model hyper-params (small, consistent with the module) -----
DIM = 3            # input point dimension
C_DIM = 32         # latent code dimension
HIDDEN = 32        # hidden size
N_BLOCKS = 5       # number of ResnetBlockFC blocks
GAUSSIAN_VAL = 0.5
VAR = GAUSSIAN_VAL ** 2        # sample_mode == 'gaussian'
PAD_COORD = 1e4                # padded cloud points -> exp weight underflows to 0
AUG = DIM + 2                  # augmented coordinate: [x, y, z, ||.||^2, 1]

# aux slab row layout (all (., HIDDEN) rows):
#   row 0              : fc_out weight
#   row 1              : fc_out bias (broadcast across lanes)
#   rows 2 .. 2+NB-1   : fc_c biases
#   rows 2+NB .. 2+2NB-1  : block fc_0 biases
#   rows 2+2NB .. 2+3NB-1 : block fc_1 biases
_OFF_CB = 2
_OFF_B0 = 2 + N_BLOCKS
_OFF_B1 = 2 + 2 * N_BLOCKS
_AUX_ROWS = 2 + 3 * N_BLOCKS


def _round_up(x, m):
    return ((x + m - 1) // m) * m


# ---------------- Pallas kernel ----------------------------------------------
def _decoder_kernel(q_ref, ppT_ref, fea_ref,
                    wc_ref, blk_w_ref, wsm_ref, aux_ref,
                    out_ref,
                    c_acc,
                    *, exact_eps):
    m_idx = pl.program_id(2)

    @pl.when(m_idx == 0)
    def _():
        c_acc[...] = jnp.zeros_like(c_acc)

    q_aug = q_ref[0]          # (TN, AUG)   columns: [q, ||q||^2, 1]
    ppT = ppT_ref[0]          # (AUG, TM)   rows:    [-2p; 1; ||p||^2]
    fea = fea_ref[0]          # (TM, C+1)   last column = ones (weight sum)

    # ---- pairwise squared distance as a single MXU matmul -------------------
    #   sq = -2 q.p + ||q||^2 + ||p||^2
    sq = jnp.dot(q_aug, ppT, preferred_element_type=jnp.float32)     # (TN, TM)
    sq = jnp.maximum(sq, 0.0)                                        # guard cancellation
    if exact_eps:
        # exact reference semantics: exp(-((norm + 1e-5)^2) / var)
        norm = jnp.sqrt(sq)
        w = jnp.exp((norm + 1e-5) ** 2 * (-1.0 / VAR))
    else:
        # fast path: drop the 1e-5 epsilon -> no sqrt (halves EUP work)
        w = jnp.exp(sq * (-1.0 / VAR))

    # accumulate un-normalized feature sum + weight sum across M tiles.
    # (w cast matches fea dtype: no-op for f32, bf16 MXU path when accum_bf16.)
    c_acc[...] += jnp.dot(w.astype(fea.dtype), fea,
                          preferred_element_type=jnp.float32)        # (TN, C+1)

    @pl.when(m_idx == pl.num_programs(2) - 1)
    def _():
        aux = aux_ref[...]                     # (2+3*NB, H) small constants
        wsm = wsm_ref[...]                     # (AUG, H) fc_p weight (augmented)

        s = c_acc[:, C_DIM:C_DIM + 1]          # (TN, 1) weight sum
        c = c_acc[:, :C_DIM] / s               # deferred normalization -> (TN, C)

        # ---- fc_p: single matmul; zero row kills the ||q||^2 column and the
        #      bias rides on the ones column of q_aug --------------------------
        net = jnp.dot(q_aug, wsm, preferred_element_type=jnp.float32)   # (TN, H)

        # ---- fused fc_c: one (C, nb*H) matmul, sliced per block --------------
        cc = jnp.dot(c, wc_ref[...], preferred_element_type=jnp.float32)

        for i in range(N_BLOCKS):
            net = net + cc[:, i * HIDDEN:(i + 1) * HIDDEN] + aux[_OFF_CB + i:_OFF_CB + i + 1, :]
            # ResnetBlockFC (size_in == size_out == size_h => identity shortcut)
            h = jnp.maximum(net, 0.0)
            h = jnp.dot(h, blk_w_ref[2 * i], preferred_element_type=jnp.float32) \
                + aux[_OFF_B0 + i:_OFF_B0 + i + 1, :]
            h = jnp.maximum(h, 0.0)
            net = net + jnp.dot(h, blk_w_ref[2 * i + 1], preferred_element_type=jnp.float32) \
                + aux[_OFF_B1 + i:_OFF_B1 + i + 1, :]

        # ---- fc_out(actvn(net)) as a lane-dense (1, TN) row -------------------
        relu_net = jnp.maximum(net, 0.0)
        out_row = lax.dot_general(
            aux[0:1, :], relu_net,
            dimension_numbers=(((1,), (1,)), ((), ())),    # fc_out_w @ relu(net)^T
            preferred_element_type=jnp.float32) + aux[1:2, 0:1]
        out_ref[0] = out_row                                # (1, TN)


# ---------------- parameter / cloud packing (hoistable) ------------------------
def _pack_params(params):
    wpT = params['fc_p_w'].astype(jnp.float32).T                     # (3, H)
    wsm = jnp.concatenate([
        wpT,
        jnp.zeros((1, HIDDEN), jnp.float32),                         # kills ||q||^2 column
        params['fc_p_b'].astype(jnp.float32)[None, :],               # rides the ones column
    ], axis=0)                                                       # (AUG, H)

    wc = jnp.concatenate(
        [params['fc_c_w'][i].astype(jnp.float32).T for i in range(N_BLOCKS)],
        axis=1)                                                      # (C, nb*H)

    blk_w = jnp.stack(
        [jnp.swapaxes(params['blk_w0'].astype(jnp.float32), 1, 2),
         jnp.swapaxes(params['blk_w1'].astype(jnp.float32), 1, 2)],
        axis=1).reshape(2 * N_BLOCKS, HIDDEN, HIDDEN)                # [w0T_0, w1T_0, ...]

    aux = jnp.concatenate([
        params['fc_out_w'].astype(jnp.float32),                                  # row 0
        jnp.broadcast_to(params['fc_out_b'].astype(jnp.float32), (1, HIDDEN)),   # row 1
        params['fc_c_b'].astype(jnp.float32),                                    # rows 2..6
        params['blk_b0'].astype(jnp.float32),                                    # rows 7..11
        params['blk_b1'].astype(jnp.float32),                                    # rows 12..16
    ], axis=0)                                                       # (2+3*nb, H)
    return wc, blk_w, wsm, aux


def prepare_point_cloud(pp, fea, *, tm=2048, accum_bf16=False):
    """Augment / transpose / pad the point cloud.  Hoist out of the per-call path
    (and reuse via prepared_cloud=) when decoding many query batches of one scene."""
    B, M, _ = pp.shape
    tm = max(128, min(tm, _round_up(M, 128)))
    m_pad = _round_up(M, tm)

    pp32 = pp.astype(jnp.float32)
    pp_pad = jnp.pad(pp32, ((0, 0), (0, m_pad - M), (0, 0)),
                     constant_values=PAD_COORD)                      # far away -> 0 weight
    p_sq = jnp.sum(pp_pad * pp_pad, axis=-1, keepdims=True)          # (B, m_pad, 1)
    ones = jnp.ones((B, m_pad, 1), jnp.float32)
    pp_aug = jnp.concatenate([-2.0 * pp_pad, ones, p_sq], axis=-1)   # (B, m_pad, AUG)
    ppT_aug = jnp.swapaxes(pp_aug, 1, 2)                             # (B, AUG, m_pad)

    fea_aug = jnp.concatenate(
        [fea.astype(jnp.float32), jnp.ones((B, M, 1), jnp.float32)], axis=-1)
    fea_aug = jnp.pad(fea_aug, ((0, 0), (0, m_pad - M), (0, 0)))     # (B, m_pad, C+1)
    if accum_bf16:
        fea_aug = fea_aug.astype(jnp.bfloat16)
    return ppT_aug, fea_aug, tm


# ---------------- wrapper ------------------------------------------------------
def local_point_decoder(p, pp=None, fea=None, params=None, *, tn=512, tm=2048,
                        exact_eps=True, accum_bf16=False, prepared_cloud=None):
    """p: (B, N, 3) queries; pp: (B, M, 3) point cloud; fea: (B, M, C)."""
    B, N, _ = p.shape

    if prepared_cloud is None:
        ppT_aug, fea_aug, tm = prepare_point_cloud(pp, fea, tm=tm, accum_bf16=accum_bf16)
    else:
        ppT_aug, fea_aug, tm = prepared_cloud
    m_pad = ppT_aug.shape[2]

    # N tile: clamp to padded extent; keep >= 2 "parallel" tiles so both v7x
    # TensorCores get work whenever possible.
    tn = max(128, min(tn, _round_up(N, 128)))
    while tn > 128 and B * (_round_up(N, tn) // tn) < 2:
        tn = max(128, _round_up(tn // 2, 128))
    n_pad = _round_up(N, tn)
    assert tn % 128 == 0 and tm % 128 == 0

    q32 = p.astype(jnp.float32)
    q_sq = jnp.sum(q32 * q32, axis=-1, keepdims=True)
    q_aug = jnp.concatenate([q32, q_sq, jnp.ones((B, N, 1), jnp.float32)], axis=-1)
    q_aug = jnp.pad(q_aug, ((0, 0), (0, n_pad - N), (0, 0)))          # (B, n_pad, AUG)

    wc, blk_w, wsm, aux = _pack_params(params)

    grid = (B, n_pad // tn, m_pad // tm)
    n_tiles = n_pad // tn

    def full_spec(shape):
        nd = len(shape)
        return pl.BlockSpec(shape, lambda b, n, m, _nd=nd: (0,) * _nd)

    flops = (2 * B * n_pad * m_pad * (AUG + C_DIM + 1)
             + 2 * B * n_pad * (AUG * HIDDEN
                                + C_DIM * N_BLOCKS * HIDDEN
                                + N_BLOCKS * 2 * HIDDEN * HIDDEN
                                + HIDDEN))
    transcendentals = (2 if exact_eps else 1) * B * n_pad * m_pad
    bytes_accessed = (4 * q_aug.size
                      + n_tiles * (4 * ppT_aug.size
                                   + fea_aug.size * fea_aug.dtype.itemsize)
                      + 4 * B * n_pad
                      + 4 * (wc.size + blk_w.size + wsm.size + aux.size))

    kernel = functools.partial(_decoder_kernel, exact_eps=exact_eps)

    out = pl.pallas_call(
        kernel,
        out_shape=jax.ShapeDtypeStruct((B, 1, n_pad), jnp.float32),
        grid_spec=pltpu.PrefetchScalarGridSpec(
            num_scalar_prefetch=0,
            grid=grid,
            in_specs=[
                pl.BlockSpec((1, tn, AUG), lambda b, n, m: (b, n, 0)),        # q_aug
                pl.BlockSpec((1, AUG, tm), lambda b, n, m: (b, 0, m)),        # ppT_aug
                pl.BlockSpec((1, tm, C_DIM + 1), lambda b, n, m: (b, m, 0)),  # fea_aug
                full_spec(wc.shape),
                full_spec(blk_w.shape),
                full_spec(wsm.shape),
                full_spec(aux.shape),
            ],
            out_specs=pl.BlockSpec((1, 1, tn), lambda b, n, m: (b, 0, n)),
            scratch_shapes=[pltpu.VMEM((tn, C_DIM + 1), jnp.float32)],
        ),
        compiler_params=pltpu.CompilerParams(
            dimension_semantics=("parallel", "parallel", "arbitrary"),
            vmem_limit_bytes=48 * 1024 * 1024,
        ),
        cost_estimate=pl.CostEstimate(
            flops=int(flops),
            transcendentals=int(transcendentals),
            bytes_accessed=int(bytes_accessed),
        ),
    )(q_aug, ppT_aug, fea_aug, wc, blk_w, wsm, aux)

    return out[:, 0, :N]                                              # (B, N), matches squeeze(-1)


# ---------------- pure-JAX reference (PyTorch semantics) -----------------------
def ref_forward(p, pp, fea, params):
    diff = pp[:, None, :, :] - p[:, :, None, :]        # (B, N, M, 3)
    norm = jnp.sqrt(jnp.sum(diff * diff, axis=-1))
    dist = -((norm + 1e-5) ** 2)
    w = jnp.exp(dist / VAR)
    w = w / jnp.sum(w, axis=2, keepdims=True)
    c = jnp.einsum('bnm,bmc->bnc', w, fea)
    net = jnp.einsum('bnd,hd->bnh', p, params['fc_p_w']) + params['fc_p_b']
    for i in range(N_BLOCKS):
        net = net + jnp.einsum('bnc,hc->bnh', c, params['fc_c_w'][i]) + params['fc_c_b'][i]
        h = jax.nn.relu(net)
        h = jnp.einsum('bnh,kh->bnk', h, params['blk_w0'][i]) + params['blk_b0'][i]
        h = jax.nn.relu(h)
        dx = jnp.einsum('bnk,hk->bnh', h, params['blk_w1'][i]) + params['blk_b1'][i]
        net = net + dx
    out = jnp.einsum('bnh,oh->bno', jax.nn.relu(net), params['fc_out_w']) + params['fc_out_b']
    return out[..., 0]


# ---------------- main ----------------------------------------------------------
if __name__ == "__main__":
    # Small shapes that still exercise N-tiling (N=320 -> 3 tiles of 128 with padding)
    # and M-tiling (M=200 -> 2 tiles of 128 with far-point padding) in the first run.
    B, N, M = 2, 320, 200
    key = jax.random.PRNGKey(0)
    keys = jax.random.split(key, 16)

    p = jax.random.uniform(keys[0], (B, N, DIM), jnp.float32)           # query points
    pp = jax.random.uniform(keys[1], (B, M, DIM), jnp.float32)          # point cloud
    fea = jax.random.normal(keys[2], (B, M, C_DIM), jnp.float32) * 0.5  # point features

    s = 0.1
    params = {
        'fc_p_w':   jax.random.normal(keys[3], (HIDDEN, DIM), jnp.float32) * s,
        'fc_p_b':   jax.random.normal(keys[4], (HIDDEN,), jnp.float32) * s,
        'fc_c_w':   jax.random.normal(keys[5], (N_BLOCKS, HIDDEN, C_DIM), jnp.float32) * s,
        'fc_c_b':   jax.random.normal(keys[6], (N_BLOCKS, HIDDEN), jnp.float32) * s,
        'blk_w0':   jax.random.normal(keys[7], (N_BLOCKS, HIDDEN, HIDDEN), jnp.float32) * s,
        'blk_b0':   jax.random.normal(keys[8], (N_BLOCKS, HIDDEN), jnp.float32) * s,
        'blk_w1':   jax.random.normal(keys[9], (N_BLOCKS, HIDDEN, HIDDEN), jnp.float32) * s,
        'blk_b1':   jax.random.normal(keys[10], (N_BLOCKS, HIDDEN), jnp.float32) * s,
        'fc_out_w': jax.random.normal(keys[11], (1, HIDDEN), jnp.float32) * s,
        'fc_out_b': jax.random.normal(keys[12], (1,), jnp.float32) * s,
    }

    ref = jax.block_until_ready(ref_forward(p, pp, fea, params))

    # 1) small tiles: exercises multi-tile M accumulation, N tiling and padding
    out_small = jax.block_until_ready(
        local_point_decoder(p, pp, fea, params, tn=128, tm=128))
    assert out_small.shape == (B, N)
    np.testing.assert_allclose(np.asarray(out_small), np.asarray(ref), rtol=1e-4, atol=1e-4)

    # 2) default (large) tiles, with the point-cloud preparation hoisted/reused
    cloud = prepare_point_cloud(pp, fea)
    out_big = jax.block_until_ready(
        local_point_decoder(p, params=params, prepared_cloud=cloud))
    np.testing.assert_allclose(np.asarray(out_big), np.asarray(ref), rtol=1e-4, atol=1e-4)

    # 3) fast EUP path (drops the 1e-5 epsilon inside the exp -> no sqrt in the
    #    inner loop); perturbation to the weights is ~1e-4 relative.
    out_fast = jax.block_until_ready(
        local_point_decoder(p, pp, fea, params, exact_eps=False))
    np.testing.assert_allclose(np.asarray(out_fast), np.asarray(ref), rtol=1e-2, atol=1e-2)

    print("KERNEL_OK")
</pallas_src>

<mosaic_0001>
module attributes {stable_mosaic.version = 11 : i64} {
  func.func @_decoder_kernel(%arg0: i32, %arg1: i32, %arg2: i32, %arg3: memref<1x128x5xf32, #tpu.memory_space<vmem>>, %arg4: memref<1x5x128xf32, #tpu.memory_space<vmem>>, %arg5: memref<1x128x33xf32, #tpu.memory_space<vmem>>, %arg6: memref<32x160xf32, #tpu.memory_space<vmem>>, %arg7: memref<10x32x32xf32, #tpu.memory_space<vmem>>, %arg8: memref<5x32xf32, #tpu.memory_space<vmem>>, %arg9: memref<17x32xf32, #tpu.memory_space<vmem>>, %arg10: memref<1x1x128xf32, #tpu.memory_space<vmem>>, %arg11: memref<128x33xf32, #tpu.memory_space<vmem>>) attributes {dimension_semantics = [#tpu.dimension_semantics<parallel>, #tpu.dimension_semantics<parallel>, #tpu.dimension_semantics<arbitrary>], iteration_bounds = array<i64: 2, 3, 2>, scalar_prefetch = 0 : i64, scratch_operands = 1 : i64, tpu.core_type = #tpu.core_type<tc>, window_params = [{transform_indices = @transform_0, window_bounds = array<i64: 1, 128, 5>}, {transform_indices = @transform_1, window_bounds = array<i64: 1, 5, 128>}, {transform_indices = @transform_2, window_bounds = array<i64: 1, 128, 33>}, {pipeline_mode = #tpu.pipeline_mode<synchronous>, transform_indices = @transform_3, window_bounds = array<i64: 32, 160>}, {pipeline_mode = #tpu.pipeline_mode<synchronous>, transform_indices = @transform_4, window_bounds = array<i64: 10, 32, 32>}, {pipeline_mode = #tpu.pipeline_mode<synchronous>, transform_indices = @transform_5, window_bounds = array<i64: 5, 32>}, {pipeline_mode = #tpu.pipeline_mode<synchronous>, transform_indices = @transform_6, window_bounds = array<i64: 17, 32>}, {transform_indices = @transform_7, window_bounds = array<i64: 1, 1, 128>}]} {
    %c0_i32 = arith.constant 0 : i32
    %0 = arith.cmpi eq, %arg2, %c0_i32 : i32
    %1 = arith.extui %0 : i1 to i32
    %c0_i32_0 = arith.constant 0 : i32
    %2 = arith.cmpi ne, %1, %c0_i32_0 : i32
    scf.if %2 {
      %cst_18 = arith.constant 0.000000e+00 : f32
      %26 = vector.broadcast %cst_18 : f32 to vector<128x33xf32>
      %c0_19 = arith.constant 0 : index
      %c0_20 = arith.constant 0 : index
      %27 = vector.load %arg11[%c0_19, %c0_20] : memref<128x33xf32, #tpu.memory_space<vmem>>, vector<128x33xf32>
      tpu.vector_store %arg11[%c0_19, %c0_20], %26 {strides = array<i32>} : memref<128x33xf32, #tpu.memory_space<vmem>>, vector<128x33xf32>,
    } else {
    }
    %c0 = arith.constant 0 : index
    %c0_1 = arith.constant 0 : index
    %c0_2 = arith.constant 0 : index
    %3 = vector.load %arg3[%c0, %c0_1, %c0_2] : memref<1x128x5xf32, #tpu.memory_space<vmem>>, vector<1x128x5xf32>
    %4 = vector.shape_cast %3 : vector<1x128x5xf32> to vector<128x5xf32>
    %c0_3 = arith.constant 0 : index
    %c0_4 = arith.constant 0 : index
    %c0_5 = arith.constant 0 : index
    %5 = vector.load %arg4[%c0_3, %c0_4, %c0_5] : memref<1x5x128xf32, #tpu.memory_space<vmem>>, vector<1x5x128xf32>
    %6 = vector.shape_cast %5 : vector<1x5x128xf32> to vector<5x128xf32>
    %c0_6 = arith.constant 0 : index
    %c0_7 = arith.constant 0 : index
    %c0_8 = arith.constant 0 : index
    %7 = vector.load %arg5[%c0_6, %c0_7, %c0_8] : memref<1x128x33xf32, #tpu.memory_space<vmem>>, vector<1x128x33xf32>
    %8 = vector.shape_cast %7 : vector<1x128x33xf32> to vector<128x33xf32>
    %cst = arith.constant dense<0.000000e+00> : vector<128x128xf32>
    %9 = tpu.matmul %4, %6, %cst {dimension_numbers = #tpu.dot_dimension_numbers<[1], [0], [0], [1], [0, 0, 1, 1], [], []>} : vector<128x5xf32>, vector<5x128xf32>, vector<128x128xf32> -> vector<128x128xf32>
    %cst_9 = arith.constant 0.000000e+00 : f32
    %10 = vector.broadcast %cst_9 : f32 to vector<128x128xf32>
    %11 = arith.maximumf %9, %10 : vector<128x128xf32>
    %12 = math.sqrt %11 : vector<128x128xf32>
    %cst_10 = arith.constant 9.99999974E-6 : f32
    %13 = vector.broadcast %cst_10 : f32 to vector<128x128xf32>
    %14 = arith.addf %12, %13 : vector<128x128xf32>
    %15 = arith.mulf %14, %14 : vector<128x128xf32>
    %cst_11 = arith.constant -4.000000e+00 : f32
    %16 = vector.broadcast %cst_11 : f32 to vector<128x128xf32>
    %17 = arith.mulf %15, %16 : vector<128x128xf32>
    %18 = math.exp %17 : vector<128x128xf32>
    %c0_12 = arith.constant 0 : index
    %c0_13 = arith.constant 0 : index
    %19 = vector.load %arg11[%c0_12, %c0_13] : memref<128x33xf32, #tpu.memory_space<vmem>>, vector<128x33xf32>
    %cst_14 = arith.constant dense<0.000000e+00> : vector<128x33xf32>
    %20 = tpu.matmul %18, %8, %cst_14 {dimension_numbers = #tpu.dot_dimension_numbers<[1], [0], [0], [1], [0, 0, 1, 1], [], []>} : vector<128x128xf32>, vector<128x33xf32>, vector<128x33xf32> -> vector<128x33xf32>
    %21 = arith.addf %19, %20 : vector<128x33xf32>
    %c0_15 = arith.constant 0 : index
    %c0_16 = arith.constant 0 : index
    %22 = vector.load %arg11[%c0_15, %c0_16] : memref<128x33xf32, #tpu.memory_space<vmem>>, vector<128x33xf32>
    tpu.vector_store %arg11[%c0_15, %c0_16], %21 {strides = array<i32>} : memref<128x33xf32, #tpu.memory_space<vmem>>, vector<128x33xf32>,
    %c1_i32 = arith.constant 1 : i32
    %23 = arith.cmpi eq, %arg2, %c1_i32 : i32
    %24 = arith.extui %23 : i1 to i32
    %c0_i32_17 = arith.constant 0 : i32
    %25 = arith.cmpi ne, %24, %c0_i32_17 : i32
    scf.if %25 {
      %c0_18 = arith.constant 0 : index
      %c0_19 = arith.constant 0 : index
      %26 = vector.load %arg9[%c0_18, %c0_19] : memref<17x32xf32, #tpu.memory_space<vmem>>, vector<17x32xf32>
      %c0_20 = arith.constant 0 : index
      %c0_21 = arith.constant 0 : index
      %27 = vector.load %arg8[%c0_20, %c0_21] : memref<5x32xf32, #tpu.memory_space<vmem>>, vector<5x32xf32>
      %c0_22 = arith.constant 0 : index
      %c32 = arith.constant 32 : index
      %28 = vector.load %arg11[%c0_22, %c32] : memref<128x33xf32, #tpu.memory_space<vmem>>, vector<128x1xf32>
      %c0_23 = arith.constant 0 : index
      %c0_24 = arith.constant 0 : index
      %29 = vector.load %arg11[%c0_23, %c0_24] : memref<128x33xf32, #tpu.memory_space<vmem>>, vector<128x32xf32>
      %30 = vector.broadcast %28 : vector<128x1xf32> to vector<128x32xf32>
      %31 = arith.divf %29, %30 : vector<128x32xf32>
      %cst_25 = arith.constant dense<0.000000e+00> : vector<128x32xf32>
      %32 = tpu.matmul %4, %27, %cst_25 {dimension_numbers = #tpu.dot_dimension_numbers<[1], [0], [0], [1], [0, 0, 1, 1], [], []>} : vector<128x5xf32>, vector<5x32xf32>, vector<128x32xf32> -> vector<128x32xf32>
      %c0_26 = arith.constant 0 : index
      %c0_27 = arith.constant 0 : index
      %33 = vector.load %arg6[%c0_26, %c0_27] : memref<32x160xf32, #tpu.memory_space<vmem>>, vector<32x160xf32>
      %cst_28 = arith.constant dense<0.000000e+00> : vector<128x160xf32>
      %34 = tpu.matmul %31, %33, %cst_28 {dimension_numbers = #tpu.dot_dimension_numbers<[1], [0], [0], [1], [0, 0, 1, 1], [], []>} : vector<128x32xf32>, vector<32x160xf32>, vector<128x160xf32> -> vector<128x160xf32>
      %35 = vector.extract_strided_slice %34 {offsets = [0, 0], sizes = [128, 32], strides = [1, 1]} : vector<128x160xf32> to vector<128x32xf32>
      %36 = arith.addf %32, %35 : vector<128x32xf32>
      %37 = vector.extract_strided_slice %26 {offsets = [2, 0], sizes = [1, 32], strides = [1, 1]} : vector<17x32xf32> to vector<1x32xf32>
      %38 = vector.broadcast %37 : vector<1x32xf32> to vector<128x32xf32>
      %39 = arith.addf %36, %38 : vector<128x32xf32>
      %cst_29 = arith.constant 0.000000e+00 : f32
      %40 = vector.broadcast %cst_29 : f32 to vector<128x32xf32>
      %41 = arith.maximumf %39, %40 : vector<128x32xf32>
      %c0_30 = arith.constant 0 : index
      %c0_31 = arith.constant 0 : index
      %c0_32 = arith.constant 0 : index
      %42 = vector.load %arg7[%c0_30, %c0_31, %c0_32] : memref<10x32x32xf32, #tpu.memory_space<vmem>>, vector<1x32x32xf32>
      %43 = vector.shape_cast %42 : vector<1x32x32xf32> to vector<32x32xf32>
      %cst_33 = arith.constant dense<0.000000e+00> : vector<128x32xf32>
      %44 = tpu.matmul %41, %43, %cst_33 {dimension_numbers = #tpu.dot_dimension_numbers<[1], [0], [0], [1], [0, 0, 1, 1], [], []>} : vector<128x32xf32>, vector<32x32xf32>, vector<128x32xf32> -> vector<128x32xf32>
      %45 = vector.extract_strided_slice %26 {offsets = [7, 0], sizes = [1, 32], strides = [1, 1]} : vector<17x32xf32> to vector<1x32xf32>
      %46 = vector.broadcast %45 : vector<1x32xf32> to vector<128x32xf32>
      %47 = arith.addf %44, %46 : vector<128x32xf32>
      %cst_34 = arith.constant 0.000000e+00 : f32
      %48 = vector.broadcast %cst_34 : f32 to vector<128x32xf32>
      %49 = arith.maximumf %47, %48 : vector<128x32xf32>
      %c1 = arith.constant 1 : index
      %c0_35 = arith.constant 0 : index
      %c0_36 = arith.constant 0 : index
      %50 = vector.load %arg7[%c1, %c0_35, %c0_36] : memref<10x32x32xf32, #tpu.memory_space<vmem>>, vector<1x32x32xf32>
      %51 = vector.shape_cast %50 : vector<1x32x32xf32> to vector<32x32xf32>
      %cst_37 = arith.constant dense<0.000000e+00> : vector<128x32xf32>
      %52 = tpu.matmul %49, %51, %cst_37 {dimension_numbers = #tpu.dot_dimension_numbers<[1], [0], [0], [1], [0, 0, 1, 1], [], []>} : vector<128x32xf32>, vector<32x32xf32>, vector<128x32xf32> -> vector<128x32xf32>
      %53 = arith.addf %39, %52 : vector<128x32xf32>
      %54 = vector.extract_strided_slice %26 {offsets = [12, 0], sizes = [1, 32], strides = [1, 1]} : vector<17x32xf32> to vector<1x32xf32>
      %55 = vector.broadcast %54 : vector<1x32xf32> to vector<128x32xf32>
      %56 = arith.addf %53, %55 : vector<128x32xf32>
      %57 = vector.extract_strided_slice %34 {offsets = [0, 32], sizes = [128, 32], strides = [1, 1]} : vector<128x160xf32> to vector<128x32xf32>
      %58 = arith.addf %56, %57 : vector<128x32xf32>
      %59 = vector.extract_strided_slice %26 {offsets = [3, 0], sizes = [1, 32], strides = [1, 1]} : vector<17x32xf32> to vector<1x32xf32>
      %60 = vector.broadcast %59 : vector<1x32xf32> to vector<128x32xf32>
      %61 = arith.addf %58, %60 : vector<128x32xf32>
      %cst_38 = arith.constant 0.000000e+00 : f32
      %62 = vector.broadcast %cst_38 : f32 to vector<128x32xf32>
      %63 = arith.maximumf %61, %62 : vector<128x32xf32>
      %c2 = arith.constant 2 : index
      %c0_39 = arith.constant 0 : index
      %c0_40 = arith.constant 0 : index
      %64 = vector.load %arg7[%c2, %c0_39, %c0_40] : memref<10x32x32xf32, #tpu.memory_space<vmem>>, vector<1x32x32xf32>
      %65 = vector.shape_cast %64 : vector<1x32x32xf32> to vector<32x32xf32>
      %cst_41 = arith.constant dense<0.000000e+00> : vector<128x32xf32>
      %66 = tpu.matmul %63, %65, %cst_41 {dimension_numbers = #tpu.dot_dimension_numbers<[1], [0], [0], [1], [0, 0, 1, 1], [], []>} : vector<128x32xf32>, vector<32x32xf32>, vector<128x32xf32> -> vector<128x32xf32>
      %67 = vector.extract_strided_slice %26 {offsets = [8, 0], sizes = [1, 32], strides = [1, 1]} : vector<17x32xf32> to vector<1x32xf32>
      %68 = vector.broadcast %67 : vector<1x32xf32> to vector<128x32xf32>
      %69 = arith.addf %66, %68 : vector<128x32xf32>
      %cst_42 = arith.constant 0.000000e+00 : f32
      %70 = vector.broadcast %cst_42 : f32 to vector<128x32xf32>
      %71 = arith.maximumf %69, %70 : vector<128x32xf32>
      %c3 = arith.constant 3 : index
      %c0_43 = arith.constant 0 : index
      %c0_44 = arith.constant 0 : index
      %72 = vector.load %arg7[%c3, %c0_43, %c0_44] : memref<10x32x32xf32, #tpu.memory_space<vmem>>, vector<1x32x32xf32>
      %73 = vector.shape_cast %72 : vector<1x32x32xf32> to vector<32x32xf32>
      %cst_45 = arith.constant dense<0.000000e+00> : vector<128x32xf32>
      %74 = tpu.matmul %71, %73, %cst_45 {dimension_numbers = #tpu.dot_dimension_numbers<[1], [0], [0], [1], [0, 0, 1, 1], [], []>} : vector<128x32xf32>, vector<32x32xf32>, vector<128x32xf32> -> vector<128x32xf32>
      %75 = arith.addf %61, %74 : vector<128x32xf32>
      %76 = vector.extract_strided_slice %26 {offsets = [13, 0], sizes = [1, 32], strides = [1, 1]} : vector<17x32xf32> to vector<1x32xf32>
      %77 = vector.broadcast %76 : vector<1x32xf32> to vector<128x32xf32>
      %78 = arith.addf %75, %77 : vector<128x32xf32>
      %79 = vector.extract_strided_slice %34 {offsets = [0, 64], sizes = [128, 32], strides = [1, 1]} : vector<128x160xf32> to vector<128x32xf32>
      %80 = arith.addf %78, %79 : vector<128x32xf32>
      %81 = vector.extract_strided_slice %26 {offsets = [4, 0], sizes = [1, 32], strides = [1, 1]} : vector<17x32xf32> to vector<1x32xf32>
      %82 = vector.broadcast %81 : vector<1x32xf32> to vector<128x32xf32>
      %83 = arith.addf %80, %82 : vector<128x32xf32>
      %cst_46 = arith.constant 0.000000e+00 : f32
      %84 = vector.broadcast %cst_46 : f32 to vector<128x32xf32>
      %85 = arith.maximumf %83, %84 : vector<128x32xf32>
      %c4 = arith.constant 4 : index
      %c0_47 = arith.constant 0 : index
      %c0_48 = arith.constant 0 : index
      %86 = vector.load %arg7[%c4, %c0_47, %c0_48] : memref<10x32x32xf32, #tpu.memory_space<vmem>>, vector<1x32x32xf32>
      %87 = vector.shape_cast %86 : vector<1x32x32xf32> to vector<32x32xf32>
      %cst_49 = arith.constant dense<0.000000e+00> : vector<128x32xf32>
      %88 = tpu.matmul %85, %87, %cst_49 {dimension_numbers = #tpu.dot_dimension_numbers<[1], [0], [0], [1], [0, 0, 1, 1], [], []>} : vector<128x32xf32>, vector<32x32xf32>, vector<128x32xf32> -> vector<128x32xf32>
      %89 = vector.extract_strided_slice %26 {offsets = [9, 0], sizes = [1, 32], strides = [1, 1]} : vector<17x32xf32> to vector<1x32xf32>
      %90 = vector.broadcast %89 : vector<1x32xf32> to vector<128x32xf32>
      %91 = arith.addf %88, %90 : vector<128x32xf32>
      %cst_50 = arith.constant 0.000000e+00 : f32
      %92 = vector.broadcast %cst_50 : f32 to vector<128x32xf32>
      %93 = arith.maximumf %91, %92 : vector<128x32xf32>
      %c5 = arith.constant 5 : index
      %c0_51 = arith.constant 0 : index
      %c0_52 = arith.constant 0 : index
      %94 = vector.load %arg7[%c5, %c0_51, %c0_52] : memref<10x32x32xf32, #tpu.memory_space<vmem>>, vector<1x32x32xf32>
      %95 = vector.shape_cast %94 : vector<1x32x32xf32> to vector<32x32xf32>
      %cst_53 = arith.constant dense<0.000000e+00> : vector<128x32xf32>
      %96 = tpu.matmul %93, %95, %cst_53 {dimension_numbers = #tpu.dot_dimension_numbers<[1], [0], [0], [1], [0, 0, 1, 1], [], []>} : vector<128x32xf32>, vector<32x32xf32>, vector<128x32xf32> -> vector<128x32xf32>
      %97 = arith.addf %83, %96 : vector<128x32xf32>
      %98 = vector.extract_strided_slice %26 {offsets = [14, 0], sizes = [1, 32], strides = [1, 1]} : vector<17x32xf32> to vector<1x32xf32>
      %99 = vector.broadcast %98 : vector<1x32xf32> to vector<128x32xf32>
      %100 = arith.addf %97, %99 : vector<128x32xf32>
      %101 = vector.extract_strided_slice %34 {offsets = [0, 96], sizes = [128, 32], strides = [1, 1]} : vector<128x160xf32> to vector<128x32xf32>
      %102 = arith.addf %100, %101 : vector<128x32xf32>
      %103 = vector.extract_strided_slice %26 {offsets = [5, 0], sizes = [1, 32], strides = [1, 1]} : vector<17x32xf32> to vector<1x32xf32>
      %104 = vector.broadcast %103 : vector<1x32xf32> to vector<128x32xf32>
      %105 = arith.addf %102, %104 : vector<128x32xf32>
      %cst_54 = arith.constant 0.000000e+00 : f32
      %106 = vector.broadcast %cst_54 : f32 to vector<128x32xf32>
      %107 = arith.maximumf %105, %106 : vector<128x32xf32>
      %c6 = arith.constant 6 : index
      %c0_55 = arith.constant 0 : index
      %c0_56 = arith.constant 0 : index
      %108 = vector.load %arg7[%c6, %c0_55, %c0_56] : memref<10x32x32xf32, #tpu.memory_space<vmem>>, vector<1x32x32xf32>
      %109 = vector.shape_cast %108 : vector<1x32x32xf32> to vector<32x32xf32>
      %cst_57 = arith.constant dense<0.000000e+00> : vector<128x32xf32>
      %110 = tpu.matmul %107, %109, %cst_57 {dimension_numbers = #tpu.dot_dimension_numbers<[1], [0], [0], [1], [0, 0, 1, 1], [], []>} : vector<128x32xf32>, vector<32x32xf32>, vector<128x32xf32> -> vector<128x32xf32>
      %111 = vector.extract_strided_slice %26 {offsets = [10, 0], sizes = [1, 32], strides = [1, 1]} : vector<17x32xf32> to vector<1x32xf32>
      %112 = vector.broadcast %111 : vector<1x32xf32> to vector<128x32xf32>
      %113 = arith.addf %110, %112 : vector<128x32xf32>
      %cst_58 = arith.constant 0.000000e+00 : f32
      %114 = vector.broadcast %cst_58 : f32 to vector<128x32xf32>
      %115 = arith.maximumf %113, %114 : vector<128x32xf32>
      %c7 = arith.constant 7 : index
      %c0_59 = arith.constant 0 : index
      %c0_60 = arith.constant 0 : index
      %116 = vector.load %arg7[%c7, %c0_59, %c0_60] : memref<10x32x32xf32, #tpu.memory_space<vmem>>, vector<1x32x32xf32>
      %117 = vector.shape_cast %116 : vector<1x32x32xf32> to vector<32x32xf32>
      %cst_61 = arith.constant dense<0.000000e+00> : vector<128x32xf32>
      %118 = tpu.matmul %115, %117, %cst_61 {dimension_numbers = #tpu.dot_dimension_numbers<[1], [0], [0], [1], [0, 0, 1, 1], [], []>} : vector<128x32xf32>, vector<32x32xf32>, vector<128x32xf32> -> vector<128x32xf32>
      %119 = arith.addf %105, %118 : vector<128x32xf32>
      %120 = vector.extract_strided_slice %26 {offsets = [15, 0], sizes = [1, 32], strides = [1, 1]} : vector<17x32xf32> to vector<1x32xf32>
      %121 = vector.broadcast %120 : vector<1x32xf32> to vector<128x32xf32>
      %122 = arith.addf %119, %121 : vector<128x32xf32>
      %123 = vector.extract_strided_slice %34 {offsets = [0, 128], sizes = [128, 32], strides = [1, 1]} : vector<128x160xf32> to vector<128x32xf32>
      %124 = arith.addf %122, %123 : vector<128x32xf32>
      %125 = vector.extract_strided_slice %26 {offsets = [6, 0], sizes = [1, 32], strides = [1, 1]} : vector<17x32xf32> to vector<1x32xf32>
      %126 = vector.broadcast %125 : vector<1x32xf32> to vector<128x32xf32>
      %127 = arith.addf %124, %126 : vector<128x32xf32>
      %cst_62 = arith.constant 0.000000e+00 : f32
      %128 = vector.broadcast %cst_62 : f32 to vector<128x32xf32>
      %129 = arith.maximumf %127, %128 : vector<128x32xf32>
      %c8 = arith.constant 8 : index
      %c0_63 = arith.constant 0 : index
      %c0_64 = arith.constant 0 : index
      %130 = vector.load %arg7[%c8, %c0_63, %c0_64] : memref<10x32x32xf32, #tpu.memory_space<vmem>>, vector<1x32x32xf32>
      %131 = vector.shape_cast %130 : vector<1x32x32xf32> to vector<32x32xf32>
      %cst_65 = arith.constant dense<0.000000e+00> : vector<128x32xf32>
      %132 = tpu.matmul %129, %131, %cst_65 {dimension_numbers = #tpu.dot_dimension_numbers<[1], [0], [0], [1], [0, 0, 1, 1], [], []>} : vector<128x32xf32>, vector<32x32xf32>, vector<128x32xf32> -> vector<128x32xf32>
      %133 = vector.extract_strided_slice %26 {offsets = [11, 0], sizes = [1, 32], strides = [1, 1]} : vector<17x32xf32> to vector<1x32xf32>
      %134 = vector.broadcast %133 : vector<1x32xf32> to vector<128x32xf32>
      %135 = arith.addf %132, %134 : vector<128x32xf32>
      %cst_66 = arith.constant 0.000000e+00 : f32
      %136 = vector.broadcast %cst_66 : f32 to vector<128x32xf32>
      %137 = arith.maximumf %135, %136 : vector<128x32xf32>
      %c9 = arith.constant 9 : index
      %c0_67 = arith.constant 0 : index
      %c0_68 = arith.constant 0 : index
      %138 = vector.load %arg7[%c9, %c0_67, %c0_68] : memref<10x32x32xf32, #tpu.memory_space<vmem>>, vector<1x32x32xf32>
      %139 = vector.shape_cast %138 : vector<1x32x32xf32> to vector<32x32xf32>
      %cst_69 = arith.constant dense<0.000000e+00> : vector<128x32xf32>
      %140 = tpu.matmul %137, %139, %cst_69 {dimension_numbers = #tpu.dot_dimension_numbers<[1], [0], [0], [1], [0, 0, 1, 1], [], []>} : vector<128x32xf32>, vector<32x32xf32>, vector<128x32xf32> -> vector<128x32xf32>
      %141 = arith.addf %127, %140 : vector<128x32xf32>
      %142 = vector.extract_strided_slice %26 {offsets = [16, 0], sizes = [1, 32], strides = [1, 1]} : vector<17x32xf32> to vector<1x32xf32>
      %143 = vector.broadcast %142 : vector<1x32xf32> to vector<128x32xf32>
      %144 = arith.addf %141, %143 : vector<128x32xf32>
      %cst_70 = arith.constant 0.000000e+00 : f32
      %145 = vector.broadcast %cst_70 : f32 to vector<128x32xf32>
      %146 = arith.maximumf %144, %145 : vector<128x32xf32>
      %147 = vector.extract_strided_slice %26 {offsets = [0, 0], sizes = [1, 32], strides = [1, 1]} : vector<17x32xf32> to vector<1x32xf32>
      %cst_71 = arith.constant dense<0.000000e+00> : vector<1x128xf32>
      %148 = tpu.matmul %147, %146, %cst_71 {dimension_numbers = #tpu.dot_dimension_numbers<[1], [1], [0], [0], [0, 0, 1, 0], [], []>} : vector<1x32xf32>, vector<128x32xf32>, vector<1x128xf32> -> vector<1x128xf32>
      %149 = vector.extract_strided_slice %26 {offsets = [1, 0], sizes = [1, 1], strides = [1, 1]} : vector<17x32xf32> to vector<1x1xf32>
      %150 = vector.broadcast %149 : vector<1x1xf32> to vector<1x128xf32>
      %151 = arith.addf %148, %150 : vector<1x128xf32>
      %c0_72 = arith.constant 0 : index
      %c0_73 = arith.constant 0 : index
      %c0_74 = arith.constant 0 : index
      %152 = vector.load %arg10[%c0_72, %c0_73, %c0_74] : memref<1x1x128xf32, #tpu.memory_space<vmem>>, vector<1x1x128xf32>
      %153 = vector.shape_cast %152 : vector<1x1x128xf32> to vector<1x128xf32>
      %154 = vector.shape_cast %151 : vector<1x128xf32> to vector<1x1x128xf32>
      tpu.vector_store %arg10[%c0_72, %c0_73, %c0_74], %154 {strides = array<i32>} : memref<1x1x128xf32, #tpu.memory_space<vmem>>, vector<1x1x128xf32>,
    } else {
    }
    return
  }
  func.func @transform_0(%arg0: i32, %arg1: i32, %arg2: i32) -> (i32, i32, i32) {
    %c0_i32 = arith.constant 0 : i32
    %c0_i32_0 = arith.constant 0 : i32
    return %arg0, %arg1, %c0_i32 : i32, i32, i32
  }
  func.func @transform_1(%arg0: i32, %arg1: i32, %arg2: i32) -> (i32, i32, i32) {
    %c0_i32 = arith.constant 0 : i32
    %c0_i32_0 = arith.constant 0 : i32
    return %arg0, %c0_i32, %arg2 : i32, i32, i32
  }
  func.func @transform_2(%arg0: i32, %arg1: i32, %arg2: i32) -> (i32, i32, i32) {
    %c0_i32 = arith.constant 0 : i32
    %c0_i32_0 = arith.constant 0 : i32
    return %arg0, %arg2, %c0_i32 : i32, i32, i32
  }
  func.func @transform_3(%arg0: i32, %arg1: i32, %arg2: i32) -> (i32, i32) {
    %c0_i32 = arith.constant 0 : i32
    %c0_i32_0 = arith.constant 0 : i32
    %c0_i32_1 = arith.constant 0 : i32
    return %c0_i32, %c0_i32_0 : i32, i32
  }
  func.func @transform_4(%arg0: i32, %arg1: i32, %arg2: i32) -> (i32, i32, i32) {
    %c0_i32 = arith.constant 0 : i32
    %c0_i32_0 = arith.constant 0 : i32
    %c0_i32_1 = arith.constant 0 : i32
    %c0_i32_2 = arith.constant 0 : i32
    return %c0_i32, %c0_i32_0, %c0_i32_1 : i32, i32, i32
  }
  func.func @transform_5(%arg0: i32, %arg1: i32, %arg2: i32) -> (i32, i32) {
    %c0_i32 = arith.constant 0 : i32
    %c0_i32_0 = arith.constant 0 : i32
    %c0_i32_1 = arith.constant 0 : i32
    return %c0_i32, %c0_i32_0 : i32, i32
  }
  func.func @transform_6(%arg0: i32, %arg1: i32, %arg2: i32) -> (i32, i32) {
    %c0_i32 = arith.constant 0 : i32
    %c0_i32_0 = arith.constant 0 : i32
    %c0_i32_1 = arith.constant 0 : i32
    return %c0_i32, %c0_i32_0 : i32, i32
  }
  func.func @transform_7(%arg0: i32, %arg1: i32, %arg2: i32) -> (i32, i32, i32) {
    %c0_i32 = arith.constant 0 : i32
    %c0_i32_0 = arith.constant 0 : i32
    return %arg0, %c0_i32, %arg1 : i32, i32, i32
  }
}

</mosaic_0001>

<bundles_post_ra>
// kernel: tpu_custom_call.1
= control target key start
LH: loop header
LB: loop body
LE: loop exit
PB: predicated region body
PF: predicated region fallthrough
CT: control target
= control target key end

     0   :  { %s6121_s0 = inlined_call_operand.vmem [shape: f32[2,384,5], index: 0, kind: input, shape index: {}]   ;;  %s6122_s1 = inlined_call_operand.vmem [shape: f32[2,5,256], index: 1, kind: input, shape index: {}]   ;;  %s6123_s2 = inlined_call_operand.vmem [shape: f32[2,256,33], index: 2, kind: input, shape index: {}]   ;;  %s6124_s3 = inlined_call_operand.vmem [shape: f32[32,160], index: 3, kind: input, shape index: {}]   ;;  %s6125_s4 = inlined_call_operand.vmem [shape: f32[10,32,32], index: 4, kind: input, shape index: {}]   ;;  %s6126_s5 = inlined_call_operand.vmem [shape: f32[5,32], index: 5, kind: input, shape index: {}]   ;;  %s6127_s6 = inlined_call_operand.vmem [shape: f32[17,32], index: 6, kind: input, shape index: {}]   ;;  %s6128_s7 = inlined_call_operand.hbm [shape: f32[2,1,384], index: 7, kind: output, shape index: {}]  }
   0x1   :  { %6142 = sst [smem:[#allocation18_spill]] %s6128_s7 }
   0x2   :  { %12 = vsyncpa [#allocation4], 0 }
   0x3   :  { %14 = vsyncpa [#allocation4 + $0x1], 0  ;;  %s4283_s24 = smov 0   ;;  %s4285_s25 = smov 0  }
   0x4   :  { %s4287_s26 = smov 0   ;;  %s4289_s27 = smov 0  }
   0x5   :  { %s4291_s28 = smov 0   ;;  %s4293_s29 = smov 0  }
   0x6   :  { %s4295_s30 = smov 0   ;;  %s4297_s8 = smov 0  }
   0x7   :  { %s4299_s9 = smov 0   ;;  %s4301_s10 = smov 0  }
   0x8 LB: > { %6143 = sst [smem:[#allocation6_spill]] %s4199_s24  ;;  %s3595_s11 = sadd.s32 4294967295, %s4235_s10   ;;  %s4235_s10 = sphi %s4301_s10, %s20_s10   ;;  %s4231_s9 = sphi %s4299_s9, %s6173_s9   ;;  %s4227_s8 = sphi %s4297_s8, %s6172_s8   ;;  %s4223_s30 = sphi %s4295_s30, %s6171_s30   ;;  %s4219_s29 = sphi %s4293_s29, %s6170_s29   ;;  %s4215_s28 = sphi %s4291_s28, %s6169_s28   ;;  %s4211_s27 = sphi %s4289_s27, %s6168_s27   ;;  %s4207_s26 = sphi %s4287_s26, %s6167_s26   ;;  %s4203_s25 = sphi %s4285_s25, %s6175_s25   ;;  %s4199_s24 = sphi %s4283_s24, %s6174_s24  }
   0x9   : > { %6144 = sst [smem:[#allocation7_spill]] %s4207_s26  ;;  %s3596_s12 = sadd.s32 4294967294, %s4235_s10  }
   0xa   : > { %6145 = sst [smem:[#allocation8_spill]] %s4223_s30  ;;  %s32_s13 = sadd.s32 1, %s4223_s30 }
   0xb   : > { %6146 = sst [smem:[#allocation9_spill]] %s4227_s8  ;;  %p33_p0 = scmp.ge.s32.totalorder %s32_s13, 2 }
   0xc   : > { %6147 = sst [smem:[#allocation10_spill]] %s4231_s9  ;;  %s35_s14 = sadd.s32 1, %s4227_s8 }
   0xd   : > { %6148 = sst [smem:[#allocation11_spill]] %s4235_s10  ;;  %s39_s15 = sadd.s32 1, %s4231_s9 }
   0xe   : > { %p226_p1 = scmp.ne.s32.totalorder %s4207_s26, %s4203_s25  ;;  %s6177_s13 = smov (%p33_p0, %s32_s13), 0 }
   0xf   : > { %6149 = sst [smem:[#allocation12_spill]] %s6177_s13  ;;  %s6179_s14 = smov (!%p33_p0, %s35_s14), %s4227_s8 }
  0x10   : > { %p227_p2 = scmp.eq.s32.totalorder %s3595_s11, 11  ;;  %p232_p3 = scmp.ne.s32.totalorder %s4203_s25, %s4199_s24 }
  0x11   : > { %p37_p4 = scmp.ge.s32.totalorder %s6179_s14, 3  ;;  %p233_p5 = scmp.eq.s32.totalorder %s3596_s12, 11 }
  0x12   : > { %p4345_p6 = por %p227_p2, %p226_p1  ;;  %p3599_p8 = scmp.ge.s32.totalorder %s4235_s10, 1 }
  0x13   : > { %s6181_s14 = smov (%p37_p4, %s6179_s14), 0  ;;  %s6183_s15 = smov (!%p37_p4, %s39_s15), %s4231_s9 }
  0x14   : > { %s6150_s16 = scalar_select %p4345_p6, 1, 0 }
  0x15   : > { %6152 = sst [smem:[#allocation14_spill]] %s6181_s14  ;;  %p4352_p7 = por %p233_p5, %p232_p3 }
  0x16   : > { %6151 = sst [smem:[#allocation13_spill]] %s6150_s16  ;;  %p41_p9 = scmp.ge.s32.totalorder %s6183_s15, 2 }
  0x17   : > { %s6153_s17 = scalar_select %p4352_p7, 1, 0 }
  0x18   : > { %p300_p10 = scmp.lt.s32.totalorder %s4235_s10, 13  ;;  %s212_s18 = ssub.s32 %s4227_s8, %s6181_s14 }
  0x19   : > { %6154 = sst [smem:[#allocation15_spill]] %s6153_s17  ;;  %s6185_s15 = smov (%p41_p9, %s6183_s15), 0 }
  0x1a   : > { %6155 = sst [smem:[#allocation16_spill]] %s6185_s15  ;;  %p301_p11 = pnand %p3599_p8, %p300_p10 }
  0x1b   : > { %s211_s19 = ssub.s32 %s4231_s9, %s6185_s15  ;;  %s216_s21 = sadd.s32 1, %s4207_s26 }
  0x1c   : > { %s213_s20 = sor.u32 %s212_s18, %s211_s19  ;;  %s3600_s11 = sshll.u32 (!%p301_p11), %s4215_s28, 4 }
  0x1d   : > { %p214_p12 = scmp.eq.s32.totalorder %s213_s20, 0  ;;  %304 = sbr.rel (%p301_p11) target bundleno = 2556 (0x9fc), region = 48 }
  0x1e   : > { %p353_p13 = scmp.lt.s32.totalorder (!%p301_p11), %s4219_s29, 1  ;;  %p355_p0 = scmp.lt.s32.totalorder (!%p301_p11), %s3600_s11, 47 }
  0x1f   : > { %s4366_s22 = scalar_select %p214_p12, %s4207_s26, %s216_s21  }
  0x20   : > { %p364_p1 = scmp.lt.s32.totalorder (!%p301_p11), %s4211_s27, 1  ;;  %s3604_s15 = sshll.u32 (!%p301_p11), %s4211_s27, 4 }
  0x21   : > { %6156 = sst [smem:[#allocation17_spill]] %s4366_s22  ;;  %p373_p2 = scmp.lt.s32.totalorder (!%p301_p11), %s3604_s15, 31 }
  0x22   : > { %s354_s12 = scalar_select %p353_p13, %s4219_s29, 1 }
  0x23   : > { %s6187_s11 = smov (!%p355_p0, %s3600_s11), 47  ;;  %s6189_s15 = smov (!%p373_p2, %s3604_s15), 31 }
  0x24   : > { %s3926_s18 = smul.u32 48, %s354_s12  ;;  %s3602_s19 = sshll.u32 %s354_s12, 1 }
  0x25   : > { %s365_s20 = scalar_select %p364_p1, %s4211_s27, 1 }
  0x26   : > { %s358_s21 = sadd.s32 %s3926_s18, %s6187_s11  ;;  %s3605_s24 = sshll.u32 %s354_s12, 5 }
  0x27   : > { %s3601_s14 = sshll.u32 %s358_s21, 3  ;;  %s367_s13 = sadd.s32 %s3602_s19, %s365_s20 }
  0x28   : > { %s4378_s30 = scalar_lea.vmem %s6121_s0, %s3601_s14  ;;  %s3603_s23 = sshll.u32 %s367_s13, 3 }
  0x29   : > { %s369_s17 = scalar_lea.vmem %s6122_s1, %s3603_s23  ;;  %s376_s10 = sadd.s32 %s3605_s24, %s6189_s15 }
  0x2a   : > { %s3606_s7 = sshll.u32 %s376_s10, 3  ;;  %s6157_s19 = sand.u32 1, %s4203_s25  }
  0x2b   : > { %s4386_s18 = scalar_lea.vmem %s6123_s2, %s3606_s7  ;;  %s4390_s20 = scalar_lea.vmem [#allocation3], %s6157_s19 }
  0x2c   : > { %p3607_p3 = scmp.ne.s32.totalorder %s4211_s27, 0 }
  0x2e   : > { %383 = sbr.rel (%p3607_p3) target bundleno = 68 (0x44), region = 52 }
  0x33   : > { %vm384_vm0 = vcmask 269312   ;;  %v4237_v0 = vmov 0.0  }
  0x34   : > { %385 = vst.msk [vmem:[#allocation2] sm:$0xff] %vm384_vm0, %v4237_v0 }
  0x35   : > { %386 = vst.msk [vmem:[#allocation2 + $0x8] sm:$0xff] %vm384_vm0, %v4237_v0 }
  0x36   : > { %387 = vst.msk [vmem:[#allocation2 + $0x10] sm:$0xff] %vm384_vm0, %v4237_v0 }
  0x37   : > { %388 = vst.msk [vmem:[#allocation2 + $0x18] sm:$0xff] %vm384_vm0, %v4237_v0 }
  0x38   : > { %389 = vst.msk [vmem:[#allocation2 + $0x20] sm:$0xff] %vm384_vm0, %v4237_v0 }
  0x39   : > { %390 = vst.msk [vmem:[#allocation2 + $0x28] sm:$0xff] %vm384_vm0, %v4237_v0 }
  0x3a   : > { %391 = vst.msk [vmem:[#allocation2 + $0x30] sm:$0xff] %vm384_vm0, %v4237_v0 }
  0x3b   : > { %392 = vst.msk [vmem:[#allocation2 + $0x38] sm:$0xff] %vm384_vm0, %v4237_v0 }
  0x3c   : > { %393 = vst.msk [vmem:[#allocation2 + $0x40] sm:$0xff] %vm384_vm0, %v4237_v0 }
  0x3d   : > { %394 = vst.msk [vmem:[#allocation2 + $0x48] sm:$0xff] %vm384_vm0, %v4237_v0 }
  0x3e   : > { %395 = vst.msk [vmem:[#allocation2 + $0x50] sm:$0xff] %vm384_vm0, %v4237_v0 }
  0x3f   : > { %396 = vst.msk [vmem:[#allocation2 + $0x58] sm:$0xff] %vm384_vm0, %v4237_v0 }
  0x40   : > { %397 = vst.msk [vmem:[#allocation2 + $0x60] sm:$0xff] %vm384_vm0, %v4237_v0 }
  0x41   : > { %398 = vst.msk [vmem:[#allocation2 + $0x68] sm:$0xff] %vm384_vm0, %v4237_v0 }
  0x42   : > { %399 = vst.msk [vmem:[#allocation2 + $0x70] sm:$0xff] %vm384_vm0, %v4237_v0 }
  0x43   : > { %400 = vst.msk [vmem:[#allocation2 + $0x78] sm:$0xff] %vm384_vm0, %v4237_v0 }
  0x44 PF: > { %v417_v1 = vld [vmem:[%s369_s17] sm:$0x1f]  ;;  %vm483_vm1 = vcmask 1044480   ;;  %vm434_vm2 = vcmask 39936   ;;  %v4415_v3 = vld [vmem:[%s4378_s30 + $0x50] sm:$0xff]  ;;  %v4422_v4 = vld [vmem:[%s4378_s30 + $0x8] sm:$0xff] }
  0x45   : > { %v4410_v2 = vld [vmem:[%s4378_s30] sm:$0xff]  ;;  %3608 = vmatpush.msk.msra.mxu0 %vm483_vm1, %v417_v1  ;;  %3890 = vmatpush.msk.msra.mxu3 %vm483_vm1, %v417_v1  ;;  %v4425_v5 = vld [vmem:[%s4378_s30 + $0x58] sm:$0xff]  ;;  %v4432_v6 = vld [vmem:[%s4378_s30 + $0x10] sm:$0xff]  ;;  %p3625_p4 = scmp.ne.s32.totalorder %s4211_s27, 1 }
  0x46   : > { %3609 = vmatmul.msk.f32.vlgmr.msra.gmra.mxu0 %vm434_vm2, %v4410_v2  ;;  %3619 = vmatmul.msk.f32.vlgmr.msra.gmra.mxu3 %vm434_vm2, %v4415_v3  ;;  %v4435_v7 = vld [vmem:[%s4378_s30 + $0x60] sm:$0xff]  ;;  %v4442_v8 = vld [vmem:[%s4378_s30 + $0x18] sm:$0xff]  ;;  %v4445_v9 = vld [vmem:[%s4378_s30 + $0x68] sm:$0xff]  ;;  %s4240_s10 = smov (!%p3625_p4), 64   ;;  %s4241_s15 = smov (!%p3625_p4), 32  }
  0x47   : > { %v4452_v10 = vld [vmem:[%s4378_s30 + $0x20] sm:$0xff]  ;;  %v4455_v11 = vld [vmem:[%s4378_s30 + $0x70] sm:$0xff]  ;;  %v4462_v12 = vld [vmem:[%s4378_s30 + $0x28] sm:$0xff] }
  0x48   : > { %v4465_v13 = vld [vmem:[%s4378_s30 + $0x78] sm:$0xff]  ;;  %v4472_v14 = vld [vmem:[%s4378_s30 + $0x30] sm:$0xff]  ;;  %v4482_v16 = vld [vmem:[%s4378_s30 + $0x40] sm:$0xff] }
  0x49   : > { %v4477_v15 = vld [vmem:[%s4378_s30 + $0x38] sm:$0xff]  ;;  %v4487_v17 = vld [vmem:[%s4378_s30 + $0x48] sm:$0xff]  ;;  %v432_v19 = vld [vmem:[%s4386_s18 + $0x70] sm:$0xff] }
  0x4a   : > { %v433_v18 = vld [vmem:[%s4386_s18 + $0x78] sm:$0xff]  ;;  %v431_v20 = vld [vmem:[%s4386_s18 + $0x68] sm:$0xff]  ;;  %v430_v21 = vld [vmem:[%s4386_s18 + $0x60] sm:$0xff] }
  0x4b   : > { %856 = vmatpush.msra.mxu1 %v433_v18  ;;  %3891 = vmatpush.msra.mxu2 %v433_v18  ;;  %v429_v22 = vld [vmem:[%s4386_s18 + $0x58] sm:$0xff]  ;;  %v428_v23 = vld [vmem:[%s4386_s18 + $0x50] sm:$0xff]  ;;  %v427_v24 = vld [vmem:[%s4386_s18 + $0x48] sm:$0xff] }
  0x4c   : > { %3892 = vmatpush.msrb.mxu3 %v433_v18  ;;  %v426_v25 = vld [vmem:[%s4386_s18 + $0x40] sm:$0xff]  ;;  %v425_v26 = vld [vmem:[%s4386_s18 + $0x38] sm:$0xff]  ;;  %v424_v27 = vld [vmem:[%s4386_s18 + $0x30] sm:$0xff] }
  0x4d   : > { %857 = vmatpush.msra.mxu1 %v432_v19  ;;  %3893 = vmatpush.msra.mxu2 %v432_v19  ;;  %v423_v28 = vld [vmem:[%s4386_s18 + $0x28] sm:$0xff]  ;;  %v422_v29 = vld [vmem:[%s4386_s18 + $0x20] sm:$0xff]  ;;  %v421_v30 = vld [vmem:[%s4386_s18 + $0x18] sm:$0xff] }
  0x4e   : > { %3610 = vmatmul.msk.f32.gmra.mxu0 %vm434_vm2, %v4422_v4  ;;  %3620 = vmatmul.msk.f32.gmra.mxu3 %vm434_vm2, %v4425_v5  ;;  %v420_v33 = vld [vmem:[%s4386_s18 + $0x10] sm:$0xff]  ;;  %v419_v34 = vld [vmem:[%s4386_s18 + $0x8] sm:$0xff]  ;;  %v418_v35 = vld [vmem:[%s4386_s18] sm:$0xff]  ;;  %s4239_s18 = smov (!%p3625_p4), 96  }
  0x4f   : > { %3894 = vmatpush.msrb.mxu3 %v432_v19  ;;  %858 = vmatpush.msra.mxu1 %v431_v20 }
  0x50   : > { %3895 = vmatpush.msra.mxu2 %v431_v20 }
  0x51   : > { %3896 = vmatpush.msrb.mxu3 %v431_v20  ;;  %859 = vmatpush.msra.mxu1 %v430_v21 }
  0x52   : > { %3897 = vmatpush.msra.mxu2 %v430_v21 }
  0x53   : > { %3898 = vmatpush.msrb.mxu3 %v430_v21  ;;  %860 = vmatpush.msra.mxu1 %v429_v22 }
  0x54   : > { %3899 = vmatpush.msra.mxu2 %v429_v22 }
  0x55   : > { %3900 = vmatpush.msrb.mxu3 %v429_v22  ;;  %861 = vmatpush.msra.mxu1 %v428_v23 }
  0x56   : > { %3611 = vmatmul.msk.f32.gmra.mxu0 %vm434_vm2, %v4432_v6  ;;  %3621 = vmatmul.msk.f32.gmra.mxu3 %vm434_vm2, %v4435_v7 }
  0x57   : > { %3901 = vmatpush.msra.mxu2 %v428_v23  ;;  %3902 = vmatpush.msrb.mxu3 %v428_v23 }
  0x58   : > { %862 = vmatpush.msra.mxu1 %v427_v24 }
  0x59   : > { %3903 = vmatpush.msra.mxu2 %v427_v24  ;;  %3904 = vmatpush.msrb.mxu3 %v427_v24 }
  0x5a   : > { %863 = vmatpush.msra.mxu1 %v426_v25 }
  0x5b   : > { %3905 = vmatpush.msra.mxu2 %v426_v25  ;;  %3906 = vmatpush.msrb.mxu3 %v426_v25 }
  0x5c   : > { %864 = vmatpush.msra.mxu1 %v425_v26 }
  0x5d   : > { %3907 = vmatpush.msra.mxu2 %v425_v26  ;;  %3908 = vmatpush.msrb.mxu3 %v425_v26 }
  0x5e   : > { %3612 = vmatmul.msk.f32.gmra.mxu0 %vm434_vm2, %v4442_v8  ;;  %3622 = vmatmul.msk.f32.gmra.mxu3 %vm434_vm2, %v4445_v9 }
  0x5f   : > { %865 = vmatpush.msra.mxu1 %v424_v27  ;;  %3909 = vmatpush.msra.mxu2 %v424_v27 }
  0x60   : > { %3910 = vmatpush.msrb.mxu3 %v424_v27 }
  0x61   : > { %866 = vmatpush.msra.mxu1 %v423_v28  ;;  %3911 = vmatpush.msra.mxu2 %v423_v28 }
  0x62   : > { %3912 = vmatpush.msrb.mxu3 %v423_v28 }
  0x63   : > { %867 = vmatpush.msra.mxu1 %v422_v29  ;;  %3913 = vmatpush.msra.mxu2 %v422_v29 }
  0x64   : > { %3914 = vmatpush.msrb.mxu3 %v422_v29 }
  0x65   : > { %868 = vmatpush.msra.mxu1 %v421_v30  ;;  %3915 = vmatpush.msra.mxu2 %v421_v30 }
  0x66   : > { %3613 = vmatmul.msk.f32.gmra.mxu0 %vm434_vm2, %v4452_v10  ;;  %3623 = vmatmul.msk.f32.gmra.mxu3 %vm434_vm2, %v4455_v11 }
  0x67   : > { %3916 = vmatpush.msrb.mxu3 %v421_v30  ;;  %869 = vmatpush.msra.mxu1 %v420_v33 }
  0x68   : > { %3917 = vmatpush.msra.mxu2 %v420_v33 }
  0x69   : > { %3918 = vmatpush.msrb.mxu3 %v420_v33  ;;  %870 = vmatpush.msra.mxu1 %v419_v34 }
  0x6a   : > { %3919 = vmatpush.msra.mxu2 %v419_v34 }
  0x6b   : > { %3920 = vmatpush.msrb.mxu3 %v419_v34  ;;  %871 = vmatpush.msra.mxu1 %v418_v35 }
  0x6c   : > { %3921 = vmatpush.msra.mxu2 %v418_v35 }
  0x6d   : > { %3922 = vmatpush.msrb.mxu3 %v418_v35 }
  0x6e   : > { %3614 = vmatmul.msk.f32.gmra.mxu0 %vm434_vm2, %v4462_v12  ;;  %3624 = vmatmul.msk.f32.gmra.mxu3 %vm434_vm2, %v4465_v13 }
  0x76   : > { %3615 = vmatmul.msk.f32.gmra.mxu0 %vm434_vm2, %v4472_v14 }
  0x7e   : > { %3616 = vmatmul.msk.f32.gmra.mxu0 %vm434_vm2, %v4477_v15 }
  0x86   : > { %3617 = vmatmul.msk.f32.gmra.mxu0 %vm434_vm2, %v4482_v16 }
  0x8e   : > { %3618 = vmatmul.msk.f32.gmra.mxu0 %vm434_vm2, %v4487_v17 }
  0xc3   : > { %v504_v31 = vpop.f32.mrf.mxu0 }
  0xc4   : > { %v552_v32 = vmax.f32 %v504_v31, 0.0 }
  0xc6   : > { %4021 = vrsqrt.f32 %v552_v32  ;;  %vm575_vm3 = vcmp.eq.f32.partialorder %v552_v32, inf  ;;  %v578_v52 = vand.u32 2147483648, %v552_v32  ;;  %vm577_vm4 = vcmp.eq.f32.partialorder %v552_v32, 0.0 }
  0xc9   : > { %v534_v36 = vpop.f32.mrf.mxu3 }
  0xca   : > { %v4521_v35 = vmax.f32 %v534_v36, 0.0 }
  0xcb   : > { %v507_v37 = vpop.f32.mrf.mxu0 }
  0xcc   : > { %v4022_v38 = vpop.eup %4021  ;;  %v553_v39 = vmax.f32 %v507_v37, 0.0 }
  0xcd   : > { %v569_v40 = vmul.f32 %v4022_v38, %v552_v32 }
  0xce   : > { %4023 = vrsqrt.f32 %v553_v39  ;;  %vm587_vm5 = vcmp.eq.f32.partialorder %v553_v39, inf  ;;  %v590_v20 = vand.u32 2147483648, %v553_v39  ;;  %vm589_vm6 = vcmp.eq.f32.partialorder %v553_v39, 0.0 }
  0xcf   : > { %v570_v41 = vmul.f32 %v4022_v38, %v569_v40 }
  0xd1   : > { %v571_v42 = vmul.f32 0.5, %v570_v41  ;;  %v4507_v43 = vpop.f32.mrf.mxu3 }
  0xd3   : > { %v510_v44 = vpop.f32.mrf.mxu0  ;;  %v572_v45 = vsub.f32 1.5, %v571_v42 }
  0xd4   : > { %v4024_v46 = vpop.eup %4023  ;;  %v554_v47 = vmax.f32 %v510_v44, 0.0 }
  0xd5   : > { %v573_v48 = vmul.f32 %v4022_v38, %v572_v45  ;;  %v581_v49 = vmul.f32 %v4024_v46, %v553_v39 }
  0xd6   : > { %4025 = vrsqrt.f32 %v554_v47  ;;  %vm599_vm7 = vcmp.eq.f32.partialorder %v554_v47, inf  ;;  %v602_v40 = vand.u32 2147483648, %v554_v47  ;;  %vm601_vm8 = vcmp.eq.f32.partialorder %v554_v47, 0.0 }
  0xd7   : > { %v574_v50 = vmul.f32 %v573_v48, %v552_v32  ;;  %v582_v51 = vmul.f32 %v4024_v46, %v581_v49 }
  0xd9   : > { %v576_v53 = vsel %vm575_vm3, %v552_v32, %v574_v50  ;;  %v583_v54 = vmul.f32 0.5, %v582_v51  ;;  %v4509_v55 = vpop.f32.mrf.mxu3 }
  0xda   : > { %v579_v56 = vsel %vm577_vm4, %v578_v52, %v576_v53 }
  0xdb   : > { %v513_v57 = vpop.f32.mrf.mxu0  ;;  %v760_v58 = vadd.f32 1e-05, %v579_v56  ;;  %v584_v59 = vsub.f32 1.5, %v583_v54 }
  0xdc   : > { %v4026_v60 = vpop.eup %4025  ;;  %v4511_v61 = vmax.f32 %v513_v57, 0.0 }
  0xdd   : > { %v776_v62 = vmul.f32 %v760_v58, %v760_v58  ;;  %v585_v63 = vmul.f32 %v4024_v46, %v584_v59  ;;  %v593_v0 = vmul.f32 %v4026_v60, %v554_v47 }
  0xde   : > { %4027 = vrsqrt.f32 %v4511_v61  ;;  %vm611_vm9 = vcmp.eq.f32.partialorder %v4511_v61, inf  ;;  %vm613_vm10 = vcmp.eq.f32.partialorder %v4511_v61, 0.0 }
  0xdf   : > { %v792_v1 = vmul.f32 -4.0, %v776_v62  ;;  %v586_v18 = vmul.f32 %v585_v63, %v553_v39  ;;  %v594_v19 = vmul.f32 %v4026_v60, %v593_v0 }
  0xe1   : > { %v808_v21 = vmul.f32 1.442695, %v792_v1  ;;  %v588_v22 = vsel %vm587_vm5, %v553_v39, %v586_v18  ;;  %v595_v23 = vmul.f32 0.5, %v594_v19  ;;  %v543_v24 = vpop.f32.mrf.mxu3  ;;  %v614_v18 = vand.u32 2147483648, %v4511_v61 }
  0xe2   : > { %v591_v25 = vsel %vm589_vm6, %v590_v20, %v588_v22  ;;  %v4514_v26 = vmax.f32 %v543_v24, 0.0 }
  0xe3   : > { %v516_v27 = vpop.f32.mrf.mxu0  ;;  %4029 = vpow2.f32 %v808_v21  ;;  %v761_v28 = vadd.f32 1e-05, %v591_v25  ;;  %v596_v29 = vsub.f32 1.5, %v595_v23 }
  0xe4   : > { %v4028_v30 = vpop.eup %4027  ;;  %v4516_v31 = vmax.f32 %v516_v27, 0.0  ;;  %4031 = vrsqrt.f32 %v4514_v26  ;;  %vm731_vm12 = vcmp.eq.f32.partialorder %v4514_v26, inf  ;;  %vm733_vm13 = vcmp.eq.f32.partialorder %v4514_v26, 0.0 }
  0xe5   : > { %v777_v32 = vmul.f32 %v761_v28, %v761_v28  ;;  %v597_v33 = vmul.f32 %v4026_v60, %v596_v29  ;;  %v605_v34 = vmul.f32 %v4028_v30, %v4511_v61 }
  0xe6   : > { %4033 = vrsqrt.f32 %v4516_v31  ;;  %vm623_vm11 = vcmp.eq.f32.partialorder %v4516_v31, inf  ;;  %vm625_vm14 = vcmp.eq.f32.partialorder %v4516_v31, 0.0 }
  0xe7   : > { %v793_v37 = vmul.f32 -4.0, %v777_v32  ;;  %v598_v38 = vmul.f32 %v597_v33, %v554_v47  ;;  %v606_v39 = vmul.f32 %v4028_v30, %v605_v34  ;;  %4035 = vrsqrt.f32 %v4521_v35 }
  0xe9   : > { %v4030_v41 = vpop.eup %4029  ;;  %v810_v42 = vmul.f32 1.442695, %v793_v37  ;;  %v600_v44 = vsel %vm599_vm7, %v554_v47, %v598_v38  ;;  %v607_v45 = vmul.f32 0.5, %v606_v39  ;;  %v546_v46 = vpop.f32.mrf.mxu3  ;;  %v4544_v37 = vmax.f32 %v4507_v43, 0.0 }
  0xea   : > { %v4032_v48 = vpop.eup %4031  ;;  %872 = vmatmul.f32.vlgmr.msra.gmra.mxu1 %v4030_v41  ;;  %v603_v49 = vsel %vm601_vm8, %v602_v40, %v600_v44  ;;  %v4524_v50 = vmax.f32 %v546_v46, 0.0  ;;  %v626_v43 = vand.u32 2147483648, %v4516_v31 }
  0xeb   : > { %v519_v36 = vpop.f32.mrf.mxu0  ;;  %4037 = vpow2.f32 %v810_v42  ;;  %v762_v51 = vadd.f32 1e-05, %v603_v49  ;;  %v725_v52 = vmul.f32 %v4032_v48, %v4514_v26  ;;  %v608_v53 = vsub.f32 1.5, %v607_v45 }
  0xec   : > { %v4034_v54 = vpop.eup %4033  ;;  %v4527_v56 = vmax.f32 %v519_v36, 0.0  ;;  %4039 = vrsqrt.f32 %v4524_v50  ;;  %v734_v36 = vand.u32 2147483648, %v4514_v26  ;;  %vm743_vm3 = vcmp.eq.f32.partialorder %v4524_v50, inf }
  0xed   : > { %v778_v47 = vmul.f32 %v762_v51, %v762_v51  ;;  %v726_v57 = vmul.f32 %v4032_v48, %v725_v52  ;;  %v609_v58 = vmul.f32 %v4028_v30, %v608_v53  ;;  %v617_v59 = vmul.f32 %v4034_v54, %v4516_v31  ;;  %v4533_v1 = vpop.eup %4035 }
  0xee   : > { %4041 = vrsqrt.f32 %v4527_v56  ;;  %v689_v44 = vmul.f32 %v4533_v1, %v4521_v35  ;;  %vm635_vm15 = vcmp.eq.f32.partialorder %v4527_v56, inf  ;;  %vm637_vm0 = vcmp.eq.f32.partialorder %v4527_v56, 0.0 }
  0xef   : > { %v794_v60 = vmul.f32 -4.0, %v778_v47  ;;  %v727_v62 = vmul.f32 0.5, %v726_v57  ;;  %v610_v63 = vmul.f32 %v609_v58, %v4511_v61  ;;  %v618_v0 = vmul.f32 %v4034_v54, %v617_v59 }
  0xf0   : > { %vm745_vm4 = vcmp.eq.f32.partialorder %v4524_v50, 0.0 }
  0xf1   : > { %v4038_v19 = vpop.eup %4037  ;;  %v812_v20 = vmul.f32 1.442695, %v794_v60  ;;  %v728_v21 = vsub.f32 1.5, %v727_v62  ;;  %v612_v22 = vsel %vm611_vm9, %v4511_v61, %v610_v63  ;;  %v619_v23 = vmul.f32 0.5, %v618_v0  ;;  %v549_v24 = vpop.f32.mrf.mxu3 }
  0xf2   : > { %v4539_v25 = vpop.eup %4039  ;;  %875 = vmatmul.f32.gmra.mxu1 %v4038_v19  ;;  %v615_v27 = vsel %vm613_vm10, %v614_v18, %v612_v22  ;;  %v4541_v28 = vmax.f32 %v549_v24, 0.0 }
  0xf3   : > { %v522_v29 = vpop.f32.mrf.mxu0  ;;  %4043 = vpow2.f32 %v812_v20  ;;  %v763_v30 = vadd.f32 1e-05, %v615_v27  ;;  %v620_v32 = vsub.f32 1.5, %v619_v23  ;;  %v729_v33 = vmul.f32 %v4032_v48, %v728_v21 }
  0xf4   : > { %v4042_v34 = vpop.eup %4041  ;;  %v4546_v38 = vmax.f32 %v522_v29, 0.0  ;;  %4045 = vrsqrt.f32 %v4541_v28  ;;  %v737_v61 = vmul.f32 %v4539_v25, %v4524_v50  ;;  %vm755_vm7 = vcmp.eq.f32.partialorder %v4541_v28, inf }
  0xf5   : > { %v779_v39 = vmul.f32 %v763_v30, %v763_v30  ;;  %v621_v40 = vmul.f32 %v4034_v54, %v620_v32  ;;  %v629_v41 = vmul.f32 %v4042_v34, %v4527_v56  ;;  %v730_v42 = vmul.f32 %v729_v33, %v4514_v26 }
  0xf6   : > { %4047 = vrsqrt.f32 %v4546_v38  ;;  %v738_v51 = vmul.f32 %v4539_v25, %v737_v61  ;;  %v638_v61 = vand.u32 2147483648, %v4527_v56  ;;  %vm647_vm5 = vcmp.eq.f32.partialorder %v4546_v38, inf }
  0xf7   : > { %v795_v45 = vmul.f32 -4.0, %v779_v39  ;;  %v622_v46 = vmul.f32 %v621_v40, %v4516_v31  ;;  %v630_v48 = vmul.f32 %v4042_v34, %v629_v41  ;;  %v732_v49 = vsel %vm731_vm12, %v4514_v26, %v730_v42 }
  0xf8   : > { %v735_v59 = vsel %vm733_vm13, %v734_v36, %v732_v49  ;;  %v739_v60 = vmul.f32 0.5, %v738_v51  ;;  %v746_v39 = vand.u32 2147483648, %v4524_v50  ;;  %vm649_vm6 = vcmp.eq.f32.partialorder %v4546_v38, 0.0 }
  0xf9   : > { %v4044_v52 = vpop.eup %4043  ;;  %v814_v53 = vmul.f32 1.442695, %v795_v45  ;;  %v624_v54 = vsel %vm623_vm11, %v4516_v31, %v622_v46  ;;  %v631_v47 = vmul.f32 0.5, %v630_v48  ;;  %v773_v26 = vadd.f32 1e-05, %v735_v59 }
  0xfa   : > { %v4566_v57 = vpop.eup %4045  ;;  %878 = vmatmul.f32.gmra.mxu1 %v4044_v52  ;;  %v627_v58 = vsel %vm625_vm14, %v626_v43, %v624_v54  ;;  %v740_v20 = vsub.f32 1.5, %v739_v60  ;;  %v690_v31 = vmul.f32 %v4533_v1, %v689_v44  ;;  %vm757_vm8 = vcmp.eq.f32.partialorder %v4541_v28, 0.0 }
  0xfb   : > { %v525_v62 = vpop.f32.mrf.mxu0  ;;  %4049 = vpow2.f32 %v814_v53  ;;  %v764_v63 = vadd.f32 1e-05, %v627_v58  ;;  %v632_v0 = vsub.f32 1.5, %v631_v47  ;;  %v789_v24 = vmul.f32 %v773_v26, %v773_v26 }
  0xfc   : > { %v4048_v18 = vpop.eup %4047  ;;  %4051 = vrsqrt.f32 %v4544_v37  ;;  %v4569_v19 = vmax.f32 %v525_v62, 0.0  ;;  %v749_v27 = vmul.f32 %v4566_v57, %v4541_v28  ;;  %v4598_v62 = vmax.f32 %v4509_v55, 0.0 }
  0xfd   : > { %v780_v21 = vmul.f32 %v764_v63, %v764_v63  ;;  %v633_v22 = vmul.f32 %v4042_v34, %v632_v0  ;;  %v641_v23 = vmul.f32 %v4048_v18, %v4546_v38  ;;  %v805_v33 = vmul.f32 -4.0, %v789_v24 }
  0xfe   : > { %4053 = vrsqrt.f32 %v4569_v19  ;;  %v741_v34 = vmul.f32 %v4539_v25, %v740_v20  ;;  %v750_v25 = vmul.f32 %v4566_v57, %v749_v27  ;;  %v691_v63 = vmul.f32 0.5, %v690_v31 }
  0xff   : > { %v796_v29 = vmul.f32 -4.0, %v780_v21  ;;  %v634_v30 = vmul.f32 %v633_v22, %v4527_v56  ;;  %v642_v32 = vmul.f32 %v4048_v18, %v641_v23  ;;  %v834_v44 = vmul.f32 1.442695, %v805_v33 }
 0x100   : > { %v742_v48 = vmul.f32 %v741_v34, %v4524_v50  ;;  %vm659_vm9 = vcmp.eq.f32.partialorder %v4569_v19, inf  ;;  %vm661_vm10 = vcmp.eq.f32.partialorder %v4569_v19, 0.0  ;;  %vm695_vm11 = vcmp.eq.f32.partialorder %v4521_v35, inf }
 0x101   : > { %v4050_v40 = vpop.eup %4049  ;;  %v816_v41 = vmul.f32 1.442695, %v796_v29  ;;  %v636_v42 = vsel %vm635_vm15, %v4527_v56, %v634_v30  ;;  %v643_v43 = vmul.f32 0.5, %v642_v32  ;;  %v751_v56 = vmul.f32 0.5, %v750_v25 }
 0x102   : > { %v4584_v45 = vpop.eup %4051  ;;  %881 = vmatmul.f32.gmra.mxu1 %v4050_v40  ;;  %v639_v46 = vsel %vm637_vm0, %v638_v61, %v636_v42  ;;  %v744_v54 = vsel %vm743_vm3, %v4524_v50, %v742_v48  ;;  %v650_v50 = vand.u32 2147483648, %v4546_v38  ;;  %v758_v42 = vand.u32 2147483648, %v4541_v28 }
 0x103   : > { %v528_v49 = vpop.f32.mrf.mxu0  ;;  %4055 = vpow2.f32 %v816_v41  ;;  %v765_v36 = vadd.f32 1e-05, %v639_v46  ;;  %v644_v51 = vsub.f32 1.5, %v643_v43  ;;  %v747_v60 = vsel %vm745_vm4, %v746_v39, %v744_v54 }
 0x104   : > { %v4054_v52 = vpop.eup %4053  ;;  %v4591_v53 = vmax.f32 %v528_v49, 0.0  ;;  %4057 = vpow2.f32 %v834_v44  ;;  %v774_v21 = vadd.f32 1e-05, %v747_v60  ;;  %v701_v32 = vmul.f32 %v4584_v45, %v4544_v37 }
 0x105   : > { %v781_v47 = vmul.f32 %v765_v36, %v765_v36  ;;  %v645_v58 = vmul.f32 %v4048_v18, %v644_v51  ;;  %v653_v59 = vmul.f32 %v4054_v52, %v4569_v19  ;;  %v752_v18 = vsub.f32 1.5, %v751_v56 }
 0x106   : > { %4059 = vrsqrt.f32 %v4591_v53  ;;  %v790_v27 = vmul.f32 %v774_v21, %v774_v21  ;;  %v692_v48 = vsub.f32 1.5, %v691_v63  ;;  %v702_v25 = vmul.f32 %v4584_v45, %v701_v32 }
 0x107   : > { %v797_v0 = vmul.f32 -4.0, %v781_v47  ;;  %v646_v26 = vmul.f32 %v645_v58, %v4546_v38  ;;  %v654_v20 = vmul.f32 %v4054_v52, %v653_v59  ;;  %4061 = vrsqrt.f32 %v4598_v62 }
 0x108   : > { %v753_v30 = vmul.f32 %v4566_v57, %v752_v18  ;;  %v806_v39 = vmul.f32 -4.0, %v790_v27  ;;  %v703_v18 = vmul.f32 0.5, %v702_v25  ;;  %vm671_vm12 = vcmp.eq.f32.partialorder %v4591_v53, inf }
 0x109   : > { %v4056_v22 = vpop.eup %4055  ;;  %v818_v23 = vmul.f32 1.442695, %v797_v0  ;;  %v648_v55 = vsel %vm647_vm5, %v4546_v38, %v646_v26  ;;  %v655_v24 = vmul.f32 0.5, %v654_v20  ;;  %v693_v20 = vmul.f32 %v4533_v1, %v692_v48 }
 0x10a   : > { %v4058_v29 = vpop.eup %4057  ;;  %884 = vmatmul.f32.gmra.mxu1 %v4056_v22  ;;  %v651_v31 = vsel %vm649_vm6, %v650_v50, %v648_v55  ;;  %v754_v41 = vmul.f32 %v753_v30, %v4541_v28  ;;  %v836_v46 = vmul.f32 1.442695, %v806_v39  ;;  %vm673_vm13 = vcmp.eq.f32.partialorder %v4591_v53, 0.0 }
 0x10b   : > { %v531_v33 = vpop.f32.mrf.mxu0  ;;  %4063 = vpow2.f32 %v818_v23  ;;  %v766_v61 = vadd.f32 1e-05, %v651_v31  ;;  %v656_v34 = vsub.f32 1.5, %v655_v24  ;;  %911 = vmatmul.f32.vlgmr.msrb.gmra.mxu3 %v4058_v29  ;;  %v694_v31 = vmul.f32 %v693_v20, %v4521_v35 }
 0x10c   : > { %v4060_v40 = vpop.eup %4059  ;;  %v4610_v38 = vmax.f32 %v531_v33, 0.0  ;;  %v756_v56 = vsel %vm755_vm7, %v4541_v28, %v754_v41  ;;  %v704_v33 = vsub.f32 1.5, %v703_v18  ;;  %v698_v25 = vand.u32 2147483648, %v4521_v35 }
 0x10d   : > { %v782_v43 = vmul.f32 %v766_v61, %v766_v61  ;;  %v657_v57 = vmul.f32 %v4054_v52, %v656_v34  ;;  %v665_v44 = vmul.f32 %v4060_v40, %v4591_v53  ;;  %v4620_v54 = vpop.eup %4061  ;;  %v662_v52 = vand.u32 2147483648, %v4569_v19 }
 0x10e   : > { %4065 = vrsqrt.f32 %v4610_v38  ;;  %v759_v63 = vsel %vm757_vm8, %v758_v42, %v756_v56  ;;  %v713_v55 = vmul.f32 %v4620_v54, %v4598_v62  ;;  %v674_v61 = vand.u32 2147483648, %v4591_v53 }
 0x10f   : > { %v798_v49 = vmul.f32 -4.0, %v782_v43  ;;  %v658_v36 = vmul.f32 %v657_v57, %v4569_v19  ;;  %v666_v51 = vmul.f32 %v4060_v40, %v665_v44  ;;  %4067 = vpow2.f32 %v836_v46 }
 0x110   : > { %v775_v26 = vadd.f32 1e-05, %v759_v63  ;;  %v714_v39 = vmul.f32 %v4620_v54, %v713_v55  ;;  %v696_v48 = vsel %vm695_vm11, %v4521_v35, %v694_v31  ;;  %vm697_vm14 = vcmp.eq.f32.partialorder %v4521_v35, 0.0 }
 0x111   : > { %v4064_v47 = vpop.eup %4063  ;;  %v820_v58 = vmul.f32 1.442695, %v798_v49  ;;  %v660_v59 = vsel %vm659_vm9, %v4569_v19, %v658_v36  ;;  %v667_v60 = vmul.f32 0.5, %v666_v51  ;;  %v705_v49 = vmul.f32 %v4584_v45, %v704_v33 }
 0x112   : > { %887 = vmatmul.f32.gmra.mxu1 %v4064_v47  ;;  %v663_v0 = vsel %vm661_vm10, %v662_v52, %v660_v59  ;;  %v791_v23 = vmul.f32 %v775_v26, %v775_v26  ;;  %vm683_vm15 = vcmp.eq.f32.partialorder %v4610_v38, inf  ;;  %v699_v59 = vsel %vm697_vm14, %v698_v25, %v696_v48  ;;  %v841_v25 = vld [vmem:[#allocation2 + $0x8] sm:$0xff] }
 0x113   : > { %4069 = vpow2.f32 %v820_v58  ;;  %v767_v21 = vadd.f32 1e-05, %v663_v0  ;;  %v668_v50 = vsub.f32 1.5, %v667_v60  ;;  %v686_v58 = vand.u32 2147483648, %v4610_v38 }
 0x114   : > { %v4066_v22 = vpop.eup %4065  ;;  %v807_v29 = vmul.f32 -4.0, %v791_v23  ;;  %v706_v60 = vmul.f32 %v705_v49, %v4544_v37  ;;  %vm685_vm0 = vcmp.eq.f32.partialorder %v4610_v38, 0.0  ;;  %vm707_vm3 = vcmp.eq.f32.partialorder %v4544_v37, inf }
 0x115   : > { %v4068_v24 = vpop.eup %4067  ;;  %v783_v19 = vmul.f32 %v767_v21, %v767_v21  ;;  %v669_v27 = vmul.f32 %v4060_v40, %v668_v50  ;;  %v677_v28 = vmul.f32 %v4066_v22, %v4610_v38  ;;  %v770_v21 = vadd.f32 1e-05, %v699_v59  ;;  %v844_v59 = vld [vmem:[#allocation2 + $0x20] sm:$0xff] }
 0x116   : > { %914 = vmatmul.f32.gmra.mxu3 %v4068_v24  ;;  %v838_v34 = vmul.f32 1.442695, %v807_v29  ;;  %v710_v50 = vand.u32 2147483648, %v4544_v37  ;;  %vm709_vm4 = vcmp.eq.f32.partialorder %v4544_v37, 0.0  ;;  %vm719_vm5 = vcmp.eq.f32.partialorder %v4598_v62, inf }
 0x117   : > { %v799_v1 = vmul.f32 -4.0, %v783_v19  ;;  %v670_v30 = vmul.f32 %v669_v27, %v4591_v53  ;;  %v678_v32 = vmul.f32 %v4066_v22, %v677_v28  ;;  %vm721_vm6 = vcmp.eq.f32.partialorder %v4598_v62, 0.0 }
 0x118   : > { %4071 = vpow2.f32 %v838_v34  ;;  %vm937_vm7 = vcmask 269312  }
 0x119   : > { %v4070_v40 = vpop.eup %4069  ;;  %v822_v41 = vmul.f32 1.442695, %v799_v1  ;;  %v672_v42 = vsel %vm671_vm12, %v4591_v53, %v670_v30  ;;  %v679_v43 = vmul.f32 0.5, %v678_v32  ;;  %v715_v53 = vmul.f32 0.5, %v714_v39 }
 0x11a   : > { %890 = vmatmul.f32.vlgmr.msra.gmra.mxu2 %v4070_v40  ;;  %v675_v57 = vsel %vm673_vm13, %v674_v61, %v672_v42  ;;  %v722_v1 = vand.u32 2147483648, %v4598_v62 }
 0x11b   : > { %4073 = vpow2.f32 %v822_v41  ;;  %v768_v44 = vadd.f32 1e-05, %v675_v57  ;;  %v680_v46 = vsub.f32 1.5, %v679_v43  ;;  %v716_v35 = vsub.f32 1.5, %v715_v53 }
 0x11d   : > { %v784_v36 = vmul.f32 %v768_v44, %v768_v44  ;;  %v681_v51 = vmul.f32 %v4066_v22, %v680_v46  ;;  %v708_v22 = vsel %vm707_vm3, %v4544_v37, %v706_v60  ;;  %v717_v23 = vmul.f32 %v4620_v54, %v716_v35 }
 0x11e   : > { %v4072_v47 = vpop.eup %4071  ;;  %v711_v24 = vsel %vm709_vm4, %v710_v50, %v708_v22  ;;  %v854_v50 = vld [vmem:[#allocation2 + $0x70] sm:$0xff] }
 0x11f   : > { %v800_v52 = vmul.f32 -4.0, %v784_v36  ;;  %v682_v56 = vmul.f32 %v681_v51, %v4610_v38  ;;  %917 = vmatmul.f32.gmra.mxu3 %v4072_v47  ;;  %v718_v28 = vmul.f32 %v717_v23, %v4598_v62  ;;  %v771_v31 = vadd.f32 1e-05, %v711_v24  ;;  %v842_v51 = vld [vmem:[#allocation2 + $0x10] sm:$0xff]  ;;  %v855_v24 = vld [vmem:[#allocation2 + $0x78] sm:$0xff] }
 0x120   : > { %v846_v23 = vld [vmem:[#allocation2 + $0x30] sm:$0xff] }
 0x121   : > { %v4074_v63 = vpop.eup %4073  ;;  %v824_v0 = vmul.f32 1.442695, %v800_v52  ;;  %v684_v45 = vsel %vm683_vm15, %v4610_v38, %v682_v56  ;;  %v786_v38 = vmul.f32 %v770_v21, %v770_v21  ;;  %v720_v30 = vsel %vm719_vm5, %v4598_v62, %v718_v28  ;;  %v840_v62 = vld [vmem:[#allocation2] sm:$0xff]  ;;  %v843_v56 = vld [vmem:[#allocation2 + $0x18] sm:$0xff] }
 0x122   : > { %893 = vmatmul.f32.gmra.mxu2 %v4074_v63  ;;  %v687_v26 = vsel %vm685_vm0, %v686_v58, %v684_v45  ;;  %v787_v54 = vmul.f32 %v771_v31, %v771_v31  ;;  %v723_v32 = vsel %vm721_vm6, %v722_v1, %v720_v30  ;;  %v845_v45 = vld [vmem:[#allocation2 + $0x28] sm:$0xff]  ;;  %v848_v1 = vld [vmem:[#allocation2 + $0x40] sm:$0xff] }
 0x123   : > { %4075 = vpow2.f32 %v824_v0  ;;  %v769_v20 = vadd.f32 1e-05, %v687_v26  ;;  %v802_v29 = vmul.f32 -4.0, %v786_v38  ;;  %v772_v34 = vadd.f32 1e-05, %v723_v32  ;;  %v853_v0 = vld [vmem:[#allocation2 + $0x68] sm:$0xff] }
 0x124   : > { %v803_v61 = vmul.f32 -4.0, %v787_v54  ;;  %v849_v54 = vld [vmem:[#allocation2 + $0x48] sm:$0xff] }
 0x125   : > { %v785_v18 = vmul.f32 %v769_v20, %v769_v20  ;;  %v828_v37 = vmul.f32 1.442695, %v802_v29  ;;  %v788_v40 = vmul.f32 %v772_v34, %v772_v34 }
 0x126   : > { %v830_v39 = vmul.f32 1.442695, %v803_v61  ;;  %v850_v61 = vld [vmem:[#allocation2 + $0x50] sm:$0xff] }
 0x127   : > { %v801_v55 = vmul.f32 -4.0, %v785_v18  ;;  %v804_v42 = vmul.f32 -4.0, %v788_v40  ;;  %v851_v40 = vld [vmem:[#allocation2 + $0x58] sm:$0xff] }
 0x129   : > { %v4076_v19 = vpop.eup %4075  ;;  %v826_v27 = vmul.f32 1.442695, %v801_v55  ;;  %v832_v43 = vmul.f32 1.442695, %v804_v42 }
 0x12a   : > { %896 = vmatmul.f32.gmra.mxu2 %v4076_v19  ;;  %v847_v19 = vld [vmem:[#allocation2 + $0x38] sm:$0xff] }
 0x12b   : > { %4077 = vpow2.f32 %v826_v27 }
 0x12c   : > { %4079 = vpow2.f32 %v828_v37 }
 0x12d   : > { %4081 = vpow2.f32 %v830_v39 }
 0x12e   : > { %4083 = vpow2.f32 %v832_v43  ;;  %v852_v43 = vld [vmem:[#allocation2 + $0x60] sm:$0xff] }
 0x131   : > { %v4078_v33 = vpop.eup %4077 }
 0x132   : > { %899 = vmatmul.f32.gmra.mxu2 %v4078_v33  ;;  %v4080_v41 = vpop.eup %4079 }
 0x133   : > { %v4082_v57 = vpop.eup %4081 }
 0x134   : > { %v4084_v44 = vpop.eup %4083 }
 0x13a   : > { %902 = vmatmul.f32.gmra.mxu2 %v4080_v41 }
 0x142   : > { %905 = vmatmul.f32.gmra.mxu2 %v4082_v57 }
 0x14a   : > { %908 = vmatmul.f32.gmra.mxu2 %v4084_v44 }
 0x167   : > { %v873_v46 = vpop.f32.mrf.mxu1 }
 0x168   : > { %v921_v48 = vadd.f32 %v873_v46, %v840_v62 }
 0x16a   : > { %938 = vst.msk [vmem:[#allocation2] sm:$0xff] %vm937_vm7, %v921_v48 }
 0x16f   : > { %v876_v49 = vpop.f32.mrf.mxu1 }
 0x170   : > { %v922_v36 = vadd.f32 %v876_v49, %v841_v25 }
 0x172   : > { %939 = vst.msk [vmem:[#allocation2 + $0x8] sm:$0xff] %vm937_vm7, %v922_v36 }
 0x177   : > { %v879_v53 = vpop.f32.mrf.mxu1 }
 0x178   : > { %v923_v52 = vadd.f32 %v879_v53, %v842_v51 }
 0x17a   : > { %940 = vst.msk [vmem:[#allocation2 + $0x10] sm:$0xff] %vm937_vm7, %v923_v52 }
 0x17f   : > { %v882_v47 = vpop.f32.mrf.mxu1 }
 0x180   : > { %v924_v58 = vadd.f32 %v882_v47, %v843_v56 }
 0x182   : > { %941 = vst.msk [vmem:[#allocation2 + $0x18] sm:$0xff] %vm937_vm7, %v924_v58 }
 0x187   : > { %v885_v60 = vpop.f32.mrf.mxu1 }
 0x188   : > { %v925_v63 = vadd.f32 %v885_v60, %v844_v59 }
 0x18a   : > { %942 = vst.msk [vmem:[#allocation2 + $0x20] sm:$0xff] %vm937_vm7, %v925_v63 }
 0x18e   : > { %v912_v35 = vpop.f32.mrf.mxu3 }
 0x18f   : > { %v888_v26 = vpop.f32.mrf.mxu1  ;;  %v934_v20 = vadd.f32 %v912_v35, %v853_v0 }
 0x190   : > { %v926_v21 = vadd.f32 %v888_v26, %v845_v45 }
 0x191   : > { %951 = vst.msk [vmem:[#allocation2 + $0x68] sm:$0xff] %vm937_vm7, %v934_v20 }
 0x192   : > { %943 = vst.msk [vmem:[#allocation2 + $0x28] sm:$0xff] %vm937_vm7, %v926_v21 }
 0x199   : > { %v915_v18 = vpop.f32.mrf.mxu3 }
 0x19a   : > { %v935_v22 = vadd.f32 %v915_v18, %v854_v50 }
 0x19c   : > { %952 = vst.msk [vmem:[#allocation2 + $0x70] sm:$0xff] %vm937_vm7, %v935_v22 }
 0x19d   : > { %v891_v55 = vpop.f32.mrf.mxu2 }
 0x19e   : > { %v927_v38 = vadd.f32 %v891_v55, %v846_v23 }
 0x1a0   : > { %944 = vst.msk [vmem:[#allocation2 + $0x30] sm:$0xff] %vm937_vm7, %v927_v38 }
 0x1a2   : > { %v918_v27 = vpop.f32.mrf.mxu3 }
 0x1a3   : > { %v936_v29 = vadd.f32 %v918_v27, %v855_v24 }
 0x1a5   : > { %v894_v28 = vpop.f32.mrf.mxu2  ;;  %953 = vst.msk [vmem:[#allocation2 + $0x78] sm:$0xff] %vm937_vm7, %v936_v29 }
 0x1a6   : > { %v928_v31 = vadd.f32 %v894_v28, %v847_v19 }
 0x1a8   : > { %945 = vst.msk [vmem:[#allocation2 + $0x38] sm:$0xff] %vm937_vm7, %v928_v31 }
 0x1ad   : > { %v897_v30 = vpop.f32.mrf.mxu2 }
 0x1ae   : > { %v929_v37 = vadd.f32 %v897_v30, %v848_v1 }
 0x1b0   : > { %946 = vst.msk [vmem:[#allocation2 + $0x40] sm:$0xff] %vm937_vm7, %v929_v37 }
 0x1b5   : > { %v900_v32 = vpop.f32.mrf.mxu2 }
 0x1b6   : > { %v930_v33 = vadd.f32 %v900_v32, %v849_v54 }
 0x1b8   : > { %947 = vst.msk [vmem:[#allocation2 + $0x48] sm:$0xff] %vm937_vm7, %v930_v33 }
 0x1bd   : > { %v903_v34 = vpop.f32.mrf.mxu2 }
 0x1be   : > { %v931_v39 = vadd.f32 %v903_v34, %v850_v61 }
 0x1c0   : > { %948 = vst.msk [vmem:[#allocation2 + $0x50] sm:$0xff] %vm937_vm7, %v931_v39 }
 0x1c5   : > { %v906_v41 = vpop.f32.mrf.mxu2 }
 0x1c6   : > { %v932_v42 = vadd.f32 %v906_v41, %v851_v40 }
 0x1c8   : > { %949 = vst.msk [vmem:[#allocation2 + $0x58] sm:$0xff] %vm937_vm7, %v932_v42 }
 0x1cc   : > { %957 = sbr.rel (%p3625_p4) target bundleno = 2535 (0x9e7), region = 56 }
 0x1cd   : > { %v909_v57 = vpop.f32.mrf.mxu2 }
 0x1ce   : > { %v933_v44 = vadd.f32 %v909_v57, %v852_v43 }
 0x1d0   : > { %950 = vst.msk [vmem:[#allocation2 + $0x60] sm:$0xff] %vm937_vm7, %v933_v44 }
 0x1d1   : > { %v4682_v62 = vld [vmem:[#allocation2 + $0x10] sm:$0xff]  ;;  %v4684_v46 = vld [vmem:[#allocation2] sm:$0xff]  ;;  %v4238_v48 = vmov 32   ;;  %v4691_v49 = vld [vmem:[#allocation2 + $0x18] sm:$0xff]  ;;  %vm1306_vm12 = vcmask 261120  }
 0x1d2   : > { %4086 = vset.pattern.permute.xlu1 %v4238_v48  ;;  %4085 = vset.pattern.permute.xlu0 %v4238_v48  ;;  %v4686_v25 = vld [vmem:[#allocation2 + $0x20] sm:$0xff]  ;;  %v4693_v36 = vld [vmem:[#allocation2 + $0x8] sm:$0xff]  ;;  %v4700_v53 = vld [vmem:[#allocation2 + $0x38] sm:$0xff] }
 0x1d3   : > { %990 = vperm.xlu1 %4086, %v4682_v62   ;;  %980 = vperm.xlu0 %4085, %v4684_v46   ;;  %v4695_v51 = vld [vmem:[#allocation2 + $0x28] sm:$0xff]  ;;  %v4702_v52 = vld [vmem:[#allocation2 + $0x30] sm:$0xff]  ;;  %v4704_v56 = vld [vmem:[#allocation2 + $0x40] sm:$0xff] }
 0x1d4   : > { %4087 = vset.pattern.permute.xlu2 %v4238_v48  ;;  %v4709_v47 = vld [vmem:[#allocation2 + $0x50] sm:$0xff]  ;;  %v4711_v58 = vld [vmem:[#allocation2 + $0x48] sm:$0xff]  ;;  %v4713_v59 = vld [vmem:[#allocation2 + $0x58] sm:$0xff] }
 0x1d5   : > { %1000 = vperm.xlu2 %4087, %v4686_v25   ;;  %v4718_v60 = vld [vmem:[#allocation2 + $0x68] sm:$0xff]  ;;  %v4722_v0 = vld [vmem:[#allocation2 + $0x70] sm:$0xff]  ;;  %v4727_v45 = vld [vmem:[#allocation2 + $0x78] sm:$0xff] }
 0x1d6   : > { %v1304_v35 = vld [vmem:[%s6124_s3 + $0x30] sm:$0xff]  ;;  %v1305_v26 = vld [vmem:[%s6124_s3 + $0x38] sm:$0xff]  ;;  %v1302_v20 = vld [vmem:[%s6124_s3 + $0x20] sm:$0xff] }
 0x1d7   : > { %v4720_v63 = vld [vmem:[#allocation2 + $0x60] sm:$0xff]  ;;  %1367 = vmatpush.msra.mxu0 %v1304_v35  ;;  %1432 = vmatpush.msra.mxu1 %v1305_v26  ;;  %v1303_v21 = vld [vmem:[%s6124_s3 + $0x28] sm:$0xff]  ;;  %v1300_v50 = vld [vmem:[%s6124_s3 + $0x10] sm:$0xff] }
 0x1d8   : > { %v1301_v18 = vld [vmem:[%s6124_s3 + $0x18] sm:$0xff]  ;;  %v1298_v22 = vld [vmem:[%s6124_s3] sm:$0xff]  ;;  %v1299_v23 = vld [vmem:[%s6124_s3 + $0x8] sm:$0xff] }
 0x1d9   : > { %1368 = vmatpush.msra.mxu0 %v1302_v20  ;;  %1433 = vmatpush.msra.mxu1 %v1303_v21 }
 0x1db   : > { %995 = vperm.xlu1 %4086, %v4691_v49   ;;  %985 = vperm.xlu0 %4085, %v4693_v36  }
 0x1dc   : > { %1369 = vmatpush.msra.mxu0 %v1300_v50  ;;  %1434 = vmatpush.msra.mxu1 %v1301_v18 }
 0x1dd   : > { %1005 = vperm.xlu2 %4087, %v4695_v51  }
 0x1de   : > { %1370 = vmatpush.msra.mxu0 %v1298_v22  ;;  %1435 = vmatpush.msra.mxu1 %v1299_v23 }
 0x1e3   : > { %1015 = vperm.xlu1 %4086, %v4700_v53   ;;  %1010 = vperm.xlu0 %4085, %v4702_v52  }
 0x1e5   : > { %1020 = vperm.xlu2 %4087, %v4704_v56  }
 0x1eb   : > { %1030 = vperm.xlu1 %4086, %v4709_v47   ;;  %1025 = vperm.xlu0 %4085, %v4711_v58  }
 0x1ed   : > { %1035 = vperm.xlu2 %4087, %v4713_v59  }
 0x1f3   : > { %1045 = vperm.xlu1 %4086, %v4718_v60   ;;  %1040 = vperm.xlu0 %4085, %v4720_v63  }
 0x1f5   : > { %1050 = vperm.xlu2 %4087, %v4722_v0  }
 0x1fb   : > { %1055 = vperm.xlu0 %4085, %v4727_v45  }
 0x22f   : > { %v4764_v40 = vpop.permute.xlu2 %1000 }
 0x245   : > { %v981_v55 = vpop.permute.xlu0 %980  ;;  %v4754_v38 = vpop.permute.xlu1 %990 }
 0x246   : > { %4091 = vrcp.f32 %v981_v55  ;;  %v1069_v37 = vand.u32 2147483648, %v981_v55  ;;  %v1067_v32 = vand.u32 2147483647, %v981_v55  ;;  %vm1063_vm9 = vweird.f32 %v981_v55 }
 0x247   : > { %4093 = vrcp.f32 %v4754_v38  ;;  %vm1093_vm14 = vweird.f32 %v4754_v38  ;;  %v1097_v22 = vand.u32 2147483647, %v4754_v38 }
 0x248   : > { %v1070_v39 = vor.u32 1.1754944e-38, %v1069_v37  ;;  %vm1068_vm11 = vcmp.eq.f32.partialorder %v1067_v32, 8.507059e+37 }
 0x249   : > { %vm1098_vm6 = vcmp.eq.f32.partialorder %v1097_v22, 8.507059e+37 }
 0x24c   : > { %v4092_v24 = vpop.eup %4091 }
 0x24d   : > { %v986_v19 = vpop.permute.xlu0 %985  ;;  %v1059_v27 = vmul.f32 %v4092_v24, %v981_v55  ;;  %v4757_v28 = vpop.eup %4093  ;;  %vm1064_vm8 = vweird.f32 %v4092_v24 }
 0x24e   : > { %4095 = vrcp.f32 %v986_v19  ;;  %v4759_v31 = vpop.permute.xlu1 %995  ;;  %v1089_v30 = vmul.f32 %v4757_v28, %v4754_v38  ;;  %vm1065_vm10 = vmor %vm1063_vm9, %vm1064_vm8  ;;  %v1084_v26 = vand.u32 2147483648, %v986_v19  ;;  %v1082_v50 = vand.u32 2147483647, %v986_v19 }
 0x24f   : > { %v1060_v29 = vsub.f32 1.0, %v1059_v27  ;;  %4097 = vrcp.f32 %v4759_v31  ;;  %vm1078_vm15 = vweird.f32 %v986_v19  ;;  %vm1094_vm0 = vweird.f32 %v4757_v28 }
 0x250   : > { %v1090_v34 = vsub.f32 1.0, %v1089_v30  ;;  %4099 = vrcp.f32 %v4764_v40  ;;  %v1085_v18 = vor.u32 1.1754944e-38, %v1084_v26  ;;  %vm1083_vm4 = vcmp.eq.f32.partialorder %v1082_v50, 8.507059e+37  ;;  %vm4782_vm5 = vmor %vm1093_vm14, %vm1094_vm0 }
 0x251   : > { %v1061_v1 = vmul.f32 %v4092_v24, %v1060_v29  ;;  %vm1108_vm7 = vweird.f32 %v4759_v31  ;;  %vm1123_vm9 = vweird.f32 %v4764_v40 }
 0x252   : > { %v1091_v35 = vmul.f32 %v4757_v28, %v1090_v34 }
 0x253   : > { %v1062_v54 = vadd.f32 %v4092_v24, %v1061_v1 }
 0x254   : > { %v4096_v33 = vpop.eup %4095 }
 0x255   : > { %v1074_v61 = vmul.f32 %v4096_v33, %v986_v19  ;;  %v1066_v42 = vsel %vm1065_vm10, %v4092_v24, %v1062_v54  ;;  %v4766_v43 = vpop.eup %4097  ;;  %vm1079_vm13 = vweird.f32 %v4096_v33  ;;  %v1092_v24 = vadd.f32 %v4757_v28, %v1091_v35  ;;  %v4786_v19 = vpop.permute.xlu2 %1005 }
 0x256   : > { %v1071_v57 = vsel %vm1068_vm11, %v1070_v39, %v1066_v42  ;;  %v1104_v20 = vmul.f32 %v4766_v43, %v4759_v31  ;;  %vm1080_vm3 = vmor %vm1078_vm15, %vm1079_vm13  ;;  %v4780_v27 = vpop.eup %4099  ;;  %4101 = vrcp.f32 %v4786_v19  ;;  %vm1109_vm8 = vweird.f32 %v4766_v43  ;;  %v4828_v26 = vpop.permute.xlu1 %1015 }
 0x257   : > { %v1075_v41 = vsub.f32 1.0, %v1074_v61  ;;  %v1072_v48 = vmul.f32 %v1071_v57, %v4684_v46  ;;  %v1099_v46 = vand.u32 2147483648, %v4754_v38  ;;  %v1119_v38 = vmul.f32 %v4780_v27, %v4764_v40 }
 0x258   : > { %v1105_v23 = vsub.f32 1.0, %v1104_v20  ;;  %v1096_v32 = vsel %vm4782_vm5, %v4757_v28, %v1092_v24  ;;  %v4808_v28 = vpop.permute.xlu0 %1010  ;;  %v1112_v42 = vand.u32 2147483647, %v4759_v31  ;;  %vm1124_vm11 = vweird.f32 %v4780_v27 }
 0x259   : > { %v1076_v44 = vmul.f32 %v4096_v33, %v1075_v41  ;;  %3626 = vmatmul.msk.f32.vlgmr.msra.gmra.mxu0 %vm1306_vm12, %v1072_v48  ;;  %3642 = vmatmul.msk.f32.vlgmr.msra.gmra.mxu1 %vm1306_vm12, %v1072_v48  ;;  %v1100_v37 = vor.u32 1.1754944e-38, %v1099_v46  ;;  %v1120_v61 = vsub.f32 1.0, %v1119_v38  ;;  %4103 = vrcp.f32 %v4808_v28  ;;  %vm1125_vm13 = vmor %vm1123_vm9, %vm1124_vm11 }
 0x25a   : > { %v1106_v54 = vmul.f32 %v4766_v43, %v1105_v23  ;;  %vm1113_vm10 = vcmp.eq.f32.partialorder %v1112_v42, 8.507059e+37  ;;  %4105 = vrcp.f32 %v4828_v26  ;;  %vm1138_vm15 = vweird.f32 %v4786_v19 }
 0x25b   : > { %v1077_v21 = vadd.f32 %v4096_v33, %v1076_v44  ;;  %v1121_v57 = vmul.f32 %v4780_v27, %v1120_v61  ;;  %v1174_v42 = vand.u32 2147483648, %v4828_v26  ;;  %vm1168_vm9 = vweird.f32 %v4828_v26 }
 0x25c   : > { %v1107_v34 = vadd.f32 %v4766_v43, %v1106_v54  ;;  %v4102_v39 = vpop.eup %4101 }
 0x25d   : > { %v1081_v55 = vsel %vm1080_vm3, %v4096_v33, %v1077_v21  ;;  %v1101_v33 = vsel %vm1098_vm6, %v1100_v37, %v1096_v32  ;;  %v1134_v44 = vmul.f32 %v4102_v39, %v4786_v19  ;;  %v1122_v20 = vadd.f32 %v4780_v27, %v1121_v57 }
 0x25e   : > { %v1086_v29 = vsel %vm1083_vm4, %v1085_v18, %v1081_v55  ;;  %v1102_v41 = vmul.f32 %v1101_v33, %v4682_v62  ;;  %v1129_v62 = vand.u32 2147483648, %v4764_v40  ;;  %v1127_v21 = vand.u32 2147483647, %v4764_v40 }
 0x25f   : > { %v1087_v30 = vmul.f32 %v1086_v29, %v4693_v36  ;;  %v961_v36 = vld [vmem:[%s6126_s5] sm:$0x1f]  ;;  %v1135_v35 = vsub.f32 1.0, %v1134_v44  ;;  %v1126_v22 = vsel %vm1125_vm13, %v4780_v27, %v1122_v20  ;;  %vm1139_vm0 = vweird.f32 %v4102_v39  ;;  %v4847_v27 = vpop.permute.xlu2 %1020 }
 0x260   : > { %3924 = vmatpush.msk.msra.mxu2 %vm483_vm1, %v961_v36  ;;  %3658 = vmatpush.msk.msrb.mxu0 %vm483_vm1, %v961_v36  ;;  %v1130_v46 = vor.u32 1.1754944e-38, %v1129_v62  ;;  %vm1128_vm14 = vcmp.eq.f32.partialorder %v1127_v21, 8.507059e+37  ;;  %v1142_v55 = vand.u32 2147483647, %v4786_v19  ;;  %vm1140_vm3 = vmor %vm1138_vm15, %vm1139_vm0  ;;  %4107 = vrcp.f32 %v4847_v27  ;;  %v4856_v38 = vpop.permute.xlu0 %1025 }
 0x261   : > { %3627 = vmatmul.msk.f32.gmra.mxu0 %vm1306_vm12, %v1087_v30  ;;  %3643 = vmatmul.msk.f32.gmra.mxu1 %vm1306_vm12, %v1087_v30  ;;  %v1159_v32 = vand.u32 2147483648, %v4808_v28  ;;  %vm1153_vm6 = vweird.f32 %v4808_v28  ;;  %v1157_v33 = vand.u32 2147483647, %v4808_v28  ;;  %4109 = vrcp.f32 %v4856_v38 }
 0x262   : > { %3665 = vmatmul.msk.f32.vlgmr.msra.gmra.mxu2 %vm434_vm2, %v4472_v14  ;;  %3923 = vmatpush.msk.msrb.mxu1 %vm483_vm1, %v961_v36  ;;  %v1114_v14 = vand.u32 2147483648, %v4759_v31  ;;  %vm1143_vm4 = vcmp.eq.f32.partialorder %v1142_v55, 8.507059e+37  ;;  %v1172_v44 = vand.u32 2147483647, %v4828_v26  ;;  %vm1183_vm11 = vweird.f32 %v4847_v27 }
 0x263   : > { %3925 = vmatpush.msk.msra.mxu3 %vm483_vm1, %v961_v36  ;;  %vm1110_vm1 = vmor %vm1108_vm7, %vm1109_vm8  ;;  %vm1158_vm8 = vcmp.eq.f32.partialorder %v1157_v33, 8.507059e+37 }
 0x264   : > { %3670 = vmatmul.msk.f32.vlgmr.msra.gmra.mxu3 %vm434_vm2, %v4425_v5  ;;  %v1111_v5 = vsel %vm1110_vm1, %v4766_v43, %v1107_v34  ;;  %v1115_v48 = vor.u32 1.1754944e-38, %v1114_v14  ;;  %v4104_v43 = vpop.eup %4103  ;;  %v1160_v34 = vor.u32 1.1754944e-38, %v1159_v32  ;;  %v4870_v14 = vpop.permute.xlu1 %1030  ;;  %vm1173_vm13 = vcmp.eq.f32.partialorder %v1172_v44, 8.507059e+37 }
 0x265   : > { %v1149_v18 = vmul.f32 %v4104_v43, %v4808_v28  ;;  %v4106_v24 = vpop.eup %4105  ;;  %vm1154_vm5 = vweird.f32 %v4104_v43  ;;  %4111 = vrcp.f32 %v4870_v14 }
 0x266   : > { %v1116_v31 = vsel %vm1113_vm10, %v1115_v48, %v1111_v5  ;;  %v4108_v54 = vpop.eup %4107  ;;  %vm1155_vm7 = vmor %vm1153_vm6, %vm1154_vm5  ;;  %vm1169_vm1 = vweird.f32 %v4106_v24  ;;  %v1175_v48 = vor.u32 1.1754944e-38, %v1174_v42 }
 0x267   : > { %v1117_v50 = vmul.f32 %v1116_v31, %v4691_v49  ;;  %v1131_v49 = vsel %vm1128_vm14, %v1130_v46, %v1126_v22  ;;  %v1150_v40 = vsub.f32 1.0, %v1149_v18  ;;  %vm1170_vm10 = vmor %vm1168_vm9, %vm1169_vm1  ;;  %vm1184_vm14 = vweird.f32 %v4108_v54  ;;  %v4885_v21 = vpop.permute.xlu2 %1035 }
 0x268   : > { %v1132_v29 = vmul.f32 %v1131_v49, %v4686_v25  ;;  %vm1185_vm15 = vmor %vm1183_vm11, %vm1184_vm14  ;;  %4113 = vrcp.f32 %v4885_v21  ;;  %v4892_v49 = vpop.permute.xlu0 %1040  ;;  %vm1228_vm9 = vweird.f32 %v4885_v21 }
 0x269   : > { %3628 = vmatmul.msk.f32.gmra.mxu0 %vm1306_vm12, %v1102_v41  ;;  %3644 = vmatmul.msk.f32.gmra.mxu1 %vm1306_vm12, %v1102_v41  ;;  %v1151_v30 = vmul.f32 %v4104_v43, %v1150_v40  ;;  %v4110_v41 = vpop.eup %4109  ;;  %4115 = vrcp.f32 %v4892_v49 }
 0x26a   : > { %3666 = vmatmul.msk.f32.gmra.mxu2 %vm434_vm2, %v4477_v15  ;;  %v1136_v15 = vmul.f32 %v4102_v39, %v1135_v35  ;;  %v1194_v5 = vmul.f32 %v4110_v41, %v4856_v38 }
 0x26b   : > { %v1152_v25 = vadd.f32 %v4104_v43, %v1151_v30  ;;  %v4112_v20 = vpop.eup %4111 }
 0x26c   : > { %3671 = vmatmul.msk.f32.gmra.mxu3 %vm434_vm2, %v4435_v7  ;;  %v1144_v7 = vand.u32 2147483648, %v4786_v19  ;;  %v1137_v23 = vadd.f32 %v4102_v39, %v1136_v15  ;;  %v1195_v31 = vsub.f32 1.0, %v1194_v5  ;;  %v1209_v46 = vmul.f32 %v4112_v20, %v4870_v14 }
 0x26e   : > { %v1145_v1 = vor.u32 1.1754944e-38, %v1144_v7  ;;  %v1141_v19 = vsel %vm1140_vm3, %v4102_v39, %v1137_v23  ;;  %v1196_v15 = vmul.f32 %v4110_v41, %v1195_v31  ;;  %v1210_v7 = vsub.f32 1.0, %v1209_v46  ;;  %v4114_v23 = vpop.eup %4113 }
 0x26f   : > { %vm1199_vm3 = vweird.f32 %v4110_v41  ;;  %vm1229_vm11 = vweird.f32 %v4114_v23  ;;  %v1247_v31 = vand.u32 2147483647, %v4892_v49 }
 0x270   : > { %v1197_v40 = vadd.f32 %v4110_v41, %v1196_v15 }
 0x271   : > { %3629 = vmatmul.msk.f32.gmra.mxu0 %vm1306_vm12, %v1117_v50  ;;  %3645 = vmatmul.msk.f32.gmra.mxu1 %vm1306_vm12, %v1117_v50 }
 0x272   : > { %3667 = vmatmul.msk.f32.gmra.mxu2 %vm434_vm2, %v4482_v16  ;;  %v1164_v16 = vmul.f32 %v4106_v24, %v4828_v26  ;;  %v1187_v26 = vand.u32 2147483647, %v4847_v27 }
 0x274   : > { %3672 = vmatmul.msk.f32.gmra.mxu3 %vm434_vm2, %v4445_v9  ;;  %v1146_v9 = vsel %vm1143_vm4, %v1145_v1, %v1141_v19  ;;  %v1165_v37 = vsub.f32 1.0, %v1164_v16  ;;  %vm1188_vm0 = vcmp.eq.f32.partialorder %v1187_v26, 8.507059e+37  ;;  %vm1198_vm4 = vweird.f32 %v4856_v38 }
 0x275   : > { %v1147_v36 = vmul.f32 %v1146_v9, %v4695_v51  ;;  %vm1200_vm5 = vmor %vm1198_vm4, %vm1199_vm3  ;;  %v4902_v9 = vpop.permute.xlu1 %1045  ;;  %vm1248_vm4 = vcmp.eq.f32.partialorder %v1247_v31, 8.507059e+37 }
 0x276   : > { %v1166_v61 = vmul.f32 %v4106_v24, %v1165_v37  ;;  %v1201_v1 = vsel %vm1200_vm5, %v4110_v41, %v1197_v40  ;;  %v4116_v37 = vpop.eup %4115  ;;  %4117 = vrcp.f32 %v4902_v9 }
 0x278   : > { %v1167_v28 = vadd.f32 %v4106_v24, %v1166_v61 }
 0x279   : > { %3630 = vmatmul.msk.f32.gmra.mxu0 %vm1306_vm12, %v1132_v29  ;;  %3646 = vmatmul.msk.f32.gmra.mxu1 %vm1306_vm12, %v1132_v29  ;;  %v1211_v29 = vmul.f32 %v4112_v20, %v1210_v7 }
 0x27a   : > { %3668 = vmatmul.msk.f32.gmra.mxu2 %vm434_vm2, %v4487_v17  ;;  %v1179_v17 = vmul.f32 %v4108_v54, %v4847_v27 }
 0x27c   : > { %3673 = vmatmul.msk.f32.gmra.mxu3 %vm434_vm2, %v4455_v11  ;;  %v1156_v11 = vsel %vm1155_vm7, %v4104_v43, %v1152_v25  ;;  %v1180_v51 = vsub.f32 1.0, %v1179_v17  ;;  %vm1214_vm7 = vweird.f32 %v4112_v20 }
 0x27d   : > { %v1161_v39 = vsel %vm1158_vm8, %v1160_v34, %v1156_v11  ;;  %vm1213_vm8 = vweird.f32 %v4870_v14  ;;  %v4914_v11 = vpop.permute.xlu2 %1050 }
 0x27e   : > { %v1162_v57 = vmul.f32 %v1161_v39, %v4702_v52  ;;  %v1189_v52 = vand.u32 2147483648, %v4847_v27  ;;  %v1224_v27 = vmul.f32 %v4114_v23, %v4885_v21  ;;  %vm1215_vm1 = vmor %vm1213_vm8, %vm1214_vm7  ;;  %4119 = vrcp.f32 %v4914_v11 }
 0x27f   : > { %vm1273_vm8 = vweird.f32 %v4914_v11 }
 0x280   : > { %v1190_v50 = vor.u32 1.1754944e-38, %v1189_v52  ;;  %v1225_v19 = vsub.f32 1.0, %v1224_v27  ;;  %v1277_v27 = vand.u32 2147483647, %v4914_v11 }
 0x281   : > { %3631 = vmatmul.msk.f32.gmra.mxu0 %vm1306_vm12, %v1147_v36  ;;  %3647 = vmatmul.msk.f32.gmra.mxu1 %vm1306_vm12, %v1147_v36  ;;  %v1239_v36 = vmul.f32 %v4116_v37, %v4892_v49 }
 0x282   : > { %3669 = vmatmul.msk.f32.gmra.mxu2 %vm434_vm2, %v4415_v3  ;;  %v1181_v3 = vmul.f32 %v4108_v54, %v1180_v51  ;;  %v1226_v32 = vmul.f32 %v4114_v23, %v1225_v19  ;;  %v1232_v51 = vand.u32 2147483647, %v4885_v21 }
 0x283   : > { %v1240_v34 = vsub.f32 1.0, %v1239_v36 }
 0x284   : > { %3674 = vmatmul.msk.f32.gmra.mxu3 %vm434_vm2, %v4465_v13  ;;  %v1171_v13 = vsel %vm1170_vm10, %v4106_v24, %v1167_v28  ;;  %v1182_v35 = vadd.f32 %v4108_v54, %v1181_v3  ;;  %v1202_v24 = vand.u32 2147483647, %v4856_v38  ;;  %v1227_v39 = vadd.f32 %v4114_v23, %v1226_v32 }
 0x285   : > { %v1176_v62 = vsel %vm1173_vm13, %v1175_v48, %v1171_v13  ;;  %vm1230_vm13 = vmor %vm1228_vm9, %vm1229_vm11  ;;  %vm1233_vm14 = vcmp.eq.f32.partialorder %v1232_v51, 8.507059e+37  ;;  %v1056_v13 = vpop.permute.xlu0 %1055  ;;  %vm1278_vm11 = vcmp.eq.f32.partialorder %v1277_v27, 8.507059e+37 }
 0x286   : > { %v1177_v43 = vmul.f32 %v1176_v62, %v4700_v53  ;;  %v1186_v18 = vsel %vm1185_vm15, %v4108_v54, %v1182_v35  ;;  %v1204_v53 = vand.u32 2147483648, %v4856_v38  ;;  %vm1203_vm6 = vcmp.eq.f32.partialorder %v1202_v24, 8.507059e+37 }
 0x287   : > { %v1191_v22 = vsel %vm1188_vm0, %v1190_v50, %v1186_v18  ;;  %v1219_v38 = vand.u32 2147483648, %v4870_v14  ;;  %v1217_v54 = vand.u32 2147483647, %v4870_v14  ;;  %v4118_v14 = vpop.eup %4117  ;;  %v1231_v44 = vsel %vm1230_vm13, %v4114_v23, %v1227_v39 }
 0x288   : > { %v1192_v55 = vmul.f32 %v1191_v22, %v4704_v56  ;;  %v1205_v16 = vor.u32 1.1754944e-38, %v1204_v53  ;;  %v1212_v56 = vadd.f32 %v4112_v20, %v1211_v29  ;;  %v1254_v42 = vmul.f32 %v4118_v14, %v4902_v9  ;;  %v4120_v52 = vpop.eup %4119 }
 0x289   : > { %3632 = vmatmul.msk.f32.gmra.mxu0 %vm1306_vm12, %v1162_v57  ;;  %3648 = vmatmul.msk.f32.gmra.mxu1 %vm1306_vm12, %v1162_v57  ;;  %v1220_v17 = vor.u32 1.1754944e-38, %v1219_v38  ;;  %vm1218_vm10 = vcmp.eq.f32.partialorder %v1217_v54, 8.507059e+37  ;;  %v1241_v57 = vmul.f32 %v4116_v37, %v1240_v34  ;;  %vm1244_vm15 = vweird.f32 %v4116_v37 }
 0x28a   : > { %v1206_v30 = vsel %vm1203_vm6, %v1205_v16, %v1201_v1  ;;  %v1216_v33 = vsel %vm1215_vm1, %v4112_v20, %v1212_v56  ;;  %v1255_v5 = vsub.f32 1.0, %v1254_v42  ;;  %vm1243_vm0 = vweird.f32 %v4892_v49 }
 0x28b   : > { %v1207_v25 = vmul.f32 %v1206_v30, %v4711_v58  ;;  %v1234_v58 = vand.u32 2147483648, %v4885_v21  ;;  %v1221_v61 = vsel %vm1218_vm10, %v1220_v17, %v1216_v33  ;;  %v1242_v48 = vadd.f32 %v4116_v37, %v1241_v57  ;;  %vm1245_vm3 = vmor %vm1243_vm0, %vm1244_vm15 }
 0x28c   : > { %v1222_v28 = vmul.f32 %v1221_v61, %v4709_v47  ;;  %v1249_v47 = vand.u32 2147483648, %v4892_v49  ;;  %4121 = vrcp.f32 %v1056_v13  ;;  %v1269_v35 = vmul.f32 %v4120_v52, %v4914_v11 }
 0x28d   : > { %v1235_v41 = vor.u32 1.1754944e-38, %v1234_v58  ;;  %v1256_v26 = vmul.f32 %v4118_v14, %v1255_v5  ;;  %v1246_v20 = vsel %vm1245_vm3, %v4116_v37, %v1242_v48  ;;  %vm1259_vm5 = vweird.f32 %v4118_v14  ;;  %v1589_v48 = vld [vmem:[%s6125_s4 + $0x18] sm:$0xff] }
 0x28e   : > { %v1250_v21 = vor.u32 1.1754944e-38, %v1249_v47  ;;  %v1270_v50 = vsub.f32 1.0, %v1269_v35  ;;  %vm1258_vm6 = vweird.f32 %v4902_v9  ;;  %v1262_v22 = vand.u32 2147483647, %v4902_v9  ;;  %1651 = vmatpush.msrb.mxu3 %v1589_v48  ;;  %v1587_v47 = vld [vmem:[%s6125_s4 + $0x8] sm:$0xff]  ;;  %v1586_v35 = vld [vmem:[%s6125_s4] sm:$0xff] }
 0x28f   : > { %v1236_v3 = vsel %vm1233_vm14, %v1235_v41, %v1231_v44  ;;  %v1257_v46 = vadd.f32 %v4118_v14, %v1256_v26  ;;  %vm1260_vm7 = vmor %vm1258_vm6, %vm1259_vm5  ;;  %vm1274_vm9 = vweird.f32 %v4120_v52  ;;  %v1279_v53 = vand.u32 2147483648, %v4914_v11 }
 0x290   : > { %v1237_v62 = vmul.f32 %v1236_v3, %v4713_v59  ;;  %v1264_v59 = vand.u32 2147483648, %v4902_v9  ;;  %v1271_v7 = vmul.f32 %v4120_v52, %v1270_v50  ;;  %vm1263_vm1 = vcmp.eq.f32.partialorder %v1262_v22, 8.507059e+37  ;;  %vm1275_vm10 = vmor %vm1273_vm8, %vm1274_vm9  ;;  %v5076_v50 = vld [vmem:[%s6127_s6] sm:$0xff] }
 0x291   : > { %3633 = vmatmul.msk.f32.gmra.mxu0 %vm1306_vm12, %v1177_v43  ;;  %3649 = vmatmul.msk.f32.gmra.mxu1 %vm1306_vm12, %v1177_v43  ;;  %v1251_v43 = vsel %vm1248_vm4, %v1250_v21, %v1246_v20  ;;  %v1261_v40 = vsel %vm1260_vm7, %v4118_v14, %v1257_v46  ;;  %v1280_v1 = vor.u32 1.1754944e-38, %v1279_v53  ;;  %v1294_v56 = vand.u32 2147483648, %v1056_v13 }
 0x292   : > { %v4122_v15 = vpop.eup %4121  ;;  %v1252_v18 = vmul.f32 %v1251_v43, %v4720_v63  ;;  %v1265_v23 = vor.u32 1.1754944e-38, %v1264_v59  ;;  %v1272_v63 = vadd.f32 %v4120_v52, %v1271_v7  ;;  %vm1288_vm14 = vweird.f32 %v1056_v13 }
 0x293   : > { %v1284_v49 = vmul.f32 %v4122_v15, %v1056_v13  ;;  %vm1289_vm13 = vweird.f32 %v4122_v15  ;;  %v1292_v38 = vand.u32 2147483647, %v1056_v13 }
 0x294   : > { %v1276_v30 = vsel %vm1275_vm10, %v4120_v52, %v1272_v63  ;;  %vm1290_vm15 = vmor %vm1288_vm14, %vm1289_vm13  ;;  %v1588_v52 = vld [vmem:[%s6125_s4 + $0x10] sm:$0xff] }
 0x295   : > { %v1285_v24 = vsub.f32 1.0, %v1284_v49  ;;  %v1281_v19 = vsel %vm1278_vm11, %v1280_v1, %v1276_v30  ;;  %vm1293_vm0 = vcmp.eq.f32.partialorder %v1292_v38, 8.507059e+37  ;;  %1652 = vmatpush.msrb.mxu3 %v1588_v52 }
 0x296   : > { %v1282_v37 = vmul.f32 %v1281_v19, %v4722_v0 }
 0x297   : > { %v1286_v16 = vmul.f32 %v4122_v15, %v1285_v24  ;;  %1653 = vmatpush.msrb.mxu3 %v1587_v47 }
 0x299   : > { %3634 = vmatmul.msk.f32.gmra.mxu0 %vm1306_vm12, %v1192_v55  ;;  %3650 = vmatmul.msk.f32.gmra.mxu1 %vm1306_vm12, %v1192_v55  ;;  %v1266_v55 = vsel %vm1263_vm1, %v1265_v23, %v1261_v40  ;;  %v1287_v9 = vadd.f32 %v4122_v15, %v1286_v16 }
 0x29a   : > { %v1267_v29 = vmul.f32 %v1266_v55, %v4718_v60  ;;  %1654 = vmatpush.msrb.mxu3 %v1586_v35 }
 0x29b   : > { %v1291_v60 = vsel %vm1290_vm15, %v4122_v15, %v1287_v9  ;;  %v5079_v15 = vperm.slane %v5076_v50, 2 }
 0x2a1   : > { %3635 = vmatmul.msk.f32.gmra.mxu0 %vm1306_vm12, %v1207_v25  ;;  %3651 = vmatmul.msk.f32.gmra.mxu1 %vm1306_vm12, %v1207_v25  ;;  %v1295_v25 = vor.u32 1.1754944e-38, %v1294_v56 }
 0x2a3   : > { %v1296_v54 = vsel %vm1293_vm0, %v1295_v25, %v1291_v60 }
 0x2a4   : > { %v1297_v32 = vmul.f32 %v1296_v54, %v4727_v45 }
 0x2a9   : > { %3636 = vmatmul.msk.f32.gmra.mxu0 %vm1306_vm12, %v1222_v28  ;;  %3652 = vmatmul.msk.f32.gmra.mxu1 %vm1306_vm12, %v1222_v28 }
 0x2b1   : > { %3637 = vmatmul.msk.f32.gmra.mxu0 %vm1306_vm12, %v1237_v62  ;;  %3653 = vmatmul.msk.f32.gmra.mxu1 %vm1306_vm12, %v1237_v62 }
 0x2b9   : > { %3638 = vmatmul.msk.f32.gmra.mxu0 %vm1306_vm12, %v1252_v18  ;;  %3654 = vmatmul.msk.f32.gmra.mxu1 %vm1306_vm12, %v1252_v18 }
 0x2c1   : > { %3639 = vmatmul.msk.f32.gmra.mxu0 %vm1306_vm12, %v1267_v29  ;;  %3655 = vmatmul.msk.f32.gmra.mxu1 %vm1306_vm12, %v1267_v29 }
 0x2c9   : > { %3640 = vmatmul.msk.f32.gmra.mxu0 %vm1306_vm12, %v1282_v37  ;;  %3656 = vmatmul.msk.f32.gmra.mxu1 %vm1306_vm12, %v1282_v37 }
 0x2d1   : > { %3641 = vmatmul.msk.f32.gmra.mxu0 %vm1306_vm12, %v1297_v32  ;;  %3657 = vmatmul.msk.f32.gmra.mxu1 %vm1306_vm12, %v1297_v32 }
 0x2d6   : > { %v4947_v36 = vpop.f32.mrf.mxu0  ;;  %v4949_v33 = vpop.f32.mrf.mxu1 }
 0x2d7   : > { %1887 = vrot.lane.b32.xlu1 %v4947_v36, %s4239_s18 }
 0x2d9   : > { %3659 = vmatmul.msk.f32.vlgmr.msrb.gmra.mxu0 %vm434_vm2, %v4410_v2  ;;  %3661 = vmatmul.msk.f32.vlgmr.msrb.gmra.mxu1 %vm434_vm2, %v4432_v6 }
 0x2de   : > { %v4957_v0 = vpop.f32.mrf.mxu0  ;;  %v4959_v45 = vpop.f32.mrf.mxu1 }
 0x2df   : > { %1889 = vrot.lane.b32.xlu2 %v4957_v0, %s4239_s18 }
 0x2e1   : > { %3660 = vmatmul.msk.f32.gmra.mxu0 %vm434_vm2, %v4422_v4  ;;  %3662 = vmatmul.msk.f32.gmra.mxu1 %vm434_vm2, %v4442_v8 }
 0x2e5   : > { %v1523_v56 = vpop.f32.mrf.mxu2 }
 0x2e6   : > { %v4967_v17 = vpop.f32.mrf.mxu0  ;;  %v4969_v58 = vpop.f32.mrf.mxu1 }
 0x2e7   : > { %1891 = vrot.lane.b32.xlu0 %v4967_v17, %s4239_s18 }
 0x2e9   : > { %3663 = vmatmul.msk.f32.gmra.mxu1 %vm434_vm2, %v4452_v10 }
 0x2ed   : > { %v1526_v54 = vpop.f32.mrf.mxu2 }
 0x2ee   : > { %v4975_v2 = vpop.f32.mrf.mxu0  ;;  %v4977_v6 = vpop.f32.mrf.mxu1 }
 0x2ef   : > { %1893 = vrot.lane.b32.xlu1 %v4975_v2, %s4239_s18 }
 0x2f1   : > { %3664 = vmatmul.msk.f32.gmra.mxu1 %vm434_vm2, %v4462_v12 }
 0x2f6   : > { %v4983_v4 = vpop.f32.mrf.mxu0  ;;  %v4985_v8 = vpop.f32.mrf.mxu1 }
 0x2f7   : > { %1895 = vrot.lane.b32.xlu2 %v4983_v4, %s4239_s18 }
 0x2fe   : > { %v4989_v61 = vpop.f32.mrf.mxu0  ;;  %v4991_v10 = vpop.f32.mrf.mxu1 }
 0x2ff   : > { %1897 = vrot.lane.b32.xlu0 %v4989_v61, %s4239_s18 }
 0x306   : > { %v4995_v11 = vpop.f32.mrf.mxu0  ;;  %v4997_v34 = vpop.f32.mrf.mxu1 }
 0x307   : > { %1899 = vrot.lane.b32.xlu1 %v4995_v11, %s4239_s18  ;;  %v1524_v32 = vadd.f32 %v1523_v56, %v4995_v11 }
 0x30e   : > { %v5001_v12 = vpop.f32.mrf.mxu0  ;;  %v5003_v39 = vpop.f32.mrf.mxu1 }
 0x30f   : > { %1901 = vrot.lane.b32.xlu2 %v5001_v12, %s4239_s18 }
 0x316   : > { %v5007_v51 = vpop.f32.mrf.mxu0  ;;  %v5009_v14 = vpop.f32.mrf.mxu1 }
 0x317   : > { %1903 = vrot.lane.b32.xlu0 %v5007_v51, %s4239_s18 }
 0x31e   : > { %v5013_v28 = vpop.f32.mrf.mxu0  ;;  %v5015_v41 = vpop.f32.mrf.mxu1 }
 0x31f   : > { %1905 = vrot.lane.b32.xlu1 %v5013_v28, %s4239_s18 }
 0x326   : > { %v5019_v42 = vpop.f32.mrf.mxu0  ;;  %v5021_v57 = vpop.f32.mrf.mxu1 }
 0x327   : > { %1907 = vrot.lane.b32.xlu2 %v5019_v42, %s4239_s18 }
 0x32e   : > { %v5025_v44 = vpop.f32.mrf.mxu0  ;;  %v5027_v3 = vpop.f32.mrf.mxu1 }
 0x32f   : > { %1909 = vrot.lane.b32.xlu0 %v5025_v44, %s4239_s18 }
 0x336   : > { %v5031_v5 = vpop.f32.mrf.mxu0  ;;  %v5033_v13 = vpop.f32.mrf.mxu1 }
 0x337   : > { %1911 = vrot.lane.b32.xlu1 %v5031_v5, %s4239_s18 }
 0x33e   : > { %v5046_v62 = vpop.f32.mrf.mxu0  ;;  %v5048_v31 = vpop.f32.mrf.mxu1 }
 0x33f   : > { %1913 = vrot.lane.b32.xlu2 %v5046_v62, %s4239_s18 }
 0x346   : > { %v5055_v26 = vpop.f32.mrf.mxu0  ;;  %v5057_v20 = vpop.f32.mrf.mxu1 }
 0x347   : > { %2270 = vrot.lane.b32.xlu2 %v4947_v36, %s4240_s10  ;;  %1915 = vrot.lane.b32.xlu0 %v5055_v26, %s4239_s18 }
 0x34e   : > { %v5063_v21 = vpop.f32.mrf.mxu0  ;;  %v5069_v43 = vpop.f32.mrf.mxu1 }
 0x34f   : > { %2276 = vrot.lane.b32.xlu2 %v4975_v2, %s4240_s10  ;;  %2272 = vrot.lane.b32.xlu0 %v4957_v0, %s4240_s10 }
 0x350   : > { %1917 = vrot.lane.b32.xlu1 %v5063_v21, %s4239_s18 }
 0x356   : > { %v1505_v46 = vpop.f32.mrf.mxu0  ;;  %v1511_v22 = vpop.f32.mrf.mxu1 }
 0x357   : > { %v1506_v59 = vadd.f32 %v1505_v46, %v4947_v36  ;;  %2282 = vrot.lane.b32.xlu2 %v4995_v11, %s4240_s10  ;;  %2278 = vrot.lane.b32.xlu0 %v4983_v4, %s4240_s10  ;;  %v1512_v53 = vadd.f32 %v1511_v22, %v4967_v17 }
 0x358   : > { %2274 = vrot.lane.b32.xlu1 %v4967_v17, %s4240_s10 }
 0x359   : > { %v5089_v18 = vadd.f32 %v5079_v15, %v1506_v59  ;;  %v5107_v63 = vadd.f32 %v5079_v15, %v1512_v53  ;;  %v1538_v59 = vpop.f32.mrf.mxu3 }
 0x35b   : > { %v1570_v7 = vmax.f32 %v5089_v18, 0.0  ;;  %v1572_v29 = vmax.f32 %v5107_v63, 0.0 }
 0x35d   : > { %3675 = vmatmul.msk.f32.vlgmr.msrb.gmra.mxu3 %vm1306_vm12, %v1570_v7 }
 0x35e   : > { %v1508_v49 = vpop.f32.mrf.mxu0  ;;  %v1514_v24 = vpop.f32.mrf.mxu1 }
 0x35f   : > { %v1509_v40 = vadd.f32 %v1508_v49, %v4957_v0  ;;  %2288 = vrot.lane.b32.xlu2 %v5013_v28, %s4240_s10  ;;  %2284 = vrot.lane.b32.xlu0 %v5001_v12, %s4240_s10  ;;  %v1515_v27 = vadd.f32 %v1514_v24, %v4975_v2 }
 0x360   : > { %2280 = vrot.lane.b32.xlu1 %v4989_v61, %s4240_s10 }
 0x361   : > { %v5101_v23 = vadd.f32 %v5079_v15, %v1509_v40  ;;  %v5119_v16 = vadd.f32 %v5079_v15, %v1515_v27  ;;  %v1541_v49 = vpop.f32.mrf.mxu3  ;;  %v1539_v40 = vadd.f32 %v1538_v59, %v5025_v44 }
 0x362   : > { %v1542_v24 = vadd.f32 %v1541_v49, %v5031_v5 }
 0x363   : > { %v1571_v55 = vmax.f32 %v5101_v23, 0.0  ;;  %v1573_v19 = vmax.f32 %v5119_v16, 0.0 }
 0x365   : > { %3676 = vmatmul.msk.f32.gmra.mxu3 %vm1306_vm12, %v1571_v55  ;;  %v5207_v55 = vadd.f32 %v5079_v15, %v1539_v40 }
 0x366   : > { %v1517_v1 = vpop.f32.mrf.mxu1 }
 0x367   : > { %2294 = vrot.lane.b32.xlu2 %v5031_v5, %s4240_s10  ;;  %2290 = vrot.lane.b32.xlu0 %v5019_v42, %s4240_s10  ;;  %v1518_v30 = vadd.f32 %v1517_v1, %v4983_v4 }
 0x368   : > { %2286 = vrot.lane.b32.xlu1 %v5007_v51, %s4240_s10 }
 0x369   : > { %v5131_v9 = vadd.f32 %v5079_v15, %v1518_v30  ;;  %v1544_v27 = vpop.f32.mrf.mxu3 }
 0x36a   : > { %v1545_v1 = vadd.f32 %v1544_v27, %v5046_v62 }
 0x36b   : > { %v1574_v60 = vmax.f32 %v5131_v9, 0.0 }
 0x36d   : > { %3677 = vmatmul.msk.f32.gmra.mxu3 %vm1306_vm12, %v1572_v29  ;;  %v5213_v29 = vadd.f32 %v5079_v15, %v1542_v24 }
 0x36e   : > { %v1520_v37 = vpop.f32.mrf.mxu1 }
 0x36f   : > { %2296 = vrot.lane.b32.xlu0 %v5046_v62, %s4240_s10  ;;  %2300 = vrot.lane.b32.xlu2 %v5063_v21, %s4240_s10  ;;  %v1521_v38 = vadd.f32 %v1520_v37, %v4989_v61  ;;  %v1582_v30 = vmax.f32 %v5213_v29, 0.0 }
 0x370   : > { %2292 = vrot.lane.b32.xlu1 %v5025_v44, %s4240_s10 }
 0x371   : > { %v5143_v25 = vadd.f32 %v5079_v15, %v1521_v38  ;;  %v3693_v38 = vld [vmem:[%s6125_s4 + $0x30] sm:$0xff] }
 0x375   : > { %3678 = vmatmul.msk.f32.gmra.mxu3 %vm1306_vm12, %v1573_v19  ;;  %v5222_v19 = vadd.f32 %v5079_v15, %v1545_v1 }
 0x377   : > { %2653 = vrot.lane.b32.xlu0 %v4947_v36, %s4241_s15  ;;  %2657 = vrot.lane.b32.xlu2 %v4967_v17, %s4241_s15  ;;  %v1575_v36 = vmax.f32 %v5143_v25, 0.0  ;;  %v5155_v17 = vadd.f32 %v5079_v15, %v1524_v32  ;;  %v1583_v37 = vmax.f32 %v5222_v19, 0.0 }
 0x378   : > { %2298 = vrot.lane.b32.xlu1 %v5055_v26, %s4240_s10 }
 0x37d   : > { %3679 = vmatmul.msk.f32.gmra.mxu3 %vm1306_vm12, %v1574_v60  ;;  %v3691_v60 = vld [vmem:[%s6125_s4 + $0x20] sm:$0xff] }
 0x37f   : > { %2659 = vrot.lane.b32.xlu0 %v4975_v2, %s4241_s15  ;;  %2663 = vrot.lane.b32.xlu2 %v4989_v61, %s4241_s15  ;;  %v1576_v2 = vmax.f32 %v5155_v17, 0.0  ;;  %v1529_v61 = vpop.f32.mrf.mxu2 }
 0x380   : > { %2655 = vrot.lane.b32.xlu1 %v4957_v0, %s4241_s15  ;;  %v1527_v0 = vadd.f32 %v1526_v54, %v5001_v12 }
 0x382   : > { %v5167_v48 = vadd.f32 %v5079_v15, %v1527_v0 }
 0x385   : > { %3680 = vmatmul.msk.f32.gmra.mxu3 %vm1306_vm12, %v1575_v36 }
 0x387   : > { %2665 = vrot.lane.b32.xlu0 %v4995_v11, %s4241_s15  ;;  %2669 = vrot.lane.b32.xlu2 %v5007_v51, %s4241_s15  ;;  %v1577_v11 = vmax.f32 %v5167_v48, 0.0  ;;  %v1532_v52 = vpop.f32.mrf.mxu2 }
 0x388   : > { %2661 = vrot.lane.b32.xlu1 %v4983_v4, %s4241_s15  ;;  %v1530_v4 = vadd.f32 %v1529_v61, %v5007_v51  ;;  %v5248_v61 = vperm.slane %v5076_v50, 7 }
 0x38a   : > { %v5179_v47 = vadd.f32 %v5079_v15, %v1530_v4 }
 0x38c   : > { %v1578_v51 = vmax.f32 %v5179_v47, 0.0 }
 0x38d   : > { %3681 = vmatmul.msk.f32.gmra.mxu3 %vm1306_vm12, %v1576_v2 }
 0x38f   : > { %2671 = vrot.lane.b32.xlu0 %v5013_v28, %s4241_s15  ;;  %2675 = vrot.lane.b32.xlu2 %v5025_v44, %s4241_s15  ;;  %v1535_v46 = vpop.f32.mrf.mxu2  ;;  %v3694_v44 = vld [vmem:[%s6125_s4 + $0x38] sm:$0xff] }
 0x390   : > { %2667 = vrot.lane.b32.xlu1 %v5001_v12, %s4241_s15  ;;  %v1533_v12 = vadd.f32 %v1532_v52, %v5013_v28  ;;  %v1536_v22 = vadd.f32 %v1535_v46, %v5019_v42  ;;  %1785 = vmatpush.msrb.mxu2 %v3694_v44 }
 0x392   : > { %v5191_v35 = vadd.f32 %v5079_v15, %v1533_v12  ;;  %v5201_v28 = vadd.f32 %v5079_v15, %v1536_v22  ;;  %1786 = vmatpush.msrb.mxu2 %v3693_v38 }
 0x394   : > { %v1579_v7 = vmax.f32 %v5191_v35, 0.0  ;;  %v1580_v53 = vmax.f32 %v5201_v28, 0.0 }
 0x395   : > { %3682 = vmatmul.msk.f32.gmra.mxu3 %vm1306_vm12, %v1577_v11 }
 0x397   : > { %2677 = vrot.lane.b32.xlu0 %v5031_v5, %s4241_s15  ;;  %2681 = vrot.lane.b32.xlu2 %v5055_v26, %s4241_s15  ;;  %v1547_v5 = vpop.f32.mrf.mxu3 }
 0x398   : > { %2673 = vrot.lane.b32.xlu1 %v5019_v42, %s4241_s15  ;;  %v1581_v42 = vmax.f32 %v5207_v55, 0.0  ;;  %v1548_v56 = vadd.f32 %v1547_v5, %v5055_v26 }
 0x39a   : > { %v5237_v26 = vadd.f32 %v5079_v15, %v1548_v56 }
 0x39c   : > { %v1584_v36 = vmax.f32 %v5237_v26, 0.0 }
 0x39d   : > { %3683 = vmatmul.msk.f32.gmra.mxu3 %vm1306_vm12, %v1578_v51 }
 0x39f   : > { %2683 = vrot.lane.b32.xlu0 %v5063_v21, %s4241_s15  ;;  %v1550_v54 = vpop.f32.mrf.mxu3 }
 0x3a0   : > { %2679 = vrot.lane.b32.xlu1 %v5046_v62, %s4241_s15  ;;  %v3692_v62 = vld [vmem:[%s6125_s4 + $0x28] sm:$0xff]  ;;  %v1551_v32 = vadd.f32 %v1550_v54, %v5063_v21 }
 0x3a1   : > { %1787 = vmatpush.msrb.mxu2 %v3692_v62 }
 0x3a2   : > { %v5243_v0 = vadd.f32 %v5079_v15, %v1551_v32 }
 0x3a3   : > { %1788 = vmatpush.msrb.mxu2 %v3691_v60 }
 0x3a4   : > { %v1585_v2 = vmax.f32 %v5243_v0, 0.0 }
 0x3a5   : > { %3684 = vmatmul.msk.f32.gmra.mxu3 %vm1306_vm12, %v1579_v7 }
 0x3ad   : > { %3685 = vmatmul.msk.f32.gmra.mxu3 %vm1306_vm12, %v1580_v53 }
 0x3b5   : > { %3686 = vmatmul.msk.f32.gmra.mxu3 %vm1306_vm12, %v1581_v42 }
 0x3bd   : > { %3687 = vmatmul.msk.f32.gmra.mxu3 %vm1306_vm12, %v1582_v30 }
 0x3c5   : > { %3688 = vmatmul.msk.f32.gmra.mxu3 %vm1306_vm12, %v1583_v37 }
 0x3cd   : > { %3689 = vmatmul.msk.f32.gmra.mxu3 %vm1306_vm12, %v1584_v36 }
 0x3d5   : > { %3690 = vmatmul.msk.f32.gmra.mxu3 %vm1306_vm12, %v1585_v2 }
 0x3e0   : > { %v1656_v4 = vpop.f32.mrf.mxu3 }
 0x3e1   : > { %v1657_v11 = vadd.f32 %v1656_v4, %v5248_v61 }
 0x3e3   : > { %v1704_v52 = vmax.f32 %v1657_v11, 0.0 }
 0x3e5   : > { %3695 = vmatmul.msk.f32.vlgmr.msrb.gmra.mxu2 %vm1306_vm12, %v1704_v52 }
 0x3e8   : > { %v1659_v21 = vpop.f32.mrf.mxu3 }
 0x3e9   : > { %v1660_v12 = vadd.f32 %v1659_v21, %v5248_v61 }
 0x3eb   : > { %v1705_v51 = vmax.f32 %v1660_v12, 0.0 }
 0x3ed   : > { %3696 = vmatmul.msk.f32.gmra.mxu2 %vm1306_vm12, %v1705_v51 }
 0x3f0   : > { %v1662_v15 = vpop.f32.mrf.mxu3 }
 0x3f1   : > { %v1663_v46 = vadd.f32 %v1662_v15, %v5248_v61 }
 0x3f3   : > { %v1706_v59 = vmax.f32 %v1663_v46, 0.0 }
 0x3f5   : > { %3697 = vmatmul.msk.f32.gmra.mxu2 %vm1306_vm12, %v1706_v59 }
 0x3f8   : > { %v1665_v22 = vpop.f32.mrf.mxu3 }
 0x3f9   : > { %v1666_v7 = vadd.f32 %v1665_v22, %v5248_v61 }
 0x3fb   : > { %v1707_v49 = vmax.f32 %v1666_v7, 0.0 }
 0x3fd   : > { %3698 = vmatmul.msk.f32.gmra.mxu2 %vm1306_vm12, %v1707_v49 }
 0x400   : > { %v1668_v40 = vpop.f32.mrf.mxu3 }
 0x401   : > { %v1669_v53 = vadd.f32 %v1668_v40, %v5248_v61 }
 0x403   : > { %v1708_v24 = vmax.f32 %v1669_v53, 0.0 }
 0x405   : > { %3699 = vmatmul.msk.f32.gmra.mxu2 %vm1306_vm12, %v1708_v24  ;;  %v3714_v24 = vld [vmem:[%s6125_s4 + $0x58] sm:$0xff] }
 0x406   : > { %2050 = vmatpush.msra.mxu0 %v3714_v24 }
 0x408   : > { %v1671_v42 = vpop.f32.mrf.mxu3 }
 0x409   : > { %v1672_v27 = vadd.f32 %v1671_v42, %v5248_v61  ;;  %v3713_v42 = vld [vmem:[%s6125_s4 + $0x50] sm:$0xff] }
 0x40a   : > { %2051 = vmatpush.msra.mxu0 %v3713_v42 }
 0x40b   : > { %v1709_v44 = vmax.f32 %v1672_v27, 0.0 }
 0x40d   : > { %3700 = vmatmul.msk.f32.gmra.mxu2 %vm1306_vm12, %v1709_v44  ;;  %v3712_v44 = vld [vmem:[%s6125_s4 + $0x48] sm:$0xff] }
 0x40e   : > { %2052 = vmatpush.msra.mxu0 %v3712_v44 }
 0x410   : > { %v1674_v1 = vpop.f32.mrf.mxu3 }
 0x411   : > { %v1675_v30 = vadd.f32 %v1674_v1, %v5248_v61  ;;  %v3711_v1 = vld [vmem:[%s6125_s4 + $0x40] sm:$0xff] }
 0x412   : > { %2053 = vmatpush.msra.mxu0 %v3711_v1 }
 0x413   : > { %v1710_v5 = vmax.f32 %v1675_v30, 0.0 }
 0x415   : > { %3701 = vmatmul.msk.f32.gmra.mxu2 %vm1306_vm12, %v1710_v5 }
 0x418   : > { %v1677_v56 = vpop.f32.mrf.mxu3 }
 0x419   : > { %v1678_v37 = vadd.f32 %v1677_v56, %v5248_v61 }
 0x41b   : > { %v1711_v38 = vmax.f32 %v1678_v37, 0.0  ;;  %v5297_v37 = vld [vmem:[%s6127_s6 + $0x8] sm:$0xff] }
 0x41d   : > { %3702 = vmatmul.msk.f32.gmra.mxu2 %vm1306_vm12, %v1711_v38  ;;  %v5300_v38 = vperm.slane %v5297_v37, 4 }
 0x420   : > { %v1680_v62 = vpop.f32.mrf.mxu3 }
 0x421   : > { %v1681_v60 = vadd.f32 %v1680_v62, %v5248_v61 }
 0x423   : > { %v1712_v54 = vmax.f32 %v1681_v60, 0.0 }
 0x425   : > { %3703 = vmatmul.msk.f32.gmra.mxu2 %vm1306_vm12, %v1712_v54 }
 0x428   : > { %v1683_v32 = vpop.f32.mrf.mxu3 }
 0x429   : > { %v1684_v36 = vadd.f32 %v1683_v32, %v5248_v61  ;;  %v5305_v32 = vperm.slane %v5076_v50, 3 }
 0x42b   : > { %v1713_v2 = vmax.f32 %v1684_v36, 0.0 }
 0x42d   : > { %3704 = vmatmul.msk.f32.gmra.mxu2 %vm1306_vm12, %v1713_v2 }
 0x430   : > { %v1686_v4 = vpop.f32.mrf.mxu3 }
 0x431   : > { %v1687_v11 = vadd.f32 %v1686_v4, %v5248_v61 }
 0x433   : > { %v1714_v52 = vmax.f32 %v1687_v11, 0.0 }
 0x435   : > { %3705 = vmatmul.msk.f32.gmra.mxu2 %vm1306_vm12, %v1714_v52 }
 0x438   : > { %v1689_v21 = vpop.f32.mrf.mxu3 }
 0x439   : > { %v1690_v12 = vadd.f32 %v1689_v21, %v5248_v61 }
 0x43b   : > { %v1715_v51 = vmax.f32 %v1690_v12, 0.0 }
 0x43d   : > { %3706 = vmatmul.msk.f32.gmra.mxu2 %vm1306_vm12, %v1715_v51 }
 0x440   : > { %v1692_v15 = vpop.f32.mrf.mxu3 }
 0x441   : > { %v1693_v46 = vadd.f32 %v1692_v15, %v5248_v61 }
 0x443   : > { %v1716_v59 = vmax.f32 %v1693_v46, 0.0 }
 0x445   : > { %3707 = vmatmul.msk.f32.gmra.mxu2 %vm1306_vm12, %v1716_v59 }
 0x448   : > { %v1695_v22 = vpop.f32.mrf.mxu3 }
 0x449   : > { %v1696_v7 = vadd.f32 %v1695_v22, %v5248_v61 }
 0x44b   : > { %v1717_v49 = vmax.f32 %v1696_v7, 0.0  ;;  %v1892_v7 = vpop.permute.xlu0 %1891 }
 0x44d   : > { %3708 = vmatmul.msk.f32.gmra.mxu2 %vm1306_vm12, %v1717_v49 }
 0x450   : > { %v1698_v40 = vpop.f32.mrf.mxu3 }
 0x451   : > { %v1699_v53 = vadd.f32 %v1698_v40, %v5248_v61 }
 0x453   : > { %v1718_v27 = vmax.f32 %v1699_v53, 0.0 }
 0x455   : > { %3709 = vmatmul.msk.f32.gmra.mxu2 %vm1306_vm12, %v1718_v27 }
 0x458   : > { %v1701_v30 = vpop.f32.mrf.mxu3 }
 0x459   : > { %v1702_v5 = vadd.f32 %v1701_v30, %v5248_v61  ;;  %v1888_v61 = vpop.permute.xlu1 %1887 }
 0x45b   : > { %v1719_v56 = vmax.f32 %v1702_v5, 0.0 }
 0x45d   : > { %3710 = vmatmul.msk.f32.gmra.mxu2 %vm1306_vm12, %v1719_v56 }
 0x468   : > { %v1790_v62 = vpop.f32.mrf.mxu2 }
 0x469   : > { %v1838_v60 = vadd.f32 %v1790_v62, %v5089_v18  ;;  %v1890_v18 = vpop.permute.xlu2 %1889 }
 0x46b   : > { %v1855_v54 = vadd.f32 %v5300_v38, %v1838_v60 }
 0x46d   : > { %v1935_v36 = vadd.f32 %v1888_v61, %v1855_v54 }
 0x46f   : > { %v5308_v2 = vadd.f32 %v5305_v32, %v1935_v36 }
 0x470   : > { %v1793_v4 = vpop.f32.mrf.mxu2 }
 0x471   : > { %v1968_v11 = vmax.f32 %v5308_v2, 0.0  ;;  %v1839_v52 = vadd.f32 %v1793_v4, %v5101_v23 }
 0x473   : > { %v1856_v21 = vadd.f32 %v5300_v38, %v1839_v52  ;;  %3715 = vmatmul.msk.f32.vlgmr.msra.gmra.mxu0 %vm1306_vm12, %v1968_v11 }
 0x475   : > { %v1936_v12 = vadd.f32 %v1890_v18, %v1856_v21 }
 0x477   : > { %v5315_v51 = vadd.f32 %v5305_v32, %v1936_v12 }
 0x478   : > { %v1796_v15 = vpop.f32.mrf.mxu2 }
 0x479   : > { %v1840_v46 = vadd.f32 %v1796_v15, %v5107_v63  ;;  %v1969_v59 = vmax.f32 %v5315_v51, 0.0  ;;  %v1894_v63 = vpop.permute.xlu1 %1893 }
 0x47b   : > { %v1857_v22 = vadd.f32 %v5300_v38, %v1840_v46  ;;  %3716 = vmatmul.msk.f32.gmra.mxu0 %vm1306_vm12, %v1969_v59 }
 0x47d   : > { %v1937_v23 = vadd.f32 %v1892_v7, %v1857_v22 }
 0x47f   : > { %v5322_v49 = vadd.f32 %v5305_v32, %v1937_v23 }
 0x480   : > { %v1799_v40 = vpop.f32.mrf.mxu2 }
 0x481   : > { %v1841_v53 = vadd.f32 %v1799_v40, %v5119_v16  ;;  %v1970_v24 = vmax.f32 %v5322_v49, 0.0  ;;  %v1896_v16 = vpop.permute.xlu2 %1895 }
 0x483   : > { %v1858_v42 = vadd.f32 %v5300_v38, %v1841_v53  ;;  %3717 = vmatmul.msk.f32.gmra.mxu0 %vm1306_vm12, %v1970_v24 }
 0x485   : > { %v1938_v27 = vadd.f32 %v1894_v63, %v1858_v42 }
 0x487   : > { %v5329_v44 = vadd.f32 %v5305_v32, %v1938_v27 }
 0x488   : > { %v1802_v1 = vpop.f32.mrf.mxu2 }
 0x489   : > { %v1842_v30 = vadd.f32 %v1802_v1, %v5131_v9  ;;  %v1971_v5 = vmax.f32 %v5329_v44, 0.0  ;;  %v1898_v9 = vpop.permute.xlu0 %1897 }
 0x48b   : > { %v1859_v56 = vadd.f32 %v5300_v38, %v1842_v30  ;;  %3718 = vmatmul.msk.f32.gmra.mxu0 %vm1306_vm12, %v1971_v5 }
 0x48d   : > { %v1939_v62 = vadd.f32 %v1896_v16, %v1859_v56 }
 0x48f   : > { %v5336_v60 = vadd.f32 %v5305_v32, %v1939_v62 }
 0x490   : > { %v1805_v54 = vpop.f32.mrf.mxu2 }
 0x491   : > { %v1843_v61 = vadd.f32 %v1805_v54, %v5143_v25  ;;  %v1972_v36 = vmax.f32 %v5336_v60, 0.0  ;;  %v1900_v25 = vpop.permute.xlu1 %1899 }
 0x493   : > { %v1860_v4 = vadd.f32 %v5300_v38, %v1843_v61  ;;  %3719 = vmatmul.msk.f32.gmra.mxu0 %vm1306_vm12, %v1972_v36 }
 0x495   : > { %v1940_v11 = vadd.f32 %v1898_v9, %v1860_v4 }
 0x497   : > { %v5343_v52 = vadd.f32 %v5305_v32, %v1940_v11 }
 0x498   : > { %v1808_v21 = vpop.f32.mrf.mxu2 }
 0x499   : > { %v1844_v18 = vadd.f32 %v1808_v21, %v5155_v17  ;;  %v1973_v12 = vmax.f32 %v5343_v52, 0.0  ;;  %v1902_v17 = vpop.permute.xlu2 %1901 }
 0x49b   : > { %v1861_v15 = vadd.f32 %v5300_v38, %v1844_v18  ;;  %3720 = vmatmul.msk.f32.gmra.mxu0 %vm1306_vm12, %v1973_v12 }
 0x49d   : > { %v1941_v46 = vadd.f32 %v1900_v25, %v1861_v15 }
 0x49f   : > { %v5350_v59 = vadd.f32 %v5305_v32, %v1941_v46 }
 0x4a0   : > { %v1811_v22 = vpop.f32.mrf.mxu2 }
 0x4a1   : > { %v1845_v7 = vadd.f32 %v1811_v22, %v5167_v48  ;;  %v1974_v23 = vmax.f32 %v5350_v59, 0.0  ;;  %v1904_v48 = vpop.permute.xlu0 %1903 }
 0x4a3   : > { %v1862_v40 = vadd.f32 %v5300_v38, %v1845_v7  ;;  %3721 = vmatmul.msk.f32.gmra.mxu0 %vm1306_vm12, %v1974_v23 }
 0x4a5   : > { %v1942_v53 = vadd.f32 %v1902_v17, %v1862_v40 }
 0x4a7   : > { %v5357_v24 = vadd.f32 %v5305_v32, %v1942_v53 }
 0x4a8   : > { %v1814_v42 = vpop.f32.mrf.mxu2 }
 0x4a9   : > { %v1846_v63 = vadd.f32 %v1814_v42, %v5179_v47  ;;  %v1975_v27 = vmax.f32 %v5357_v24, 0.0  ;;  %v1906_v47 = vpop.permute.xlu1 %1905 }
 0x4ab   : > { %v1863_v1 = vadd.f32 %v5300_v38, %v1846_v63  ;;  %3722 = vmatmul.msk.f32.gmra.mxu0 %vm1306_vm12, %v1975_v27 }
 0x4ad   : > { %v1943_v30 = vadd.f32 %v1904_v48, %v1863_v1 }
 0x4af   : > { %v5364_v5 = vadd.f32 %v5305_v32, %v1943_v30 }
 0x4b0   : > { %v1817_v56 = vpop.f32.mrf.mxu2 }
 0x4b1   : > { %v1847_v16 = vadd.f32 %v1817_v56, %v5191_v35  ;;  %v1976_v62 = vmax.f32 %v5364_v5, 0.0  ;;  %v1908_v35 = vpop.permute.xlu2 %1907  ;;  %v1912_v63 = vpop.permute.xlu1 %1911 }
 0x4b3   : > { %v1864_v54 = vadd.f32 %v5300_v38, %v1847_v16  ;;  %3723 = vmatmul.msk.f32.gmra.mxu0 %vm1306_vm12, %v1976_v62  ;;  %v3733_v16 = vld [vmem:[%s6125_s4 + $0x70] sm:$0xff]  ;;  %v3732_v62 = vld [vmem:[%s6125_s4 + $0x68] sm:$0xff] }
 0x4b5   : > { %v1944_v61 = vadd.f32 %v1906_v47, %v1864_v54 }
 0x4b7   : > { %v5371_v36 = vadd.f32 %v5305_v32, %v1944_v61 }
 0x4b8   : > { %v1820_v4 = vpop.f32.mrf.mxu2 }
 0x4b9   : > { %v1848_v9 = vadd.f32 %v1820_v4, %v5201_v28  ;;  %v1977_v11 = vmax.f32 %v5371_v36, 0.0  ;;  %v1910_v28 = vpop.permute.xlu0 %1909  ;;  %v1914_v54 = vpop.permute.xlu2 %1913 }
 0x4bb   : > { %v1865_v21 = vadd.f32 %v5300_v38, %v1848_v9  ;;  %3724 = vmatmul.msk.f32.gmra.mxu0 %vm1306_vm12, %v1977_v11 }
 0x4bd   : > { %v1945_v18 = vadd.f32 %v1908_v35, %v1865_v21 }
 0x4bf   : > { %v5378_v12 = vadd.f32 %v5305_v32, %v1945_v18 }
 0x4c0   : > { %v1823_v15 = vpop.f32.mrf.mxu2 }
 0x4c1   : > { %v1849_v25 = vadd.f32 %v1823_v15, %v5207_v55  ;;  %v1978_v46 = vmax.f32 %v5378_v12, 0.0  ;;  %v3734_v55 = vld [vmem:[%s6125_s4 + $0x78] sm:$0xff]  ;;  %v1916_v35 = vpop.permute.xlu0 %1915 }
 0x4c2   : > { %2184 = vmatpush.msra.mxu1 %v3734_v55 }
 0x4c3   : > { %v1866_v22 = vadd.f32 %v5300_v38, %v1849_v25  ;;  %3725 = vmatmul.msk.f32.gmra.mxu0 %vm1306_vm12, %v1978_v46 }
 0x4c4   : > { %2185 = vmatpush.msra.mxu1 %v3733_v16 }
 0x4c5   : > { %v1946_v7 = vadd.f32 %v1910_v28, %v1866_v22 }
 0x4c6   : > { %2186 = vmatpush.msra.mxu1 %v3732_v62 }
 0x4c7   : > { %v5385_v23 = vadd.f32 %v5305_v32, %v1946_v7 }
 0x4c8   : > { %v1826_v40 = vpop.f32.mrf.mxu2 }
 0x4c9   : > { %v1850_v17 = vadd.f32 %v1826_v40, %v5213_v29  ;;  %v1979_v53 = vmax.f32 %v5385_v23, 0.0 }
 0x4cb   : > { %v1867_v42 = vadd.f32 %v5300_v38, %v1850_v17  ;;  %3726 = vmatmul.msk.f32.gmra.mxu0 %vm1306_vm12, %v1979_v53  ;;  %v5430_v53 = vperm.slane %v5297_v37, 0 }
 0x4cd   : > { %v1947_v27 = vadd.f32 %v1912_v63, %v1867_v42 }
 0x4cf   : > { %v5395_v1 = vadd.f32 %v5305_v32, %v1947_v27 }
 0x4d0   : > { %v1829_v48 = vpop.f32.mrf.mxu2 }
 0x4d1   : > { %v1851_v30 = vadd.f32 %v1829_v48, %v5222_v19  ;;  %v1980_v29 = vmax.f32 %v5395_v1, 0.0  ;;  %v3731_v19 = vld [vmem:[%s6125_s4 + $0x60] sm:$0xff] }
 0x4d2   : > { %2187 = vmatpush.msra.mxu1 %v3731_v19 }
 0x4d3   : > { %v1868_v56 = vadd.f32 %v5300_v38, %v1851_v30  ;;  %3727 = vmatmul.msk.f32.gmra.mxu0 %vm1306_vm12, %v1980_v29 }
 0x4d5   : > { %v1948_v47 = vadd.f32 %v1914_v54, %v1868_v56 }
 0x4d7   : > { %v5411_v61 = vadd.f32 %v5305_v32, %v1948_v47 }
 0x4d8   : > { %v1832_v4 = vpop.f32.mrf.mxu2 }
 0x4d9   : > { %v1852_v9 = vadd.f32 %v1832_v4, %v5237_v26  ;;  %v1981_v11 = vmax.f32 %v5411_v61, 0.0  ;;  %v1918_v26 = vpop.permute.xlu1 %1917 }
 0x4db   : > { %v1869_v21 = vadd.f32 %v5300_v38, %v1852_v9  ;;  %3728 = vmatmul.msk.f32.gmra.mxu0 %vm1306_vm12, %v1981_v11  ;;  %v3754_v11 = vld [vmem:[%s6125_s4 + $0x98] sm:$0xff] }
 0x4dc   : > { %2433 = vmatpush.msra.mxu3 %v3754_v11 }
 0x4dd   : > { %v1949_v18 = vadd.f32 %v1916_v35, %v1869_v21 }
 0x4df   : > { %v5418_v15 = vadd.f32 %v5305_v32, %v1949_v18 }
 0x4e0   : > { %v1835_v25 = vpop.f32.mrf.mxu2 }
 0x4e1   : > { %v1853_v46 = vadd.f32 %v1835_v25, %v5243_v0  ;;  %v1982_v22 = vmax.f32 %v5418_v15, 0.0 }
 0x4e3   : > { %v1870_v28 = vadd.f32 %v5300_v38, %v1853_v46  ;;  %3729 = vmatmul.msk.f32.gmra.mxu0 %vm1306_vm12, %v1982_v22 }
 0x4e5   : > { %v1950_v7 = vadd.f32 %v1918_v26, %v1870_v28 }
 0x4e7   : > { %v5425_v40 = vadd.f32 %v5305_v32, %v1950_v7 }
 0x4e9   : > { %v1983_v17 = vmax.f32 %v5425_v40, 0.0 }
 0x4eb   : > { %3730 = vmatmul.msk.f32.gmra.mxu0 %vm1306_vm12, %v1983_v17 }
 0x4f0   : > { %v2055_v42 = vpop.f32.mrf.mxu0 }
 0x4f1   : > { %v2056_v0 = vadd.f32 %v2055_v42, %v5430_v53 }
 0x4f3   : > { %v2103_v55 = vmax.f32 %v2056_v0, 0.0 }
 0x4f5   : > { %3735 = vmatmul.msk.f32.vlgmr.msra.gmra.mxu1 %vm1306_vm12, %v2103_v55  ;;  %v3753_v55 = vld [vmem:[%s6125_s4 + $0x90] sm:$0xff] }
 0x4f6   : > { %2434 = vmatpush.msra.mxu3 %v3753_v55 }
 0x4f8   : > { %v2058_v38 = vpop.f32.mrf.mxu0 }
 0x4f9   : > { %v2059_v63 = vadd.f32 %v2058_v38, %v5430_v53 }
 0x4fb   : > { %v2104_v27 = vmax.f32 %v2059_v63, 0.0 }
 0x4fd   : > { %3736 = vmatmul.msk.f32.gmra.mxu1 %vm1306_vm12, %v2104_v27 }
 0x500   : > { %v2061_v32 = vpop.f32.mrf.mxu0 }
 0x501   : > { %v2062_v48 = vadd.f32 %v2061_v32, %v5430_v53 }
 0x503   : > { %v2105_v30 = vmax.f32 %v2062_v48, 0.0 }
 0x505   : > { %3737 = vmatmul.msk.f32.gmra.mxu1 %vm1306_vm12, %v2105_v30 }
 0x508   : > { %v2064_v29 = vpop.f32.mrf.mxu0 }
 0x509   : > { %v2065_v56 = vadd.f32 %v2064_v29, %v5430_v53 }
 0x50b   : > { %v2106_v16 = vmax.f32 %v2065_v56, 0.0 }
 0x50d   : > { %3738 = vmatmul.msk.f32.gmra.mxu1 %vm1306_vm12, %v2106_v16 }
 0x510   : > { %v2067_v62 = vpop.f32.mrf.mxu0 }
 0x511   : > { %v2068_v54 = vadd.f32 %v2067_v62, %v5430_v53 }
 0x513   : > { %v2107_v47 = vmax.f32 %v2068_v54, 0.0 }
 0x515   : > { %3739 = vmatmul.msk.f32.gmra.mxu1 %vm1306_vm12, %v2107_v47 }
 0x518   : > { %v2070_v19 = vpop.f32.mrf.mxu0 }
 0x519   : > { %v2071_v4 = vadd.f32 %v2070_v19, %v5430_v53  ;;  %v3752_v19 = vld [vmem:[%s6125_s4 + $0x88] sm:$0xff] }
 0x51a   : > { %2435 = vmatpush.msra.mxu3 %v3752_v19 }
 0x51b   : > { %v2108_v9 = vmax.f32 %v2071_v4, 0.0  ;;  %v3751_v4 = vld [vmem:[%s6125_s4 + $0x80] sm:$0xff] }
 0x51c   : > { %2436 = vmatpush.msra.mxu3 %v3751_v4 }
 0x51d   : > { %3740 = vmatmul.msk.f32.gmra.mxu1 %vm1306_vm12, %v2108_v9 }
 0x520   : > { %v2073_v21 = vpop.f32.mrf.mxu0 }
 0x521   : > { %v2074_v35 = vadd.f32 %v2073_v21, %v5430_v53 }
 0x523   : > { %v2109_v18 = vmax.f32 %v2074_v35, 0.0 }
 0x525   : > { %3741 = vmatmul.msk.f32.gmra.mxu1 %vm1306_vm12, %v2109_v18 }
 0x528   : > { %v2076_v25 = vpop.f32.mrf.mxu0 }
 0x529   : > { %v2077_v46 = vadd.f32 %v2076_v25, %v5430_v53 }
 0x52b   : > { %v2110_v22 = vmax.f32 %v2077_v46, 0.0  ;;  %v5477_v46 = vperm.slane %v5297_v37, 5 }
 0x52d   : > { %3742 = vmatmul.msk.f32.gmra.mxu1 %vm1306_vm12, %v2110_v22 }
 0x530   : > { %v2079_v28 = vpop.f32.mrf.mxu0 }
 0x531   : > { %v2080_v26 = vadd.f32 %v2079_v28, %v5430_v53 }
 0x533   : > { %v2111_v7 = vmax.f32 %v2080_v26, 0.0 }
 0x535   : > { %3743 = vmatmul.msk.f32.gmra.mxu1 %vm1306_vm12, %v2111_v7  ;;  %v5482_v7 = vperm.slane %v5076_v50, 4 }
 0x538   : > { %v2082_v17 = vpop.f32.mrf.mxu0 }
 0x539   : > { %v2083_v42 = vadd.f32 %v2082_v17, %v5430_v53  ;;  %v2271_v17 = vpop.permute.xlu2 %2270 }
 0x53b   : > { %v2112_v0 = vmax.f32 %v2083_v42, 0.0 }
 0x53d   : > { %3744 = vmatmul.msk.f32.gmra.mxu1 %vm1306_vm12, %v2112_v0 }
 0x540   : > { %v2085_v38 = vpop.f32.mrf.mxu0 }
 0x541   : > { %v2086_v63 = vadd.f32 %v2085_v38, %v5430_v53 }
 0x543   : > { %v2113_v27 = vmax.f32 %v2086_v63, 0.0 }
 0x545   : > { %3745 = vmatmul.msk.f32.gmra.mxu1 %vm1306_vm12, %v2113_v27 }
 0x548   : > { %v2088_v32 = vpop.f32.mrf.mxu0 }
 0x549   : > { %v2089_v48 = vadd.f32 %v2088_v32, %v5430_v53 }
 0x54b   : > { %v2114_v30 = vmax.f32 %v2089_v48, 0.0 }
 0x54d   : > { %3746 = vmatmul.msk.f32.gmra.mxu1 %vm1306_vm12, %v2114_v30 }
 0x550   : > { %v2091_v29 = vpop.f32.mrf.mxu0 }
 0x551   : > { %v2092_v56 = vadd.f32 %v2091_v29, %v5430_v53 }
 0x553   : > { %v2115_v16 = vmax.f32 %v2092_v56, 0.0  ;;  %v2275_v56 = vpop.permute.xlu1 %2274 }
 0x555   : > { %3747 = vmatmul.msk.f32.gmra.mxu1 %vm1306_vm12, %v2115_v16 }
 0x558   : > { %v2094_v62 = vpop.f32.mrf.mxu0 }
 0x559   : > { %v2095_v54 = vadd.f32 %v2094_v62, %v5430_v53 }
 0x55b   : > { %v2116_v47 = vmax.f32 %v2095_v54, 0.0 }
 0x55d   : > { %3748 = vmatmul.msk.f32.gmra.mxu1 %vm1306_vm12, %v2116_v47 }
 0x560   : > { %v2097_v9 = vpop.f32.mrf.mxu0 }
 0x561   : > { %v2098_v11 = vadd.f32 %v2097_v9, %v5430_v53 }
 0x563   : > { %v2117_v21 = vmax.f32 %v2098_v11, 0.0 }
 0x565   : > { %3749 = vmatmul.msk.f32.gmra.mxu1 %vm1306_vm12, %v2117_v21 }
 0x568   : > { %v2100_v35 = vpop.f32.mrf.mxu0 }
 0x569   : > { %v2101_v18 = vadd.f32 %v2100_v35, %v5430_v53 }
 0x56b   : > { %v2118_v25 = vmax.f32 %v2101_v18, 0.0 }
 0x56d   : > { %3750 = vmatmul.msk.f32.gmra.mxu1 %vm1306_vm12, %v2118_v25 }
 0x572   : > { %v2189_v22 = vpop.f32.mrf.mxu1 }
 0x573   : > { %v2237_v28 = vadd.f32 %v2189_v22, %v5308_v2  ;;  %v2273_v2 = vpop.permute.xlu0 %2272 }
 0x575   : > { %v2254_v26 = vadd.f32 %v5477_v46, %v2237_v28 }
 0x577   : > { %v2318_v42 = vadd.f32 %v2271_v17, %v2254_v26 }
 0x579   : > { %v5485_v0 = vadd.f32 %v5482_v7, %v2318_v42 }
 0x57a   : > { %v2192_v53 = vpop.f32.mrf.mxu1 }
 0x57b   : > { %v2351_v55 = vmax.f32 %v5485_v0, 0.0  ;;  %v2238_v38 = vadd.f32 %v2192_v53, %v5315_v51 }
 0x57d   : > { %v2255_v63 = vadd.f32 %v5477_v46, %v2238_v38  ;;  %3755 = vmatmul.msk.f32.vlgmr.msra.gmra.mxu3 %vm1306_vm12, %v2351_v55 }
 0x57f   : > { %v2319_v27 = vadd.f32 %v2273_v2, %v2255_v63 }
 0x581   : > { %v5492_v32 = vadd.f32 %v5482_v7, %v2319_v27 }
 0x582   : > { %v2195_v50 = vpop.f32.mrf.mxu1 }
 0x583   : > { %v2239_v48 = vadd.f32 %v2195_v50, %v5322_v49  ;;  %v2352_v30 = vmax.f32 %v5492_v32, 0.0  ;;  %v2277_v49 = vpop.permute.xlu2 %2276 }
 0x585   : > { %v2256_v29 = vadd.f32 %v5477_v46, %v2239_v48  ;;  %3756 = vmatmul.msk.f32.gmra.mxu3 %vm1306_vm12, %v2352_v30  ;;  %v3774_v30 = vld [vmem:[%s6125_s4 + $0xb8] sm:$0xff] }
 0x586   : > { %2567 = vmatpush.msra.mxu2 %v3774_v30 }
 0x587   : > { %v2320_v51 = vadd.f32 %v2275_v56, %v2256_v29 }
 0x589   : > { %v5499_v16 = vadd.f32 %v5482_v7, %v2320_v51 }
 0x58a   : > { %v2198_v62 = vpop.f32.mrf.mxu1 }
 0x58b   : > { %v2240_v54 = vadd.f32 %v2198_v62, %v5329_v44  ;;  %v2353_v47 = vmax.f32 %v5499_v16, 0.0  ;;  %v2279_v44 = vpop.permute.xlu0 %2278 }
 0x58d   : > { %v2257_v19 = vadd.f32 %v5477_v46, %v2240_v54  ;;  %3757 = vmatmul.msk.f32.gmra.mxu3 %vm1306_vm12, %v2353_v47 }
 0x58f   : > { %v2321_v4 = vadd.f32 %v2277_v49, %v2257_v19 }
 0x591   : > { %v5506_v9 = vadd.f32 %v5482_v7, %v2321_v4 }
 0x592   : > { %v2201_v11 = vpop.f32.mrf.mxu1 }
 0x593   : > { %v2241_v21 = vadd.f32 %v2201_v11, %v5336_v60  ;;  %v2354_v35 = vmax.f32 %v5506_v9, 0.0  ;;  %v2281_v60 = vpop.permute.xlu1 %2280  ;;  %v2285_v62 = vpop.permute.xlu0 %2284 }
 0x595   : > { %v2258_v18 = vadd.f32 %v5477_v46, %v2241_v21  ;;  %3758 = vmatmul.msk.f32.gmra.mxu3 %vm1306_vm12, %v2354_v35 }
 0x597   : > { %v2322_v25 = vadd.f32 %v2279_v44, %v2258_v18 }
 0x599   : > { %v5513_v22 = vadd.f32 %v5482_v7, %v2322_v25 }
 0x59a   : > { %v2204_v28 = vpop.f32.mrf.mxu1 }
 0x59b   : > { %v2242_v26 = vadd.f32 %v2204_v28, %v5343_v52  ;;  %v2355_v17 = vmax.f32 %v5513_v22, 0.0  ;;  %v2283_v52 = vpop.permute.xlu2 %2282 }
 0x59d   : > { %v2259_v42 = vadd.f32 %v5477_v46, %v2242_v26  ;;  %3759 = vmatmul.msk.f32.gmra.mxu3 %vm1306_vm12, %v2355_v17 }
 0x59f   : > { %v2323_v53 = vadd.f32 %v2281_v60, %v2259_v42 }
 0x5a1   : > { %v5520_v55 = vadd.f32 %v5482_v7, %v2323_v53 }
 0x5a2   : > { %v2207_v38 = vpop.f32.mrf.mxu1 }
 0x5a3   : > { %v2243_v63 = vadd.f32 %v2207_v38, %v5350_v59  ;;  %v2356_v2 = vmax.f32 %v5520_v55, 0.0 }
 0x5a5   : > { %v2260_v27 = vadd.f32 %v5477_v46, %v2243_v63  ;;  %3760 = vmatmul.msk.f32.gmra.mxu3 %vm1306_vm12, %v2356_v2 }
 0x5a7   : > { %v2324_v50 = vadd.f32 %v2283_v52, %v2260_v27  ;;  %v3773_v27 = vld [vmem:[%s6125_s4 + $0xb0] sm:$0xff] }
 0x5a8   : > { %2568 = vmatpush.msra.mxu2 %v3773_v27 }
 0x5a9   : > { %v5527_v48 = vadd.f32 %v5482_v7, %v2324_v50 }
 0x5aa   : > { %v2210_v29 = vpop.f32.mrf.mxu1 }
 0x5ab   : > { %v2244_v56 = vadd.f32 %v2210_v29, %v5357_v24  ;;  %v2357_v59 = vmax.f32 %v5527_v48, 0.0  ;;  %v2287_v24 = vpop.permute.xlu1 %2286 }
 0x5ad   : > { %v2261_v51 = vadd.f32 %v5477_v46, %v2244_v56  ;;  %3761 = vmatmul.msk.f32.gmra.mxu3 %vm1306_vm12, %v2357_v59 }
 0x5af   : > { %v2325_v54 = vadd.f32 %v2285_v62, %v2261_v51 }
 0x5b1   : > { %v5537_v47 = vadd.f32 %v5482_v7, %v2325_v54 }
 0x5b2   : > { %v2213_v19 = vpop.f32.mrf.mxu1 }
 0x5b3   : > { %v2245_v49 = vadd.f32 %v2213_v19, %v5364_v5  ;;  %v2358_v4 = vmax.f32 %v5537_v47, 0.0  ;;  %v2289_v5 = vpop.permute.xlu2 %2288  ;;  %v2293_v29 = vpop.permute.xlu1 %2292 }
 0x5b5   : > { %v2262_v11 = vadd.f32 %v5477_v46, %v2245_v49  ;;  %3762 = vmatmul.msk.f32.gmra.mxu3 %vm1306_vm12, %v2358_v4 }
 0x5b7   : > { %v2326_v21 = vadd.f32 %v2287_v24, %v2262_v11 }
 0x5b9   : > { %v5544_v35 = vadd.f32 %v5482_v7, %v2326_v21 }
 0x5ba   : > { %v2216_v18 = vpop.f32.mrf.mxu1 }
 0x5bb   : > { %v2246_v44 = vadd.f32 %v2216_v18, %v5371_v36  ;;  %v2359_v25 = vmax.f32 %v5544_v35, 0.0  ;;  %v2291_v36 = vpop.permute.xlu0 %2290 }
 0x5bd   : > { %v2263_v28 = vadd.f32 %v5477_v46, %v2246_v44  ;;  %3763 = vmatmul.msk.f32.gmra.mxu3 %vm1306_vm12, %v2359_v25 }
 0x5bf   : > { %v2327_v26 = vadd.f32 %v2289_v5, %v2263_v28 }
 0x5c1   : > { %v5551_v17 = vadd.f32 %v5482_v7, %v2327_v26 }
 0x5c2   : > { %v2219_v42 = vpop.f32.mrf.mxu1 }
 0x5c3   : > { %v2247_v60 = vadd.f32 %v2219_v42, %v5378_v12  ;;  %v2360_v53 = vmax.f32 %v5551_v17, 0.0  ;;  %v3771_v42 = vld [vmem:[%s6125_s4 + $0xa0] sm:$0xff] }
 0x5c5   : > { %v2264_v38 = vadd.f32 %v5477_v46, %v2247_v60  ;;  %3764 = vmatmul.msk.f32.gmra.mxu3 %vm1306_vm12, %v2360_v53  ;;  %v2299_v53 = vpop.permute.xlu1 %2298 }
 0x5c7   : > { %v2328_v63 = vadd.f32 %v2291_v36, %v2264_v38 }
 0x5c9   : > { %v5558_v2 = vadd.f32 %v5482_v7, %v2328_v63 }
 0x5ca   : > { %v2222_v52 = vpop.f32.mrf.mxu1 }
 0x5cb   : > { %v2248_v50 = vadd.f32 %v2222_v52, %v5385_v23  ;;  %v2361_v12 = vmax.f32 %v5558_v2, 0.0  ;;  %v2295_v23 = vpop.permute.xlu2 %2294 }
 0x5cd   : > { %v2265_v30 = vadd.f32 %v5477_v46, %v2248_v50  ;;  %3765 = vmatmul.msk.f32.gmra.mxu3 %vm1306_vm12, %v2361_v12 }
 0x5cf   : > { %v2329_v56 = vadd.f32 %v2293_v29, %v2265_v30 }
 0x5d1   : > { %v5568_v59 = vadd.f32 %v5482_v7, %v2329_v56  ;;  %v5607_v56 = vperm.slane %v5297_v37, 1 }
 0x5d2   : > { %v2225_v51 = vpop.f32.mrf.mxu1 }
 0x5d3   : > { %v2249_v62 = vadd.f32 %v2225_v51, %v5395_v1  ;;  %v2362_v54 = vmax.f32 %v5568_v59, 0.0  ;;  %v2297_v1 = vpop.permute.xlu0 %2296  ;;  %v2301_v50 = vpop.permute.xlu2 %2300 }
 0x5d5   : > { %v2266_v19 = vadd.f32 %v5477_v46, %v2249_v62  ;;  %3766 = vmatmul.msk.f32.gmra.mxu3 %vm1306_vm12, %v2362_v54 }
 0x5d7   : > { %v2330_v49 = vadd.f32 %v2295_v23, %v2266_v19 }
 0x5d9   : > { %v5575_v4 = vadd.f32 %v5482_v7, %v2330_v49 }
 0x5da   : > { %v2228_v11 = vpop.f32.mrf.mxu1 }
 0x5db   : > { %v2250_v24 = vadd.f32 %v2228_v11, %v5411_v61  ;;  %v2363_v21 = vmax.f32 %v5575_v4, 0.0  ;;  %v3772_v61 = vld [vmem:[%s6125_s4 + $0xa8] sm:$0xff] }
 0x5dc   : > { %2569 = vmatpush.msra.mxu2 %v3772_v61 }
 0x5dd   : > { %v2267_v18 = vadd.f32 %v5477_v46, %v2250_v24  ;;  %3767 = vmatmul.msk.f32.gmra.mxu3 %vm1306_vm12, %v2363_v21 }
 0x5de   : > { %2570 = vmatpush.msra.mxu2 %v3771_v42 }
 0x5df   : > { %v2331_v44 = vadd.f32 %v2297_v1, %v2267_v18 }
 0x5e1   : > { %v5582_v25 = vadd.f32 %v5482_v7, %v2331_v44 }
 0x5e2   : > { %v2231_v28 = vpop.f32.mrf.mxu1 }
 0x5e3   : > { %v2251_v5 = vadd.f32 %v2231_v28, %v5418_v15  ;;  %v2364_v26 = vmax.f32 %v5582_v25, 0.0 }
 0x5e5   : > { %v2268_v60 = vadd.f32 %v5477_v46, %v2251_v5  ;;  %3768 = vmatmul.msk.f32.gmra.mxu3 %vm1306_vm12, %v2364_v26 }
 0x5e7   : > { %v2332_v38 = vadd.f32 %v2299_v53, %v2268_v60  ;;  %v3794_v53 = vld [vmem:[%s6125_s4 + $0xd8] sm:$0xff] }
 0x5e8   : > { %2816 = vmatpush.msrb.mxu0 %v3794_v53 }
 0x5e9   : > { %v5595_v15 = vadd.f32 %v5482_v7, %v2332_v38 }
 0x5ea   : > { %v2234_v36 = vpop.f32.mrf.mxu1 }
 0x5eb   : > { %v2252_v63 = vadd.f32 %v2234_v36, %v5425_v40  ;;  %v2365_v27 = vmax.f32 %v5595_v15, 0.0 }
 0x5ed   : > { %v2269_v52 = vadd.f32 %v5477_v46, %v2252_v63  ;;  %3769 = vmatmul.msk.f32.gmra.mxu3 %vm1306_vm12, %v2365_v27 }
 0x5ef   : > { %v2333_v12 = vadd.f32 %v2301_v50, %v2269_v52 }
 0x5f1   : > { %v5602_v30 = vadd.f32 %v5482_v7, %v2333_v12 }
 0x5f3   : > { %v2366_v29 = vmax.f32 %v5602_v30, 0.0 }
 0x5f5   : > { %3770 = vmatmul.msk.f32.gmra.mxu3 %vm1306_vm12, %v2366_v29 }
 0x600   : > { %v2438_v51 = vpop.f32.mrf.mxu3 }
 0x601   : > { %v2439_v40 = vadd.f32 %v2438_v51, %v5607_v56 }
 0x603   : > { %v2486_v62 = vmax.f32 %v2439_v40, 0.0 }
 0x605   : > { %3775 = vmatmul.msk.f32.vlgmr.msra.gmra.mxu2 %vm1306_vm12, %v2486_v62 }
 0x608   : > { %v2441_v46 = vpop.f32.mrf.mxu3 }
 0x609   : > { %v2442_v54 = vadd.f32 %v2441_v46, %v5607_v56 }
 0x60b   : > { %v2487_v19 = vmax.f32 %v2442_v54, 0.0  ;;  %v3793_v54 = vld [vmem:[%s6125_s4 + $0xd0] sm:$0xff] }
 0x60c   : > { %2817 = vmatpush.msrb.mxu0 %v3793_v54 }
 0x60d   : > { %3776 = vmatmul.msk.f32.gmra.mxu2 %vm1306_vm12, %v2487_v19 }
 0x610   : > { %v2444_v7 = vpop.f32.mrf.mxu3 }
 0x611   : > { %v2445_v23 = vadd.f32 %v2444_v7, %v5607_v56 }
 0x613   : > { %v2488_v49 = vmax.f32 %v2445_v23, 0.0 }
 0x615   : > { %3777 = vmatmul.msk.f32.gmra.mxu2 %vm1306_vm12, %v2488_v49 }
 0x618   : > { %v2447_v11 = vpop.f32.mrf.mxu3 }
 0x619   : > { %v2448_v24 = vadd.f32 %v2447_v11, %v5607_v56 }
 0x61b   : > { %v2489_v21 = vmax.f32 %v2448_v24, 0.0 }
 0x61d   : > { %3778 = vmatmul.msk.f32.gmra.mxu2 %vm1306_vm12, %v2489_v21 }
 0x620   : > { %v2450_v18 = vpop.f32.mrf.mxu3 }
 0x621   : > { %v2451_v1 = vadd.f32 %v2450_v18, %v5607_v56 }
 0x623   : > { %v2490_v44 = vmax.f32 %v2451_v1, 0.0 }
 0x625   : > { %3779 = vmatmul.msk.f32.gmra.mxu2 %vm1306_vm12, %v2490_v44 }
 0x628   : > { %v2453_v28 = vpop.f32.mrf.mxu3 }
 0x629   : > { %v2454_v5 = vadd.f32 %v2453_v28, %v5607_v56 }
 0x62b   : > { %v2491_v26 = vmax.f32 %v2454_v5, 0.0 }
 0x62d   : > { %3780 = vmatmul.msk.f32.gmra.mxu2 %vm1306_vm12, %v2491_v26  ;;  %v3792_v26 = vld [vmem:[%s6125_s4 + $0xc8] sm:$0xff] }
 0x62e   : > { %2818 = vmatpush.msrb.mxu0 %v3792_v26 }
 0x630   : > { %v2456_v61 = vpop.f32.mrf.mxu3 }
 0x631   : > { %v2457_v42 = vadd.f32 %v2456_v61, %v5607_v56  ;;  %v3791_v61 = vld [vmem:[%s6125_s4 + $0xc0] sm:$0xff] }
 0x632   : > { %2819 = vmatpush.msrb.mxu0 %v3791_v61 }
 0x633   : > { %v2492_v60 = vmax.f32 %v2457_v42, 0.0 }
 0x635   : > { %3781 = vmatmul.msk.f32.gmra.mxu2 %vm1306_vm12, %v2492_v60 }
 0x638   : > { %v2459_v38 = vpop.f32.mrf.mxu3 }
 0x639   : > { %v2460_v36 = vadd.f32 %v2459_v38, %v5607_v56  ;;  %v5654_v38 = vperm.slane %v5297_v37, 6 }
 0x63b   : > { %v2493_v63 = vmax.f32 %v2460_v36, 0.0 }
 0x63d   : > { %3782 = vmatmul.msk.f32.gmra.mxu2 %vm1306_vm12, %v2493_v63 }
 0x640   : > { %v2462_v27 = vpop.f32.mrf.mxu3 }
 0x641   : > { %v2463_v52 = vadd.f32 %v2462_v27, %v5607_v56 }
 0x643   : > { %v2494_v50 = vmax.f32 %v2463_v52, 0.0  ;;  %v5661_v52 = vld [vmem:[%s6127_s6] sm:$0xff] }
 0x645   : > { %3783 = vmatmul.msk.f32.gmra.mxu2 %vm1306_vm12, %v2494_v50  ;;  %v5664_v50 = vperm.slane %v5661_v52, 5 }
 0x648   : > { %v2465_v12 = vpop.f32.mrf.mxu3 }
 0x649   : > { %v2466_v29 = vadd.f32 %v2465_v12, %v5607_v56 }
 0x64b   : > { %v2495_v51 = vmax.f32 %v2466_v29, 0.0 }
 0x64d   : > { %3784 = vmatmul.msk.f32.gmra.mxu2 %vm1306_vm12, %v2495_v51 }
 0x650   : > { %v2468_v40 = vpop.f32.mrf.mxu3 }
 0x651   : > { %v2469_v62 = vadd.f32 %v2468_v40, %v5607_v56 }
 0x653   : > { %v2496_v46 = vmax.f32 %v2469_v62, 0.0  ;;  %v2656_v62 = vpop.permute.xlu1 %2655 }
 0x655   : > { %3785 = vmatmul.msk.f32.gmra.mxu2 %vm1306_vm12, %v2496_v46 }
 0x658   : > { %v2471_v19 = vpop.f32.mrf.mxu3 }
 0x659   : > { %v2472_v7 = vadd.f32 %v2471_v19, %v5607_v56 }
 0x65b   : > { %v2497_v23 = vmax.f32 %v2472_v7, 0.0 }
 0x65d   : > { %3786 = vmatmul.msk.f32.gmra.mxu2 %vm1306_vm12, %v2497_v23 }
 0x660   : > { %v2474_v49 = vpop.f32.mrf.mxu3 }
 0x661   : > { %v2475_v11 = vadd.f32 %v2474_v49, %v5607_v56 }
 0x663   : > { %v2498_v24 = vmax.f32 %v2475_v11, 0.0  ;;  %v2658_v11 = vpop.permute.xlu2 %2657 }
 0x665   : > { %3787 = vmatmul.msk.f32.gmra.mxu2 %vm1306_vm12, %v2498_v24 }
 0x668   : > { %v2477_v21 = vpop.f32.mrf.mxu3 }
 0x669   : > { %v2478_v18 = vadd.f32 %v2477_v21, %v5607_v56 }
 0x66b   : > { %v2499_v1 = vmax.f32 %v2478_v18, 0.0 }
 0x66d   : > { %3788 = vmatmul.msk.f32.gmra.mxu2 %vm1306_vm12, %v2499_v1 }
 0x670   : > { %v2480_v44 = vpop.f32.mrf.mxu3 }
 0x671   : > { %v2481_v28 = vadd.f32 %v2480_v44, %v5607_v56 }
 0x673   : > { %v2500_v5 = vmax.f32 %v2481_v28, 0.0 }
 0x675   : > { %3789 = vmatmul.msk.f32.gmra.mxu2 %vm1306_vm12, %v2500_v5 }
 0x678   : > { %v2483_v42 = vpop.f32.mrf.mxu3 }
 0x679   : > { %v2484_v60 = vadd.f32 %v2483_v42, %v5607_v56  ;;  %v2654_v56 = vpop.permute.xlu0 %2653 }
 0x67b   : > { %v2501_v53 = vmax.f32 %v2484_v60, 0.0 }
 0x67d   : > { %3790 = vmatmul.msk.f32.gmra.mxu2 %vm1306_vm12, %v2501_v53 }
 0x688   : > { %v2572_v36 = vpop.f32.mrf.mxu2 }
 0x689   : > { %v2620_v63 = vadd.f32 %v2572_v36, %v5485_v0 }
 0x68b   : > { %v2637_v27 = vadd.f32 %v5654_v38, %v2620_v63 }
 0x68d   : > { %v2701_v12 = vadd.f32 %v2654_v56, %v2637_v27 }
 0x68f   : > { %v5667_v29 = vadd.f32 %v5664_v50, %v2701_v12 }
 0x690   : > { %v2575_v37 = vpop.f32.mrf.mxu2 }
 0x691   : > { %v2734_v51 = vmax.f32 %v5667_v29, 0.0  ;;  %v2621_v0 = vadd.f32 %v2575_v37, %v5492_v32 }
 0x693   : > { %v2638_v40 = vadd.f32 %v5654_v38, %v2621_v0  ;;  %3795 = vmatmul.msk.f32.vlgmr.msrb.gmra.mxu0 %vm1306_vm12, %v2734_v51  ;;  %v3814_v0 = vld [vmem:[%s6125_s4 + $0xf8] sm:$0xff] }
 0x694   : > { %2950 = vmatpush.msrb.mxu1 %v3814_v0 }
 0x695   : > { %v2702_v46 = vadd.f32 %v2656_v62, %v2638_v40 }
 0x697   : > { %v5674_v54 = vadd.f32 %v5664_v50, %v2702_v46 }
 0x698   : > { %v2578_v19 = vpop.f32.mrf.mxu2 }
 0x699   : > { %v2622_v7 = vadd.f32 %v2578_v19, %v5499_v16  ;;  %v2735_v23 = vmax.f32 %v5674_v54, 0.0  ;;  %v2660_v16 = vpop.permute.xlu0 %2659 }
 0x69b   : > { %v2639_v49 = vadd.f32 %v5654_v38, %v2622_v7  ;;  %3796 = vmatmul.msk.f32.gmra.mxu0 %vm1306_vm12, %v2735_v23 }
 0x69d   : > { %v2703_v32 = vadd.f32 %v2658_v11, %v2639_v49 }
 0x69f   : > { %v5681_v24 = vadd.f32 %v5664_v50, %v2703_v32 }
 0x6a0   : > { %v2581_v21 = vpop.f32.mrf.mxu2 }
 0x6a1   : > { %v2623_v18 = vadd.f32 %v2581_v21, %v5506_v9  ;;  %v2736_v1 = vmax.f32 %v5681_v24, 0.0  ;;  %v2662_v9 = vpop.permute.xlu1 %2661  ;;  %v2666_v19 = vpop.permute.xlu0 %2665 }
 0x6a3   : > { %v2640_v44 = vadd.f32 %v5654_v38, %v2623_v18  ;;  %3797 = vmatmul.msk.f32.gmra.mxu0 %vm1306_vm12, %v2736_v1 }
 0x6a5   : > { %v2704_v28 = vadd.f32 %v2660_v16, %v2640_v44 }
 0x6a7   : > { %v5688_v5 = vadd.f32 %v5664_v50, %v2704_v28 }
 0x6a8   : > { %v2584_v26 = vpop.f32.mrf.mxu2 }
 0x6a9   : > { %v2624_v61 = vadd.f32 %v2584_v26, %v5513_v22  ;;  %v2737_v42 = vmax.f32 %v5688_v5, 0.0  ;;  %v2664_v22 = vpop.permute.xlu2 %2663 }
 0x6ab   : > { %v2641_v60 = vadd.f32 %v5654_v38, %v2624_v61  ;;  %3798 = vmatmul.msk.f32.gmra.mxu0 %vm1306_vm12, %v2737_v42 }
 0x6ad   : > { %v2705_v53 = vadd.f32 %v2662_v9, %v2641_v60 }
 0x6af   : > { %v5695_v36 = vadd.f32 %v5664_v50, %v2705_v53 }
 0x6b0   : > { %v2587_v63 = vpop.f32.mrf.mxu2 }
 0x6b1   : > { %v2625_v27 = vadd.f32 %v2587_v63, %v5520_v55  ;;  %v2738_v56 = vmax.f32 %v5695_v36, 0.0 }
 0x6b3   : > { %v2642_v12 = vadd.f32 %v5654_v38, %v2625_v27  ;;  %3799 = vmatmul.msk.f32.gmra.mxu0 %vm1306_vm12, %v2738_v56 }
 0x6b5   : > { %v2706_v37 = vadd.f32 %v2664_v22, %v2642_v12  ;;  %v3813_v12 = vld [vmem:[%s6125_s4 + $0xf0] sm:$0xff] }
 0x6b6   : > { %2951 = vmatpush.msrb.mxu1 %v3813_v12 }
 0x6b7   : > { %v5702_v51 = vadd.f32 %v5664_v50, %v2706_v37 }
 0x6b8   : > { %v2590_v40 = vpop.f32.mrf.mxu2 }
 0x6b9   : > { %v2626_v62 = vadd.f32 %v2590_v40, %v5527_v48  ;;  %v2739_v55 = vmax.f32 %v5702_v51, 0.0  ;;  %v2668_v48 = vpop.permute.xlu1 %2667 }
 0x6bb   : > { %v2643_v46 = vadd.f32 %v5654_v38, %v2626_v62  ;;  %3800 = vmatmul.msk.f32.gmra.mxu0 %vm1306_vm12, %v2739_v55 }
 0x6bd   : > { %v2707_v7 = vadd.f32 %v2666_v19, %v2643_v46 }
 0x6bf   : > { %v5712_v23 = vadd.f32 %v5664_v50, %v2707_v7 }
 0x6c0   : > { %v2593_v49 = vpop.f32.mrf.mxu2 }
 0x6c1   : > { %v2627_v11 = vadd.f32 %v2593_v49, %v5537_v47  ;;  %v2740_v32 = vmax.f32 %v5712_v23, 0.0  ;;  %v2670_v47 = vpop.permute.xlu2 %2669  ;;  %v2674_v40 = vpop.permute.xlu1 %2673 }
 0x6c3   : > { %v2644_v21 = vadd.f32 %v5654_v38, %v2627_v11  ;;  %3801 = vmatmul.msk.f32.gmra.mxu0 %vm1306_vm12, %v2740_v32 }
 0x6c5   : > { %v2708_v18 = vadd.f32 %v2668_v48, %v2644_v21 }
 0x6c7   : > { %v5719_v1 = vadd.f32 %v5664_v50, %v2708_v18 }
 0x6c8   : > { %v2596_v44 = vpop.f32.mrf.mxu2 }
 0x6c9   : > { %v2628_v16 = vadd.f32 %v2596_v44, %v5544_v35  ;;  %v2741_v28 = vmax.f32 %v5719_v1, 0.0  ;;  %v2672_v35 = vpop.permute.xlu0 %2671 }
 0x6cb   : > { %v2645_v26 = vadd.f32 %v5654_v38, %v2628_v16  ;;  %3802 = vmatmul.msk.f32.gmra.mxu0 %vm1306_vm12, %v2741_v28 }
 0x6cd   : > { %v2709_v61 = vadd.f32 %v2670_v47, %v2645_v26 }
 0x6cf   : > { %v5726_v42 = vadd.f32 %v5664_v50, %v2709_v61 }
 0x6d0   : > { %v2599_v60 = vpop.f32.mrf.mxu2 }
 0x6d1   : > { %v2629_v9 = vadd.f32 %v2599_v60, %v5551_v17  ;;  %v2742_v53 = vmax.f32 %v5726_v42, 0.0 }
 0x6d3   : > { %v2646_v63 = vadd.f32 %v5654_v38, %v2629_v9  ;;  %3803 = vmatmul.msk.f32.gmra.mxu0 %vm1306_vm12, %v2742_v53  ;;  %v3811_v9 = vld [vmem:[%s6125_s4 + $0xe0] sm:$0xff]  ;;  %v2680_v53 = vpop.permute.xlu1 %2679 }
 0x6d5   : > { %v2710_v27 = vadd.f32 %v2672_v35, %v2646_v63 }
 0x6d7   : > { %v5733_v56 = vadd.f32 %v5664_v50, %v2710_v27 }
 0x6d8   : > { %v2602_v22 = vpop.f32.mrf.mxu2 }
 0x6d9   : > { %v2630_v37 = vadd.f32 %v2602_v22, %v5558_v2  ;;  %v2743_v17 = vmax.f32 %v5733_v56, 0.0  ;;  %v2676_v2 = vpop.permute.xlu2 %2675 }
 0x6db   : > { %v2647_v0 = vadd.f32 %v5654_v38, %v2630_v37  ;;  %3804 = vmatmul.msk.f32.gmra.mxu0 %vm1306_vm12, %v2743_v17 }
 0x6dd   : > { %v2711_v62 = vadd.f32 %v2674_v40, %v2647_v0 }
 0x6df   : > { %v5743_v55 = vadd.f32 %v5664_v50, %v2711_v62 }
 0x6e0   : > { %v2605_v46 = vpop.f32.mrf.mxu2 }
 0x6e1   : > { %v2631_v19 = vadd.f32 %v2605_v46, %v5568_v59  ;;  %v2744_v7 = vmax.f32 %v5743_v55, 0.0  ;;  %v2678_v59 = vpop.permute.xlu0 %2677  ;;  %v2682_v37 = vpop.permute.xlu2 %2681 }
 0x6e3   : > { %v2648_v49 = vadd.f32 %v5654_v38, %v2631_v19  ;;  %3805 = vmatmul.msk.f32.gmra.mxu0 %vm1306_vm12, %v2744_v7 }
 0x6e5   : > { %v2712_v11 = vadd.f32 %v2676_v2, %v2648_v49 }
 0x6e7   : > { %v5750_v32 = vadd.f32 %v5664_v50, %v2712_v11  ;;  %v5791_v11 = vld [vmem:[%s6127_s6 + $0x8] sm:$0xff] }
 0x6e8   : > { %v2608_v21 = vpop.f32.mrf.mxu2 }
 0x6e9   : > { %v2632_v48 = vadd.f32 %v2608_v21, %v5575_v4  ;;  %v2745_v18 = vmax.f32 %v5750_v32, 0.0  ;;  %v3812_v4 = vld [vmem:[%s6125_s4 + $0xe8] sm:$0xff] }
 0x6ea   : > { %2952 = vmatpush.msrb.mxu1 %v3812_v4 }
 0x6eb   : > { %v2649_v44 = vadd.f32 %v5654_v38, %v2632_v48  ;;  %3806 = vmatmul.msk.f32.gmra.mxu0 %vm1306_vm12, %v2745_v18 }
 0x6ec   : > { %2953 = vmatpush.msrb.mxu1 %v3811_v9 }
 0x6ed   : > { %v2713_v16 = vadd.f32 %v2678_v59, %v2649_v44 }
 0x6ef   : > { %v5757_v28 = vadd.f32 %v5664_v50, %v2713_v16 }
 0x6f0   : > { %v2611_v26 = vpop.f32.mrf.mxu2 }
 0x6f1   : > { %v2633_v47 = vadd.f32 %v2611_v26, %v5582_v25  ;;  %v2746_v61 = vmax.f32 %v5757_v28, 0.0 }
 0x6f3   : > { %v2650_v60 = vadd.f32 %v5654_v38, %v2633_v47  ;;  %3807 = vmatmul.msk.f32.gmra.mxu0 %vm1306_vm12, %v2746_v61 }
 0x6f5   : > { %v2714_v63 = vadd.f32 %v2680_v53, %v2650_v60 }
 0x6f7   : > { %v5770_v25 = vadd.f32 %v5664_v50, %v2714_v63 }
 0x6f8   : > { %v2614_v35 = vpop.f32.mrf.mxu2 }
 0x6f9   : > { %v2634_v27 = vadd.f32 %v2614_v35, %v5595_v15  ;;  %v2747_v12 = vmax.f32 %v5770_v25, 0.0  ;;  %v2684_v15 = vpop.permute.xlu0 %2683 }
 0x6fb   : > { %v2651_v22 = vadd.f32 %v5654_v38, %v2634_v27  ;;  %3808 = vmatmul.msk.f32.gmra.mxu0 %vm1306_vm12, %v2747_v12  ;;  %v3834_v12 = vld [vmem:[%s6125_s4 + $0x118] sm:$0xff] }
 0x6fc   : > { %3151 = vmatpush.msrb.mxu3 %v3834_v12  ;;  %v3831_v12 = vld [vmem:[%s6125_s4 + $0x100] sm:$0xff] }
 0x6fd   : > { %v2715_v17 = vadd.f32 %v2682_v37, %v2651_v22 }
 0x6ff   : > { %v5777_v0 = vadd.f32 %v5664_v50, %v2715_v17 }
 0x700   : > { %v2617_v40 = vpop.f32.mrf.mxu2 }
 0x701   : > { %v2635_v62 = vadd.f32 %v2617_v40, %v5602_v30  ;;  %v2748_v46 = vmax.f32 %v5777_v0, 0.0  ;;  %v5794_v30 = vperm.slane %v5791_v11, 2 }
 0x703   : > { %v2652_v19 = vadd.f32 %v5654_v38, %v2635_v62  ;;  %3809 = vmatmul.msk.f32.gmra.mxu0 %vm1306_vm12, %v2748_v46 }
 0x705   : > { %v2716_v7 = vadd.f32 %v2684_v15, %v2652_v19 }
 0x707   : > { %v5784_v49 = vadd.f32 %v5664_v50, %v2716_v7 }
 0x709   : > { %v2749_v2 = vmax.f32 %v5784_v49, 0.0 }
 0x70b   : > { %3810 = vmatmul.msk.f32.gmra.mxu0 %vm1306_vm12, %v2749_v2 }
 0x710   : > { %v2821_v38 = vpop.f32.mrf.mxu0 }
 0x711   : > { %v2822_v21 = vadd.f32 %v2821_v38, %v5794_v30 }
 0x713   : > { %v2869_v48 = vmax.f32 %v2822_v21, 0.0 }
 0x715   : > { %3815 = vmatmul.msk.f32.vlgmr.msrb.gmra.mxu1 %vm1306_vm12, %v2869_v48  ;;  %v3833_v48 = vld [vmem:[%s6125_s4 + $0x110] sm:$0xff] }
 0x716   : > { %3152 = vmatpush.msrb.mxu3 %v3833_v48 }
 0x718   : > { %v2824_v50 = vpop.f32.mrf.mxu0 }
 0x719   : > { %v2825_v18 = vadd.f32 %v2824_v50, %v5794_v30 }
 0x71b   : > { %v2870_v44 = vmax.f32 %v2825_v18, 0.0 }
 0x71d   : > { %3816 = vmatmul.msk.f32.gmra.mxu1 %vm1306_vm12, %v2870_v44 }
 0x720   : > { %v2827_v59 = vpop.f32.mrf.mxu0 }
 0x721   : > { %v2828_v16 = vadd.f32 %v2827_v59, %v5794_v30 }
 0x723   : > { %v2871_v26 = vmax.f32 %v2828_v16, 0.0 }
 0x725   : > { %3817 = vmatmul.msk.f32.gmra.mxu1 %vm1306_vm12, %v2871_v26 }
 0x728   : > { %v2830_v47 = vpop.f32.mrf.mxu0 }
 0x729   : > { %v2831_v61 = vadd.f32 %v2830_v47, %v5794_v30 }
 0x72b   : > { %v2872_v60 = vmax.f32 %v2831_v61, 0.0 }
 0x72d   : > { %3818 = vmatmul.msk.f32.gmra.mxu1 %vm1306_vm12, %v2872_v60 }
 0x730   : > { %v2833_v4 = vpop.f32.mrf.mxu0 }
 0x731   : > { %v2834_v9 = vadd.f32 %v2833_v4, %v5794_v30 }
 0x733   : > { %v2873_v53 = vmax.f32 %v2834_v9, 0.0 }
 0x735   : > { %3819 = vmatmul.msk.f32.gmra.mxu1 %vm1306_vm12, %v2873_v53 }
 0x738   : > { %v2836_v63 = vpop.f32.mrf.mxu0 }
 0x739   : > { %v2837_v35 = vadd.f32 %v2836_v63, %v5794_v30 }
 0x73b   : > { %v2874_v27 = vmax.f32 %v2837_v35, 0.0 }
 0x73d   : > { %3820 = vmatmul.msk.f32.gmra.mxu1 %vm1306_vm12, %v2874_v27  ;;  %v3832_v27 = vld [vmem:[%s6125_s4 + $0x108] sm:$0xff] }
 0x73e   : > { %3153 = vmatpush.msrb.mxu3 %v3832_v27 }
 0x740   : > { %v2839_v22 = vpop.f32.mrf.mxu0  ;;  %3154 = vmatpush.msrb.mxu3 %v3831_v12 }
 0x741   : > { %v2840_v37 = vadd.f32 %v2839_v22, %v5794_v30 }
 0x743   : > { %v2875_v17 = vmax.f32 %v2840_v37, 0.0 }
 0x745   : > { %3821 = vmatmul.msk.f32.gmra.mxu1 %vm1306_vm12, %v2875_v17 }
 0x748   : > { %v2842_v40 = vpop.f32.mrf.mxu0 }
 0x749   : > { %v2843_v62 = vadd.f32 %v2842_v40, %v5794_v30 }
 0x74b   : > { %v2876_v46 = vmax.f32 %v2843_v62, 0.0  ;;  %v5841_v62 = vperm.slane %v5791_v11, 7 }
 0x74d   : > { %3822 = vmatmul.msk.f32.gmra.mxu1 %vm1306_vm12, %v2876_v46 }
 0x750   : > { %v2845_v19 = vpop.f32.mrf.mxu0 }
 0x751   : > { %v2846_v15 = vadd.f32 %v2845_v19, %v5794_v30 }
 0x753   : > { %v2877_v7 = vmax.f32 %v2846_v15, 0.0 }
 0x755   : > { %3823 = vmatmul.msk.f32.gmra.mxu1 %vm1306_vm12, %v2877_v7  ;;  %v5846_v7 = vperm.slane %v5661_v52, 6 }
 0x758   : > { %v2848_v2 = vpop.f32.mrf.mxu0 }
 0x759   : > { %v2849_v38 = vadd.f32 %v2848_v2, %v5794_v30 }
 0x75b   : > { %v2878_v21 = vmax.f32 %v2849_v38, 0.0 }
 0x75d   : > { %3824 = vmatmul.msk.f32.gmra.mxu1 %vm1306_vm12, %v2878_v21 }
 0x760   : > { %v2851_v50 = vpop.f32.mrf.mxu0 }
 0x761   : > { %v2852_v18 = vadd.f32 %v2851_v50, %v5794_v30 }
 0x763   : > { %v2879_v44 = vmax.f32 %v2852_v18, 0.0 }
 0x765   : > { %3825 = vmatmul.msk.f32.gmra.mxu1 %vm1306_vm12, %v2879_v44 }
 0x768   : > { %v2854_v59 = vpop.f32.mrf.mxu0 }
 0x769   : > { %v2855_v16 = vadd.f32 %v2854_v59, %v5794_v30 }
 0x76b   : > { %v2880_v26 = vmax.f32 %v2855_v16, 0.0 }
 0x76d   : > { %3826 = vmatmul.msk.f32.gmra.mxu1 %vm1306_vm12, %v2880_v26 }
 0x770   : > { %v2857_v47 = vpop.f32.mrf.mxu0 }
 0x771   : > { %v2858_v61 = vadd.f32 %v2857_v47, %v5794_v30 }
 0x773   : > { %v2881_v60 = vmax.f32 %v2858_v61, 0.0 }
 0x775   : > { %3827 = vmatmul.msk.f32.gmra.mxu1 %vm1306_vm12, %v2881_v60 }
 0x778   : > { %v2860_v4 = vpop.f32.mrf.mxu0 }
 0x779   : > { %v2861_v9 = vadd.f32 %v2860_v4, %v5794_v30 }
 0x77b   : > { %v2882_v53 = vmax.f32 %v2861_v9, 0.0 }
 0x77d   : > { %3828 = vmatmul.msk.f32.gmra.mxu1 %vm1306_vm12, %v2882_v53 }
 0x780   : > { %v2863_v63 = vpop.f32.mrf.mxu0 }
 0x781   : > { %v2864_v35 = vadd.f32 %v2863_v63, %v5794_v30 }
 0x783   : > { %v2883_v22 = vmax.f32 %v2864_v35, 0.0 }
 0x785   : > { %3829 = vmatmul.msk.f32.gmra.mxu1 %vm1306_vm12, %v2883_v22 }
 0x788   : > { %v2866_v37 = vpop.f32.mrf.mxu0 }
 0x789   : > { %v2867_v17 = vadd.f32 %v2866_v37, %v5794_v30 }
 0x78b   : > { %v2884_v40 = vmax.f32 %v2867_v17, 0.0 }
 0x78d   : > { %3830 = vmatmul.msk.f32.gmra.mxu1 %vm1306_vm12, %v2884_v40 }
 0x792   : > { %v2955_v46 = vpop.f32.mrf.mxu1 }
 0x793   : > { %v3003_v19 = vadd.f32 %v2955_v46, %v5667_v29 }
 0x795   : > { %v3020_v15 = vadd.f32 %v5841_v62, %v3003_v19 }
 0x797   : > { %v3036_v2 = vadd.f32 %v3020_v15, %v4949_v33 }
 0x799   : > { %v5850_v38 = vadd.f32 %v5846_v7, %v3036_v2 }
 0x79a   : > { %v2958_v30 = vpop.f32.mrf.mxu1 }
 0x79b   : > { %v3069_v21 = vmax.f32 %v5850_v38, 0.0  ;;  %v3004_v48 = vadd.f32 %v2958_v30, %v5674_v54 }
 0x79d   : > { %v3021_v50 = vadd.f32 %v5841_v62, %v3004_v48  ;;  %3835 = vmatmul.msk.f32.vlgmr.msrb.gmra.mxu3 %vm1306_vm12, %v3069_v21 }
 0x79f   : > { %v3037_v29 = vadd.f32 %v3021_v50, %v4959_v45 }
 0x7a1   : > { %v5858_v18 = vadd.f32 %v5846_v7, %v3037_v29 }
 0x7a2   : > { %v2961_v44 = vpop.f32.mrf.mxu1 }
 0x7a3   : > { %v3005_v33 = vadd.f32 %v2961_v44, %v5681_v24  ;;  %v3070_v59 = vmax.f32 %v5858_v18, 0.0 }
 0x7a5   : > { %v3022_v16 = vadd.f32 %v5841_v62, %v3005_v33  ;;  %3836 = vmatmul.msk.f32.gmra.mxu3 %vm1306_vm12, %v3070_v59 }
 0x7a7   : > { %v3038_v54 = vadd.f32 %v3022_v16, %v4969_v58 }
 0x7a9   : > { %v5866_v26 = vadd.f32 %v5846_v7, %v3038_v54 }
 0x7aa   : > { %v2964_v47 = vpop.f32.mrf.mxu1 }
 0x7ab   : > { %v3006_v45 = vadd.f32 %v2964_v47, %v5688_v5  ;;  %v3071_v61 = vmax.f32 %v5866_v26, 0.0 }
 0x7ad   : > { %v3023_v60 = vadd.f32 %v5841_v62, %v3006_v45  ;;  %3837 = vmatmul.msk.f32.gmra.mxu3 %vm1306_vm12, %v3071_v61 }
 0x7af   : > { %v3039_v24 = vadd.f32 %v3023_v60, %v4977_v6 }
 0x7b1   : > { %v5874_v4 = vadd.f32 %v5846_v7, %v3039_v24 }
 0x7b2   : > { %v2967_v9 = vpop.f32.mrf.mxu1 }
 0x7b3   : > { %v3007_v58 = vadd.f32 %v2967_v9, %v5695_v36  ;;  %v3072_v53 = vmax.f32 %v5874_v4, 0.0 }
 0x7b5   : > { %v3024_v63 = vadd.f32 %v5841_v62, %v3007_v58  ;;  %3838 = vmatmul.msk.f32.gmra.mxu3 %vm1306_vm12, %v3072_v53 }
 0x7b7   : > { %v3040_v5 = vadd.f32 %v3024_v63, %v4985_v8 }
 0x7b9   : > { %v5882_v35 = vadd.f32 %v5846_v7, %v3040_v5 }
 0x7ba   : > { %v2970_v27 = vpop.f32.mrf.mxu1 }
 0x7bb   : > { %v3008_v6 = vadd.f32 %v2970_v27, %v5702_v51  ;;  %v3073_v12 = vmax.f32 %v5882_v35, 0.0 }
 0x7bd   : > { %v3025_v22 = vadd.f32 %v5841_v62, %v3008_v6  ;;  %3839 = vmatmul.msk.f32.gmra.mxu3 %vm1306_vm12, %v3073_v12 }
 0x7bf   : > { %v3041_v36 = vadd.f32 %v3025_v22, %v4991_v10  ;;  %v3854_v10 = vld [vmem:[%s6125_s4 + $0x138] sm:$0xff] }
 0x7c0   : > { %3285 = vmatpush.msrb.mxu2 %v3854_v10  ;;  %v3851_v10 = vld [vmem:[%s6125_s4 + $0x120] sm:$0xff] }
 0x7c1   : > { %v5890_v37 = vadd.f32 %v5846_v7, %v3041_v36 }
 0x7c2   : > { %v2973_v17 = vpop.f32.mrf.mxu1 }
 0x7c3   : > { %v3009_v8 = vadd.f32 %v2973_v17, %v5712_v23  ;;  %v3074_v40 = vmax.f32 %v5890_v37, 0.0 }
 0x7c5   : > { %v3026_v46 = vadd.f32 %v5841_v62, %v3009_v8  ;;  %3840 = vmatmul.msk.f32.gmra.mxu3 %vm1306_vm12, %v3074_v40 }
 0x7c7   : > { %v3042_v51 = vadd.f32 %v3026_v46, %v4997_v34 }
 0x7c9   : > { %v5898_v19 = vadd.f32 %v5846_v7, %v3042_v51 }
 0x7ca   : > { %v2976_v15 = vpop.f32.mrf.mxu1 }
 0x7cb   : > { %v3010_v2 = vadd.f32 %v2976_v15, %v5719_v1  ;;  %v3075_v23 = vmax.f32 %v5898_v19, 0.0 }
 0x7cd   : > { %v3027_v30 = vadd.f32 %v5841_v62, %v3010_v2  ;;  %3841 = vmatmul.msk.f32.gmra.mxu3 %vm1306_vm12, %v3075_v23 }
 0x7cf   : > { %v3043_v21 = vadd.f32 %v3027_v30, %v5003_v39 }
 0x7d1   : > { %v5909_v34 = vadd.f32 %v5846_v7, %v3043_v21 }
 0x7d2   : > { %v2979_v48 = vpop.f32.mrf.mxu1 }
 0x7d3   : > { %v3011_v50 = vadd.f32 %v2979_v48, %v5726_v42  ;;  %v3076_v29 = vmax.f32 %v5909_v34, 0.0 }
 0x7d5   : > { %v3028_v44 = vadd.f32 %v5841_v62, %v3011_v50  ;;  %3842 = vmatmul.msk.f32.gmra.mxu3 %vm1306_vm12, %v3076_v29 }
 0x7d7   : > { %v3044_v1 = vadd.f32 %v3028_v44, %v5009_v14 }
 0x7d9   : > { %v5917_v33 = vadd.f32 %v5846_v7, %v3044_v1 }
 0x7da   : > { %v2982_v59 = vpop.f32.mrf.mxu1 }
 0x7db   : > { %v3012_v39 = vadd.f32 %v2982_v59, %v5733_v56  ;;  %v3077_v16 = vmax.f32 %v5917_v33, 0.0 }
 0x7dd   : > { %v3029_v54 = vadd.f32 %v5841_v62, %v3012_v39  ;;  %3843 = vmatmul.msk.f32.gmra.mxu3 %vm1306_vm12, %v3077_v16 }
 0x7df   : > { %v3045_v42 = vadd.f32 %v3029_v54, %v5015_v41  ;;  %v3853_v41 = vld [vmem:[%s6125_s4 + $0x130] sm:$0xff] }
 0x7e0   : > { %3286 = vmatpush.msrb.mxu2 %v3853_v41 }
 0x7e1   : > { %v5925_v47 = vadd.f32 %v5846_v7, %v3045_v42 }
 0x7e2   : > { %v2985_v45 = vpop.f32.mrf.mxu1 }
 0x7e3   : > { %v3013_v14 = vadd.f32 %v2985_v45, %v5743_v55  ;;  %v3078_v61 = vmax.f32 %v5925_v47, 0.0 }
 0x7e5   : > { %v3030_v60 = vadd.f32 %v5841_v62, %v3013_v14  ;;  %3844 = vmatmul.msk.f32.gmra.mxu3 %vm1306_vm12, %v3078_v61 }
 0x7e7   : > { %v3046_v56 = vadd.f32 %v3030_v60, %v5021_v57 }
 0x7e9   : > { %v5933_v24 = vadd.f32 %v5846_v7, %v3046_v56 }
 0x7ea   : > { %v2988_v9 = vpop.f32.mrf.mxu1 }
 0x7eb   : > { %v3014_v58 = vadd.f32 %v2988_v9, %v5750_v32  ;;  %v3079_v55 = vmax.f32 %v5933_v24, 0.0 }
 0x7ed   : > { %v3031_v53 = vadd.f32 %v5841_v62, %v3014_v58  ;;  %3845 = vmatmul.msk.f32.gmra.mxu3 %vm1306_vm12, %v3079_v55 }
 0x7ef   : > { %v3047_v63 = vadd.f32 %v3031_v53, %v5027_v3 }
 0x7f1   : > { %v5944_v57 = vadd.f32 %v5846_v7, %v3047_v63 }
 0x7f2   : > { %v2991_v5 = vpop.f32.mrf.mxu1 }
 0x7f3   : > { %v3015_v27 = vadd.f32 %v2991_v5, %v5757_v28  ;;  %v3080_v6 = vmax.f32 %v5944_v57, 0.0 }
 0x7f5   : > { %v3032_v12 = vadd.f32 %v5841_v62, %v3015_v27  ;;  %3846 = vmatmul.msk.f32.gmra.mxu3 %vm1306_vm12, %v3080_v6 }
 0x7f7   : > { %v3048_v32 = vadd.f32 %v3032_v12, %v5033_v13 }
 0x7f9   : > { %v5952_v22 = vadd.f32 %v5846_v7, %v3048_v32 }
 0x7fa   : > { %v2994_v36 = vpop.f32.mrf.mxu1 }
 0x7fb   : > { %v3016_v3 = vadd.f32 %v2994_v36, %v5770_v25  ;;  %v3081_v17 = vmax.f32 %v5952_v22, 0.0  ;;  %v3852_v25 = vld [vmem:[%s6125_s4 + $0x128] sm:$0xff] }
 0x7fc   : > { %3287 = vmatpush.msrb.mxu2 %v3852_v25 }
 0x7fd   : > { %v3033_v8 = vadd.f32 %v5841_v62, %v3016_v3  ;;  %3847 = vmatmul.msk.f32.gmra.mxu3 %vm1306_vm12, %v3081_v17 }
 0x7fe   : > { %3288 = vmatpush.msrb.mxu2 %v3851_v10 }
 0x7ff   : > { %v3049_v28 = vadd.f32 %v3033_v8, %v5048_v31 }
 0x801   : > { %v5960_v40 = vadd.f32 %v5846_v7, %v3049_v28 }
 0x802   : > { %v2997_v46 = vpop.f32.mrf.mxu1 }
 0x803   : > { %v3017_v13 = vadd.f32 %v2997_v46, %v5777_v0  ;;  %v3082_v51 = vmax.f32 %v5960_v40, 0.0 }
 0x805   : > { %v3034_v15 = vadd.f32 %v5841_v62, %v3017_v13  ;;  %3848 = vmatmul.msk.f32.gmra.mxu3 %vm1306_vm12, %v3082_v51 }
 0x807   : > { %v3050_v31 = vadd.f32 %v3034_v15, %v5057_v20  ;;  %v3090_v20 = vperm.slane %v5791_v11, 3 }
 0x809   : > { %v5974_v0 = vadd.f32 %v5846_v7, %v3050_v31 }
 0x80a   : > { %v3000_v2 = vpop.f32.mrf.mxu1 }
 0x80b   : > { %v3018_v23 = vadd.f32 %v3000_v2, %v5784_v49  ;;  %v3083_v30 = vmax.f32 %v5974_v0, 0.0 }
 0x80d   : > { %v3035_v21 = vadd.f32 %v5841_v62, %v3018_v23  ;;  %3849 = vmatmul.msk.f32.gmra.mxu3 %vm1306_vm12, %v3083_v30 }
 0x80f   : > { %v3051_v48 = vadd.f32 %v3035_v21, %v5069_v43 }
 0x811   : > { %v5982_v50 = vadd.f32 %v5846_v7, %v3051_v48 }
 0x813   : > { %v3084_v29 = vmax.f32 %v5982_v50, 0.0 }
 0x815   : > { %3850 = vmatmul.msk.f32.gmra.mxu3 %vm1306_vm12, %v3084_v29 }
 0x820   : > { %v3156_v44 = vpop.f32.mrf.mxu3 }
 0x821   : > { %v3157_v1 = vadd.f32 %v3156_v44, %v3090_v20 }
 0x823   : > { %v3204_v49 = vmax.f32 %v3157_v1, 0.0 }
 0x825   : > { %3855 = vmatmul.msk.f32.vlgmr.msrb.gmra.mxu2 %vm1306_vm12, %v3204_v49 }
 0x828   : > { %v3159_v59 = vpop.f32.mrf.mxu3 }
 0x829   : > { %v3160_v62 = vadd.f32 %v3159_v59, %v3090_v20 }
 0x82b   : > { %v3205_v39 = vmax.f32 %v3160_v62, 0.0 }
 0x82d   : > { %3856 = vmatmul.msk.f32.gmra.mxu2 %vm1306_vm12, %v3205_v39 }
 0x830   : > { %v3162_v43 = vpop.f32.mrf.mxu3 }
 0x831   : > { %v3163_v16 = vadd.f32 %v3162_v43, %v3090_v20 }
 0x833   : > { %v3206_v7 = vmax.f32 %v3163_v16, 0.0 }
 0x835   : > { %3857 = vmatmul.msk.f32.gmra.mxu2 %vm1306_vm12, %v3206_v7 }
 0x838   : > { %v3165_v54 = vpop.f32.mrf.mxu3 }
 0x839   : > { %v3166_v42 = vadd.f32 %v3165_v54, %v3090_v20 }
 0x83b   : > { %v3207_v45 = vmax.f32 %v3166_v42, 0.0 }
 0x83d   : > { %3858 = vmatmul.msk.f32.gmra.mxu2 %vm1306_vm12, %v3207_v45 }
 0x840   : > { %v3168_v11 = vpop.f32.mrf.mxu3 }
 0x841   : > { %v3169_v14 = vadd.f32 %v3168_v11, %v3090_v20 }
 0x843   : > { %v3208_v61 = vmax.f32 %v3169_v14, 0.0 }
 0x845   : > { %3859 = vmatmul.msk.f32.gmra.mxu2 %vm1306_vm12, %v3208_v61 }
 0x848   : > { %v3171_v60 = vpop.f32.mrf.mxu3 }
 0x849   : > { %v3172_v56 = vadd.f32 %v3171_v60, %v3090_v20 }
 0x84b   : > { %v3209_v41 = vmax.f32 %v3172_v56, 0.0 }
 0x84d   : > { %3860 = vmatmul.msk.f32.gmra.mxu2 %vm1306_vm12, %v3209_v41  ;;  %v6012_v41 = vld [vmem:[%s6127_s6 + $0x10] ss:$0 sm:$0xff] }
 0x850   : > { %v3174_v9 = vpop.f32.mrf.mxu3 }
 0x851   : > { %v3175_v58 = vadd.f32 %v3174_v9, %v3090_v20 }
 0x853   : > { %v3210_v55 = vmax.f32 %v3175_v58, 0.0 }
 0x855   : > { %3861 = vmatmul.msk.f32.gmra.mxu2 %vm1306_vm12, %v3210_v55 }
 0x858   : > { %v3177_v53 = vpop.f32.mrf.mxu3 }
 0x859   : > { %v3178_v63 = vadd.f32 %v3177_v53, %v3090_v20 }
 0x85b   : > { %v3211_v5 = vmax.f32 %v3178_v63, 0.0 }
 0x85d   : > { %3862 = vmatmul.msk.f32.gmra.mxu2 %vm1306_vm12, %v3211_v5 }
 0x860   : > { %v3180_v27 = vpop.f32.mrf.mxu3 }
 0x861   : > { %v3181_v6 = vadd.f32 %v3180_v27, %v3090_v20 }
 0x863   : > { %v3212_v12 = vmax.f32 %v3181_v6, 0.0 }
 0x865   : > { %3863 = vmatmul.msk.f32.gmra.mxu2 %vm1306_vm12, %v3212_v12 }
 0x868   : > { %v3183_v32 = vpop.f32.mrf.mxu3 }
 0x869   : > { %v3184_v36 = vadd.f32 %v3183_v32, %v3090_v20 }
 0x86b   : > { %v3213_v3 = vmax.f32 %v3184_v36, 0.0 }
 0x86d   : > { %3864 = vmatmul.msk.f32.gmra.mxu2 %vm1306_vm12, %v3213_v3 }
 0x870   : > { %v3186_v17 = vpop.f32.mrf.mxu3 }
 0x871   : > { %v3187_v8 = vadd.f32 %v3186_v17, %v3090_v20 }
 0x873   : > { %v3214_v28 = vmax.f32 %v3187_v8, 0.0 }
 0x875   : > { %3865 = vmatmul.msk.f32.gmra.mxu2 %vm1306_vm12, %v3214_v28 }
 0x878   : > { %v3189_v46 = vpop.f32.mrf.mxu3 }
 0x879   : > { %v3190_v13 = vadd.f32 %v3189_v46, %v3090_v20 }
 0x87b   : > { %v3215_v51 = vmax.f32 %v3190_v13, 0.0 }
 0x87d   : > { %3866 = vmatmul.msk.f32.gmra.mxu2 %vm1306_vm12, %v3215_v51 }
 0x880   : > { %v3192_v25 = vpop.f32.mrf.mxu3 }
 0x881   : > { %v3193_v10 = vadd.f32 %v3192_v25, %v3090_v20 }
 0x883   : > { %v3216_v15 = vmax.f32 %v3193_v10, 0.0 }
 0x885   : > { %3867 = vmatmul.msk.f32.gmra.mxu2 %vm1306_vm12, %v3216_v15 }
 0x888   : > { %v3195_v31 = vpop.f32.mrf.mxu3 }
 0x889   : > { %v3196_v2 = vadd.f32 %v3195_v31, %v3090_v20 }
 0x88b   : > { %v3217_v23 = vmax.f32 %v3196_v2, 0.0 }
 0x88d   : > { %3868 = vmatmul.msk.f32.gmra.mxu2 %vm1306_vm12, %v3217_v23 }
 0x890   : > { %v3198_v30 = vpop.f32.mrf.mxu3 }
 0x891   : > { %v3199_v21 = vadd.f32 %v3198_v30, %v3090_v20 }
 0x893   : > { %v3218_v48 = vmax.f32 %v3199_v21, 0.0 }
 0x895   : > { %3869 = vmatmul.msk.f32.gmra.mxu2 %vm1306_vm12, %v3218_v48 }
 0x898   : > { %v3201_v29 = vpop.f32.mrf.mxu3 }
 0x899   : > { %v3202_v44 = vadd.f32 %v3201_v29, %v3090_v20 }
 0x89b   : > { %v3219_v1 = vmax.f32 %v3202_v44, 0.0 }
 0x89d   : > { %3870 = vmatmul.msk.f32.gmra.mxu2 %vm1306_vm12, %v3219_v1 }
 0x8a8   : > { %v6003_v49 = vpop.f32.mrf.mxu2 }
 0x8b0   : > { %v6005_v59 = vpop.f32.mrf.mxu2 }
 0x8b8   : > { %v6007_v62 = vpop.f32.mrf.mxu2 }
 0x8b9   : > { %v3340_v48 = vadd.f32 %v6007_v62, %v5866_v26 }
 0x8bb   : > { %v3357_v1 = vadd.f32 %v6012_v41, %v3340_v48 }
 0x8bd   : > { %v3373_v26 = vmax.f32 %v3357_v1, 0.0 }
 0x8c0   : > { %v3299_v39 = vpop.f32.mrf.mxu2 }
 0x8c1   : > { %v3341_v30 = vadd.f32 %v3299_v39, %v5874_v4  ;;  %v3338_v4 = vadd.f32 %v6003_v49, %v5850_v38 }
 0x8c3   : > { %v3358_v29 = vadd.f32 %v6012_v41, %v3341_v30  ;;  %v3355_v62 = vadd.f32 %v6012_v41, %v3338_v4 }
 0x8c8   : > { %v3302_v43 = vpop.f32.mrf.mxu2 }
 0x8c9   : > { %v3342_v2 = vadd.f32 %v3302_v43, %v5882_v35  ;;  %v3339_v35 = vadd.f32 %v6005_v59, %v5858_v18  ;;  %v3374_v43 = vmax.f32 %v3358_v29, 0.0  ;;  %v3371_v18 = vmax.f32 %v3355_v62, 0.0 }
 0x8cb   : > { %v3356_v39 = vadd.f32 %v6012_v41, %v3339_v35 }
 0x8d0   : > { %v3305_v16 = vpop.f32.mrf.mxu2 }
 0x8d8   : > { %v3308_v7 = vpop.f32.mrf.mxu2 }
 0x8e0   : > { %v3311_v54 = vpop.f32.mrf.mxu2 }
 0x8e8   : > { %v3314_v42 = vpop.f32.mrf.mxu2 }
 0x8f0   : > { %v3317_v45 = vpop.f32.mrf.mxu2 }
 0x8f8   : > { %v3320_v11 = vpop.f32.mrf.mxu2 }
 0x900   : > { %v3323_v14 = vpop.f32.mrf.mxu2 }
 0x908   : > { %v3326_v61 = vpop.f32.mrf.mxu2 }
 0x909   : > { %v3350_v27 = vadd.f32 %v3326_v61, %v5952_v22  ;;  %v3347_v22 = vadd.f32 %v3317_v45, %v5925_v47  ;;  %v3344_v47 = vadd.f32 %v3308_v7, %v5898_v19 }
 0x90b   : > { %v3364_v28 = vadd.f32 %v6012_v41, %v3347_v22  ;;  %v3361_v15 = vadd.f32 %v6012_v41, %v3344_v47 }
 0x90d   : > { %v3380_v51 = vmax.f32 %v3364_v28, 0.0  ;;  %v3377_v23 = vmax.f32 %v3361_v15, 0.0 }
 0x910   : > { %v3329_v20 = vpop.f32.mrf.mxu2 }
 0x911   : > { %v3351_v53 = vadd.f32 %v3329_v20, %v5960_v40  ;;  %v3348_v40 = vadd.f32 %v3320_v11, %v5933_v24  ;;  %v3345_v24 = vadd.f32 %v3311_v54, %v5909_v34  ;;  %v4242_v34 = vmov 0  }
 0x912   : > { %4088 = vset.pattern.permute.xlu1 %v4242_v34  ;;  %4089 = vset.pattern.permute.xlu0 %v4242_v34 }
 0x913   : > { %v3368_v6 = vadd.f32 %v6012_v41, %v3351_v53  ;;  %v3365_v17 = vadd.f32 %v6012_v41, %v3348_v40  ;;  %v3362_v25 = vadd.f32 %v6012_v41, %v3345_v24  ;;  %3389 = vperm.xlu1 %4088, %v5661_v52  }
 0x915   : > { %v3384_v32 = vmax.f32 %v3368_v6, 0.0  ;;  %v3381_v46 = vmax.f32 %v3365_v17, 0.0  ;;  %v3378_v31 = vmax.f32 %v3362_v25, 0.0 }
 0x918   : > { %v3332_v60 = vpop.f32.mrf.mxu2 }
 0x919   : > { %v3352_v9 = vadd.f32 %v3332_v60, %v5974_v0  ;;  %v3349_v0 = vadd.f32 %v3323_v14, %v5944_v57  ;;  %v3346_v57 = vadd.f32 %v3314_v42, %v5917_v33  ;;  %v3343_v33 = vadd.f32 %v3305_v16, %v5890_v37 }
 0x91a   : > { %v3359_v37 = vadd.f32 %v6012_v41, %v3342_v2  ;;  %v3372_v16 = vmax.f32 %v3356_v39, 0.0 }
 0x91b   : > { %v3369_v63 = vadd.f32 %v6012_v41, %v3352_v9  ;;  %v3366_v36 = vadd.f32 %v6012_v41, %v3349_v0  ;;  %v3363_v13 = vadd.f32 %v6012_v41, %v3346_v57  ;;  %v3360_v19 = vadd.f32 %v6012_v41, %v3343_v33 }
 0x91c   : > { %v3375_v44 = vmax.f32 %v3359_v37, 0.0 }
 0x91d   : > { %v3385_v12 = vmax.f32 %v3369_v63, 0.0  ;;  %v3382_v8 = vmax.f32 %v3366_v36, 0.0  ;;  %v3379_v10 = vmax.f32 %v3363_v13, 0.0  ;;  %v3376_v21 = vmax.f32 %v3360_v19, 0.0 }
 0x920   : > { %v3335_v56 = vpop.f32.mrf.mxu2 }
 0x921   : > { %v3353_v58 = vadd.f32 %v3335_v56, %v5982_v50  ;;  %v3367_v50 = vadd.f32 %v6012_v41, %v3350_v27 }
 0x923   : > { %v3370_v55 = vadd.f32 %v6012_v41, %v3353_v58  ;;  %v3383_v3 = vmax.f32 %v3367_v50, 0.0 }
 0x925   : > { %v3386_v5 = vmax.f32 %v3370_v55, 0.0 }
 0x927   : > { %3871 = vmatpush.xpose.msk.msra.mxu0 %vm1306_vm12, %v3386_v5 }
 0x92b   : > { %3872 = vmatpush.xpose.msk.msra.mxu0 %vm1306_vm12, %v3385_v12 }
 0x92f   : > { %3873 = vmatpush.xpose.msk.msra.mxu0 %vm1306_vm12, %v3384_v32 }
 0x933   : > { %3874 = vmatpush.xpose.msk.msra.mxu0 %vm1306_vm12, %v3383_v3 }
 0x937   : > { %3875 = vmatpush.xpose.msk.msra.mxu0 %vm1306_vm12, %v3382_v8 }
 0x93b   : > { %3876 = vmatpush.xpose.msk.msra.mxu0 %vm1306_vm12, %v3381_v46 }
 0x93f   : > { %3877 = vmatpush.xpose.msk.msra.mxu0 %vm1306_vm12, %v3380_v51 }
 0x943   : > { %3878 = vmatpush.xpose.msk.msra.mxu0 %vm1306_vm12, %v3379_v10 }
 0x947   : > { %3879 = vmatpush.xpose.msk.msra.mxu0 %vm1306_vm12, %v3378_v31 }
 0x94b   : > { %3880 = vmatpush.xpose.msk.msra.mxu0 %vm1306_vm12, %v3377_v23 }
 0x94f   : > { %3881 = vmatpush.xpose.msk.msra.mxu0 %vm1306_vm12, %v3376_v21 }
 0x953   : > { %3882 = vmatpush.xpose.msk.msra.mxu0 %vm1306_vm12, %v3375_v44 }
 0x957   : > { %3883 = vmatpush.xpose.msk.msra.mxu0 %vm1306_vm12, %v3374_v43 }
 0x95b   : > { %3884 = vmatpush.xpose.msk.msra.mxu0 %vm1306_vm12, %v3373_v26 }
 0x95f   : > { %3885 = vmatpush.xpose.msk.msra.mxu0 %vm1306_vm12, %v3372_v16 }
 0x963   : > { %3886 = vmatpush.xpose.msk.msra.mxu0 %vm1306_vm12, %v3371_v18 }
 0x966   : > { %3887 = vmatmul.msk.f32.vlgmr.msra.gmra.mxu0 %vm1306_vm12, %v5661_v52 }
 0x985   : > { %v3390_v59 = vpop.permute.xlu1 %3389 }
 0x986   : > { %v3391_v7 = vrot.slane %v3390_v59, 1 }
 0x9e3   : > { %v3460_v54 = vpop.f32.mrf.mxu0 }
 0x9e4   : > { %v3461_v38 = vadd.f32 %v3460_v54, %v3391_v7 }
 0x9e6   : > { %3463 = vst [vmem:[%s4390_s20] sm:$0x1] %v3461_v38 }
 0x9e7 PF: > { %s3927_s17 = smul.u32 3, %s4219_s29  ;;  %s3477_s22 = sshll.u32 %s4390_s20, 4  ;;  %s3478_s22 = int_to_ptr.vmem [resolvable:$true] %s3477_s22 }
 0x9e8   : > { %s6161_s11 = sld [smem:[#allocation18_spill]]  ;;  %s6162_s7 = sand.u32 1, %s4203_s25  }
 0x9e9   : > { %s3474_s23 = sadd.s32 %s4215_s28, %s3927_s17  ;;  %s3465_s24 = scalar_lea.sflag [#allocation4], %s6162_s7 }
 0x9ee   : > { %s3475_s18 = scalar_lea.hbm %s6161_s11, %s3474_s23  ;;  %s4145_s28 = scalar_lea.hbm %s6161_s11, 6 }
 0x9ef   : > { %s3479_s19 = sshll.u32 %s3475_s18, 4  ;;  %s3480_s19 = int_to_ptr.hbm [resolvable:$true] %s3479_s19 }
 0x9f0   : > { %s4139_s26 = sshra.s32 %s3480_s19, 4  ;;  %s4140_s26 = int_to_ptr.hbm [resolvable:$true] %s4139_s26 }
 0x9f1   : > { %s4141_s27 = scalar_lea.hbm %s4140_s26, 1  ;;  %p4146_p10 = scmp.lt.s32.totalorder %s4140_s26, %s6161_s11 }
 0x9f2   : > { %p4142_p5 = scmp.ne.s32.totalorder %s4140_s26, %s4141_s27  ;;  %p4147_p11 = scmp.lt.s32.totalorder %s4145_s28, %s4141_s27 }
 0x9f4   : > { %p4143_p8 = pnand %p4142_p5, %p4345_p6  ;;  %p4148_p12 = por %p4147_p11, %p4146_p10 }
 0x9f6   : > { %p4144_p9 = pneg %p4143_p8 }
 0x9f8   : > { %p4149_p13 = pnand %p4148_p12, %p4144_p9 }
 0x9fa   : > { %4152 = shalt.err (!%p4149_p13)
}
 0x9fb   : > { %3928 = dma.vmem_to_hbm [thread:$0]  (%p4345_p6), %s3478_s22, 16, %s3480_s19, %s3465_s24  }
 0x9fc PF: > { %s6163_s9 = sld [smem:[#allocation11_spill]] }
 0x9fd   : > { %s6164_s10 = sld [smem:[#allocation6_spill]] }
 0xa02   : > { %p3934_p0 = scmp.ge.s32.totalorder %s6163_s9, 2 }
 0xa03   : > { %s3491_s14 = sand.u32 1, %s6164_s10  }
 0xa04   : > { %p3931_p1 = pnand %p3934_p0, %p4352_p7  ;;  %s3492_s15 = scalar_lea.sflag [#allocation4], %s3491_s14 }
 0xa06   : > { %p3932_p2 = pneg %p3931_p1 }
 0xa08   : > { %4194 = dma.done.wait (%p3932_p2), %s3492_s15, 16  }
 0xa09   : > { %4196 = vsyncadd (%p3932_p2), %s3492_s15, 4294967280  ;;  %s20_s10 = sadd.s32 1, %s6163_s9   ;;  %s6166_s17 = sld [smem:[#allocation7_spill]] }
 0xa0a   : > { %p17_p3 = scmp.ge.s32.totalorder %s20_s10, 14   ;;  %s6167_s26 = sld [smem:[#allocation17_spill]] }
 0xa0b   : > { %s6168_s27 = sld [smem:[#allocation8_spill]]  ;;  %s6174_s24 = smov %s4203_s25 }
 0xa0c   : > { %s6169_s28 = sld [smem:[#allocation9_spill]]  ;;  %19 = sbr.rel (!%p17_p3) target bundleno = 8 (0x8), region = 106 }
 0xa0d   : > { %s6170_s29 = sld [smem:[#allocation10_spill]] }
 0xa0e   : > { %s6171_s30 = sld [smem:[#allocation12_spill]] }
 0xa0f   : > { %s6172_s8 = sld [smem:[#allocation14_spill]]  ;;  %s6175_s25 = smov %s6166_s17 }
 0xa10   : > { %s6173_s9 = sld [smem:[#allocation16_spill]] }
 0xa11   :  { %3497 = vsyncpa [#allocation4], 1 }
 0xa12   :  { %3499 = vsyncpa [#allocation4 + $0x1], 1 }

</bundles_post_ra>
